<compile_context>
chip_gen: v7x
topology: tpu7x:2x2x1
jax: 0.10.0
libtpu: 0.0.40
codegen_flags: <defaults>
</compile_context>

<pallas_src>
import functools

import jax
import jax.numpy as jnp
from jax import lax
from jax.experimental import pallas as pl
from jax.experimental.pallas import tpu as pltpu

KSIZE = 7
PAD = KSIZE // 2


def spatial_attention_kernel(w_ref, x_ref, o_ref, sum_ref, max_ref, att_ref,
                             *, nchan, height, width):
    # Grid: (batch, phase, channel_tile).  phase 0 = channel reduce,
    # phase 1 = conv+sigmoid (first tile only) then apply attention.
    p = pl.program_id(1)
    ci = pl.program_id(2)
    hw = height * width
    tc = x_ref.shape[1]

    x = x_ref[0].astype(jnp.float32)            # (tc, HW), lane-dense

    # ---- Phase 0: accumulate channel sum and channel max -------------------
    @pl.when(p == 0)
    def _reduce():
        @pl.when(ci == 0)
        def _init():
            sum_ref[...] = jnp.zeros(sum_ref.shape, sum_ref.dtype)
            max_ref[...] = jnp.full(max_ref.shape, -jnp.inf, max_ref.dtype)

        if nchan % tc == 0:
            xs, xm = x, x
        else:  # mask the out-of-range channels of a ragged last tile
            ch = ci * tc + lax.broadcasted_iota(jnp.int32, (tc, 1), 0)
            ok = ch < nchan
            xs = jnp.where(ok, x, 0.0)
            xm = jnp.where(ok, x, -jnp.inf)
        sum_ref[...] += jnp.sum(xs, axis=0, keepdims=True)
        max_ref[...] = jnp.maximum(max_ref[...],
                                   jnp.max(xm, axis=0, keepdims=True))

    # ---- Phase 1, first tile: 7x7 conv + sigmoid on the (avg, max) map -----
    @pl.when(jnp.logical_and(p == 1, ci == 0))
    def _attention():
        avg = sum_ref[...] * (1.0 / nchan)       # (1, HW) channel mean
        mx = max_ref[...]                        # (1, HW) channel max

        # Hoist all 98 SMEM scalar weight reads out of the tap loop.
        wa = [w_ref[t] for t in range(KSIZE * KSIZE)]                  # avg ch
        wm = [w_ref[KSIZE * KSIZE + t] for t in range(KSIZE * KSIZE)]  # max ch

        # Row / column validity masks of the zero-padded conv, built once in
        # the flat (1, H*W) layout (y = idx // W, x = idx % W).
        idx = lax.broadcasted_iota(jnp.int32, (1, hw), 1)
        col = idx % width
        row_ok = []
        col_ok = []
        for k in range(KSIZE):
            d = k - PAD
            row_ok.append((idx >= (-d) * width) & (idx < (height - d) * width))
            col_ok.append((col >= -d) & (col < width - d))

        # 7x7 "same" conv as static lane rolls (XLU) + masked MACs.  Four
        # independent accumulators give the VPU parallel add chains.
        accs = [jnp.zeros((1, hw), jnp.float32) for _ in range(4)]
        for ky in range(KSIZE):
            for kx in range(KSIZE):
                t = ky * KSIZE + kx
                d = (ky - PAD) * width + (kx - PAD)   # flat shift, row-major
                shift = (-d) % hw
                if shift == 0:
                    sa, sm = avg, mx
                else:
                    # rolled[i] = map[i + d] (circular); wrapped lanes are
                    # masked off below, reproducing zero padding.
                    sa = pltpu.roll(avg, shift, 1)
                    sm = pltpu.roll(mx, shift, 1)
                tap = wa[t] * sa + wm[t] * sm
                accs[t % 4] += jnp.where(row_ok[ky] & col_ok[kx], tap, 0.0)
        conv = (accs[0] + accs[1]) + (accs[2] + accs[3])
        att_ref[...] = jax.nn.sigmoid(conv)

    # ---- Phase 1: apply attention, lane-dense store -------------------------
    @pl.when(p == 1)
    def _apply():
        o_ref[0] = (x * att_ref[...]).astype(o_ref.dtype)


def spatial_attention(x, conv_weight):
    """x: f32[N, C, H, W]; conv_weight: f32[1, 2, 7, 7] (PyTorch OIHW)."""
    n, c, h, w = x.shape
    hw = h * w
    x_flat = x.reshape(n, c, hw)                              # free, contiguous
    w_flat = conv_weight.astype(jnp.float32).reshape(-1)      # (2*7*7,)

    # Channel tile: largest block <= ~2 MiB so in+out double buffering fits the
    # scoped VMEM budget on every generation while still giving the pipeline
    # multiple steps per batch element to overlap HBM DMA with compute.
    ch_bytes = hw * x.dtype.itemsize
    max_tc = max(1, (2 * 1024 * 1024) // ch_bytes)
    tc = c if c <= max_tc else max(8, (max_tc // 8) * 8)
    ct = pl.cdiv(c, tc)

    block_bytes = tc * hw * x.dtype.itemsize
    vmem_limit = int(min(48 * 1024 * 1024,
                         max(16 * 1024 * 1024, 6 * block_bytes + (2 << 20))))

    kernel = functools.partial(spatial_attention_kernel,
                               nchan=c, height=h, width=w)

    out = pl.pallas_call(
        kernel,
        out_shape=jax.ShapeDtypeStruct((n, c, hw), x.dtype),
        grid_spec=pltpu.PrefetchScalarGridSpec(
            num_scalar_prefetch=0,
            grid=(n, 2, ct),
            in_specs=[
                pl.BlockSpec(memory_space=pltpu.SMEM),             # conv weights
                pl.BlockSpec((1, tc, hw), lambda b, p, ci: (b, ci, 0)),
            ],
            # Phase 0 never writes: pin the out block to (b, 0, 0) so every
            # output block is written back to HBM exactly once (after phase 1).
            out_specs=pl.BlockSpec((1, tc, hw), lambda b, p, ci: (b, ci * p, 0)),
            scratch_shapes=[
                pltpu.VMEM((1, hw), jnp.float32),   # channel sum
                pltpu.VMEM((1, hw), jnp.float32),   # channel max
                pltpu.VMEM((1, hw), jnp.float32),   # sigmoid attention map
            ]),
        compiler_params=pltpu.CompilerParams(
            # Batch axis parallel (megacore); phase/channel axes carry scratch.
            dimension_semantics=("parallel", "arbitrary", "arbitrary"),
            vmem_limit_bytes=vmem_limit),
    )(w_flat, x_flat)
    return out.reshape(n, c, h, w)


def spatial_attention_ref(x, conv_weight):
    """Pure-JAX reference (mirrors the PyTorch module)."""
    avg = jnp.mean(x, axis=1, keepdims=True)
    mx = jnp.max(x, axis=1, keepdims=True)
    cat = jnp.concatenate([avg, mx], axis=1)                   # (N,2,H,W)
    conv = lax.conv_general_dilated(
        cat, conv_weight, window_strides=(1, 1),
        padding=[(PAD, PAD), (PAD, PAD)],
        dimension_numbers=("NCHW", "OIHW", "NCHW"))
    return x * jax.nn.sigmoid(conv)


if __name__ == "__main__":
    key = jax.random.PRNGKey(0)
    k_x, k_w = jax.random.split(key)

    N, C, H, W = 2, 4, 16, 16
    x = jax.random.normal(k_x, (N, C, H, W), dtype=jnp.float32)
    # nn.Conv2d(2, 1, 7, bias=False) weight shape, deterministic.
    conv_weight = 0.1 * jax.random.normal(k_w, (1, 2, KSIZE, KSIZE),
                                          dtype=jnp.float32)

    out = jax.block_until_ready(spatial_attention(x, conv_weight))
    ref = jax.block_until_ready(spatial_attention_ref(x, conv_weight))

    assert out.shape == (N, C, H, W)
    assert jnp.allclose(out, ref, atol=1e-4, rtol=1e-4), "mismatch vs reference"

    print("KERNEL_OK")
</pallas_src>

<mosaic_0001>
module attributes {stable_mosaic.version = 11 : i64} {
  func.func @spatial_attention_kernel(%arg0: i32, %arg1: i32, %arg2: i32, %arg3: memref<98xf32, #tpu.memory_space<smem>>, %arg4: memref<1x4x256xf32, #tpu.memory_space<vmem>>, %arg5: memref<1x4x256xf32, #tpu.memory_space<vmem>>, %arg6: memref<1x256xf32, #tpu.memory_space<vmem>>, %arg7: memref<1x256xf32, #tpu.memory_space<vmem>>, %arg8: memref<1x256xf32, #tpu.memory_space<vmem>>) attributes {dimension_semantics = [#tpu.dimension_semantics<parallel>, #tpu.dimension_semantics<arbitrary>, #tpu.dimension_semantics<arbitrary>], iteration_bounds = array<i64: 2, 2, 1>, scalar_prefetch = 0 : i64, scratch_operands = 3 : i64, tpu.core_type = #tpu.core_type<tc>, window_params = [{transform_indices = @transform_0, window_bounds = array<i64: 98>}, {transform_indices = @transform_1, window_bounds = array<i64: 1, 4, 256>}, {transform_indices = @transform_2, window_bounds = array<i64: 1, 4, 256>}]} {
    %c0 = arith.constant 0 : index
    %c0_0 = arith.constant 0 : index
    %c0_1 = arith.constant 0 : index
    %0 = vector.load %arg4[%c0, %c0_0, %c0_1] : memref<1x4x256xf32, #tpu.memory_space<vmem>>, vector<1x4x256xf32>
    %1 = vector.shape_cast %0 : vector<1x4x256xf32> to vector<4x256xf32>
    %c0_i32 = arith.constant 0 : i32
    %2 = arith.cmpi eq, %arg1, %c0_i32 : i32
    %3 = arith.extui %2 : i1 to i32
    %c0_i32_2 = arith.constant 0 : i32
    %4 = arith.cmpi ne, %3, %c0_i32_2 : i32
    scf.if %4 {
      %c0_i32_7 = arith.constant 0 : i32
      %13 = arith.cmpi eq, %arg2, %c0_i32_7 : i32
      %14 = arith.extui %13 : i1 to i32
      %c0_i32_8 = arith.constant 0 : i32
      %15 = arith.cmpi ne, %14, %c0_i32_8 : i32
      scf.if %15 {
        %cst_18 = arith.constant 0.000000e+00 : f32
        %26 = vector.broadcast %cst_18 : f32 to vector<1x256xf32>
        %c0_19 = arith.constant 0 : index
        %c0_20 = arith.constant 0 : index
        %27 = vector.load %arg6[%c0_19, %c0_20] : memref<1x256xf32, #tpu.memory_space<vmem>>, vector<1x256xf32>
        tpu.vector_store %arg6[%c0_19, %c0_20], %26 {strides = array<i32>} : memref<1x256xf32, #tpu.memory_space<vmem>>, vector<1x256xf32>,
        %cst_21 = arith.constant 0xFF800000 : f32
        %28 = vector.broadcast %cst_21 : f32 to vector<1x256xf32>
        %c0_22 = arith.constant 0 : index
        %c0_23 = arith.constant 0 : index
        %29 = vector.load %arg7[%c0_22, %c0_23] : memref<1x256xf32, #tpu.memory_space<vmem>>, vector<1x256xf32>
        tpu.vector_store %arg7[%c0_22, %c0_23], %28 {strides = array<i32>} : memref<1x256xf32, #tpu.memory_space<vmem>>, vector<1x256xf32>,
      } else {
      }
      %c0_9 = arith.constant 0 : index
      %c0_10 = arith.constant 0 : index
      %16 = vector.load %arg6[%c0_9, %c0_10] : memref<1x256xf32, #tpu.memory_space<vmem>>, vector<1x256xf32>
      %cst = arith.constant dense<0.000000e+00> : vector<256xf32>
      %17 = vector.multi_reduction <add>, %1, %cst [0] : vector<4x256xf32> to vector<256xf32>
      %18 = vector.shape_cast %17 : vector<256xf32> to vector<1x256xf32>
      %19 = arith.addf %16, %18 : vector<1x256xf32>
      %c0_11 = arith.constant 0 : index
      %c0_12 = arith.constant 0 : index
      %20 = vector.load %arg6[%c0_11, %c0_12] : memref<1x256xf32, #tpu.memory_space<vmem>>, vector<1x256xf32>
      tpu.vector_store %arg6[%c0_11, %c0_12], %19 {strides = array<i32>} : memref<1x256xf32, #tpu.memory_space<vmem>>, vector<1x256xf32>,
      %c0_13 = arith.constant 0 : index
      %c0_14 = arith.constant 0 : index
      %21 = vector.load %arg7[%c0_13, %c0_14] : memref<1x256xf32, #tpu.memory_space<vmem>>, vector<1x256xf32>
      %cst_15 = arith.constant dense<0xFF800000> : vector<256xf32>
      %22 = vector.multi_reduction <maximumf>, %1, %cst_15 [0] : vector<4x256xf32> to vector<256xf32>
      %23 = vector.shape_cast %22 : vector<256xf32> to vector<1x256xf32>
      %24 = arith.maximumf %21, %23 : vector<1x256xf32>
      %c0_16 = arith.constant 0 : index
      %c0_17 = arith.constant 0 : index
      %25 = vector.load %arg7[%c0_16, %c0_17] : memref<1x256xf32, #tpu.memory_space<vmem>>, vector<1x256xf32>
      tpu.vector_store %arg7[%c0_16, %c0_17], %24 {strides = array<i32>} : memref<1x256xf32, #tpu.memory_space<vmem>>, vector<1x256xf32>,
    } else {
    }
    %c1_i32 = arith.constant 1 : i32
    %5 = arith.cmpi eq, %arg1, %c1_i32 : i32
    %c0_i32_3 = arith.constant 0 : i32
    %6 = arith.cmpi eq, %arg2, %c0_i32_3 : i32
    %7 = arith.andi %5, %6 : i1
    %8 = arith.extui %7 : i1 to i32
    %c0_i32_4 = arith.constant 0 : i32
    %9 = arith.cmpi ne, %8, %c0_i32_4 : i32
    scf.if %9 {
      %c0_7 = arith.constant 0 : index
      %c0_8 = arith.constant 0 : index
      %13 = vector.load %arg6[%c0_7, %c0_8] : memref<1x256xf32, #tpu.memory_space<vmem>>, vector<1x256xf32>
      %cst = arith.constant 2.500000e-01 : f32
      %14 = vector.broadcast %cst : f32 to vector<1x256xf32>
      %15 = arith.mulf %13, %14 : vector<1x256xf32>
      %c0_9 = arith.constant 0 : index
      %c0_10 = arith.constant 0 : index
      %16 = vector.load %arg7[%c0_9, %c0_10] : memref<1x256xf32, #tpu.memory_space<vmem>>, vector<1x256xf32>
      %c0_11 = arith.constant 0 : index
      %17 = memref.load %arg3[%c0_11] : memref<98xf32, #tpu.memory_space<smem>>
      %c1 = arith.constant 1 : index
      %18 = memref.load %arg3[%c1] : memref<98xf32, #tpu.memory_space<smem>>
      %c2 = arith.constant 2 : index
      %19 = memref.load %arg3[%c2] : memref<98xf32, #tpu.memory_space<smem>>
      %c3 = arith.constant 3 : index
      %20 = memref.load %arg3[%c3] : memref<98xf32, #tpu.memory_space<smem>>
      %c4 = arith.constant 4 : index
      %21 = memref.load %arg3[%c4] : memref<98xf32, #tpu.memory_space<smem>>
      %c5 = arith.constant 5 : index
      %22 = memref.load %arg3[%c5] : memref<98xf32, #tpu.memory_space<smem>>
      %c6 = arith.constant 6 : index
      %23 = memref.load %arg3[%c6] : memref<98xf32, #tpu.memory_space<smem>>
      %c7 = arith.constant 7 : index
      %24 = memref.load %arg3[%c7] : memref<98xf32, #tpu.memory_space<smem>>
      %c8 = arith.constant 8 : index
      %25 = memref.load %arg3[%c8] : memref<98xf32, #tpu.memory_space<smem>>
      %c9 = arith.constant 9 : index
      %26 = memref.load %arg3[%c9] : memref<98xf32, #tpu.memory_space<smem>>
      %c10 = arith.constant 10 : index
      %27 = memref.load %arg3[%c10] : memref<98xf32, #tpu.memory_space<smem>>
      %c11 = arith.constant 11 : index
      %28 = memref.load %arg3[%c11] : memref<98xf32, #tpu.memory_space<smem>>
      %c12 = arith.constant 12 : index
      %29 = memref.load %arg3[%c12] : memref<98xf32, #tpu.memory_space<smem>>
      %c13 = arith.constant 13 : index
      %30 = memref.load %arg3[%c13] : memref<98xf32, #tpu.memory_space<smem>>
      %c14 = arith.constant 14 : index
      %31 = memref.load %arg3[%c14] : memref<98xf32, #tpu.memory_space<smem>>
      %c15 = arith.constant 15 : index
      %32 = memref.load %arg3[%c15] : memref<98xf32, #tpu.memory_space<smem>>
      %c16 = arith.constant 16 : index
      %33 = memref.load %arg3[%c16] : memref<98xf32, #tpu.memory_space<smem>>
      %c17 = arith.constant 17 : index
      %34 = memref.load %arg3[%c17] : memref<98xf32, #tpu.memory_space<smem>>
      %c18 = arith.constant 18 : index
      %35 = memref.load %arg3[%c18] : memref<98xf32, #tpu.memory_space<smem>>
      %c19 = arith.constant 19 : index
      %36 = memref.load %arg3[%c19] : memref<98xf32, #tpu.memory_space<smem>>
      %c20 = arith.constant 20 : index
      %37 = memref.load %arg3[%c20] : memref<98xf32, #tpu.memory_space<smem>>
      %c21 = arith.constant 21 : index
      %38 = memref.load %arg3[%c21] : memref<98xf32, #tpu.memory_space<smem>>
      %c22 = arith.constant 22 : index
      %39 = memref.load %arg3[%c22] : memref<98xf32, #tpu.memory_space<smem>>
      %c23 = arith.constant 23 : index
      %40 = memref.load %arg3[%c23] : memref<98xf32, #tpu.memory_space<smem>>
      %c24 = arith.constant 24 : index
      %41 = memref.load %arg3[%c24] : memref<98xf32, #tpu.memory_space<smem>>
      %c25 = arith.constant 25 : index
      %42 = memref.load %arg3[%c25] : memref<98xf32, #tpu.memory_space<smem>>
      %c26 = arith.constant 26 : index
      %43 = memref.load %arg3[%c26] : memref<98xf32, #tpu.memory_space<smem>>
      %c27 = arith.constant 27 : index
      %44 = memref.load %arg3[%c27] : memref<98xf32, #tpu.memory_space<smem>>
      %c28 = arith.constant 28 : index
      %45 = memref.load %arg3[%c28] : memref<98xf32, #tpu.memory_space<smem>>
      %c29 = arith.constant 29 : index
      %46 = memref.load %arg3[%c29] : memref<98xf32, #tpu.memory_space<smem>>
      %c30 = arith.constant 30 : index
      %47 = memref.load %arg3[%c30] : memref<98xf32, #tpu.memory_space<smem>>
      %c31 = arith.constant 31 : index
      %48 = memref.load %arg3[%c31] : memref<98xf32, #tpu.memory_space<smem>>
      %c32 = arith.constant 32 : index
      %49 = memref.load %arg3[%c32] : memref<98xf32, #tpu.memory_space<smem>>
      %c33 = arith.constant 33 : index
      %50 = memref.load %arg3[%c33] : memref<98xf32, #tpu.memory_space<smem>>
      %c34 = arith.constant 34 : index
      %51 = memref.load %arg3[%c34] : memref<98xf32, #tpu.memory_space<smem>>
      %c35 = arith.constant 35 : index
      %52 = memref.load %arg3[%c35] : memref<98xf32, #tpu.memory_space<smem>>
      %c36 = arith.constant 36 : index
      %53 = memref.load %arg3[%c36] : memref<98xf32, #tpu.memory_space<smem>>
      %c37 = arith.constant 37 : index
      %54 = memref.load %arg3[%c37] : memref<98xf32, #tpu.memory_space<smem>>
      %c38 = arith.constant 38 : index
      %55 = memref.load %arg3[%c38] : memref<98xf32, #tpu.memory_space<smem>>
      %c39 = arith.constant 39 : index
      %56 = memref.load %arg3[%c39] : memref<98xf32, #tpu.memory_space<smem>>
      %c40 = arith.constant 40 : index
      %57 = memref.load %arg3[%c40] : memref<98xf32, #tpu.memory_space<smem>>
      %c41 = arith.constant 41 : index
      %58 = memref.load %arg3[%c41] : memref<98xf32, #tpu.memory_space<smem>>
      %c42 = arith.constant 42 : index
      %59 = memref.load %arg3[%c42] : memref<98xf32, #tpu.memory_space<smem>>
      %c43 = arith.constant 43 : index
      %60 = memref.load %arg3[%c43] : memref<98xf32, #tpu.memory_space<smem>>
      %c44 = arith.constant 44 : index
      %61 = memref.load %arg3[%c44] : memref<98xf32, #tpu.memory_space<smem>>
      %c45 = arith.constant 45 : index
      %62 = memref.load %arg3[%c45] : memref<98xf32, #tpu.memory_space<smem>>
      %c46 = arith.constant 46 : index
      %63 = memref.load %arg3[%c46] : memref<98xf32, #tpu.memory_space<smem>>
      %c47 = arith.constant 47 : index
      %64 = memref.load %arg3[%c47] : memref<98xf32, #tpu.memory_space<smem>>
      %c48 = arith.constant 48 : index
      %65 = memref.load %arg3[%c48] : memref<98xf32, #tpu.memory_space<smem>>
      %c49 = arith.constant 49 : index
      %66 = memref.load %arg3[%c49] : memref<98xf32, #tpu.memory_space<smem>>
      %c50 = arith.constant 50 : index
      %67 = memref.load %arg3[%c50] : memref<98xf32, #tpu.memory_space<smem>>
      %c51 = arith.constant 51 : index
      %68 = memref.load %arg3[%c51] : memref<98xf32, #tpu.memory_space<smem>>
      %c52 = arith.constant 52 : index
      %69 = memref.load %arg3[%c52] : memref<98xf32, #tpu.memory_space<smem>>
      %c53 = arith.constant 53 : index
      %70 = memref.load %arg3[%c53] : memref<98xf32, #tpu.memory_space<smem>>
      %c54 = arith.constant 54 : index
      %71 = memref.load %arg3[%c54] : memref<98xf32, #tpu.memory_space<smem>>
      %c55 = arith.constant 55 : index
      %72 = memref.load %arg3[%c55] : memref<98xf32, #tpu.memory_space<smem>>
      %c56 = arith.constant 56 : index
      %73 = memref.load %arg3[%c56] : memref<98xf32, #tpu.memory_space<smem>>
      %c57 = arith.constant 57 : index
      %74 = memref.load %arg3[%c57] : memref<98xf32, #tpu.memory_space<smem>>
      %c58 = arith.constant 58 : index
      %75 = memref.load %arg3[%c58] : memref<98xf32, #tpu.memory_space<smem>>
      %c59 = arith.constant 59 : index
      %76 = memref.load %arg3[%c59] : memref<98xf32, #tpu.memory_space<smem>>
      %c60 = arith.constant 60 : index
      %77 = memref.load %arg3[%c60] : memref<98xf32, #tpu.memory_space<smem>>
      %c61 = arith.constant 61 : index
      %78 = memref.load %arg3[%c61] : memref<98xf32, #tpu.memory_space<smem>>
      %c62 = arith.constant 62 : index
      %79 = memref.load %arg3[%c62] : memref<98xf32, #tpu.memory_space<smem>>
      %c63 = arith.constant 63 : index
      %80 = memref.load %arg3[%c63] : memref<98xf32, #tpu.memory_space<smem>>
      %c64 = arith.constant 64 : index
      %81 = memref.load %arg3[%c64] : memref<98xf32, #tpu.memory_space<smem>>
      %c65 = arith.constant 65 : index
      %82 = memref.load %arg3[%c65] : memref<98xf32, #tpu.memory_space<smem>>
      %c66 = arith.constant 66 : index
      %83 = memref.load %arg3[%c66] : memref<98xf32, #tpu.memory_space<smem>>
      %c67 = arith.constant 67 : index
      %84 = memref.load %arg3[%c67] : memref<98xf32, #tpu.memory_space<smem>>
      %c68 = arith.constant 68 : index
      %85 = memref.load %arg3[%c68] : memref<98xf32, #tpu.memory_space<smem>>
      %c69 = arith.constant 69 : index
      %86 = memref.load %arg3[%c69] : memref<98xf32, #tpu.memory_space<smem>>
      %c70 = arith.constant 70 : index
      %87 = memref.load %arg3[%c70] : memref<98xf32, #tpu.memory_space<smem>>
      %c71 = arith.constant 71 : index
      %88 = memref.load %arg3[%c71] : memref<98xf32, #tpu.memory_space<smem>>
      %c72 = arith.constant 72 : index
      %89 = memref.load %arg3[%c72] : memref<98xf32, #tpu.memory_space<smem>>
      %c73 = arith.constant 73 : index
      %90 = memref.load %arg3[%c73] : memref<98xf32, #tpu.memory_space<smem>>
      %c74 = arith.constant 74 : index
      %91 = memref.load %arg3[%c74] : memref<98xf32, #tpu.memory_space<smem>>
      %c75 = arith.constant 75 : index
      %92 = memref.load %arg3[%c75] : memref<98xf32, #tpu.memory_space<smem>>
      %c76 = arith.constant 76 : index
      %93 = memref.load %arg3[%c76] : memref<98xf32, #tpu.memory_space<smem>>
      %c77 = arith.constant 77 : index
      %94 = memref.load %arg3[%c77] : memref<98xf32, #tpu.memory_space<smem>>
      %c78 = arith.constant 78 : index
      %95 = memref.load %arg3[%c78] : memref<98xf32, #tpu.memory_space<smem>>
      %c79 = arith.constant 79 : index
      %96 = memref.load %arg3[%c79] : memref<98xf32, #tpu.memory_space<smem>>
      %c80 = arith.constant 80 : index
      %97 = memref.load %arg3[%c80] : memref<98xf32, #tpu.memory_space<smem>>
      %c81 = arith.constant 81 : index
      %98 = memref.load %arg3[%c81] : memref<98xf32, #tpu.memory_space<smem>>
      %c82 = arith.constant 82 : index
      %99 = memref.load %arg3[%c82] : memref<98xf32, #tpu.memory_space<smem>>
      %c83 = arith.constant 83 : index
      %100 = memref.load %arg3[%c83] : memref<98xf32, #tpu.memory_space<smem>>
      %c84 = arith.constant 84 : index
      %101 = memref.load %arg3[%c84] : memref<98xf32, #tpu.memory_space<smem>>
      %c85 = arith.constant 85 : index
      %102 = memref.load %arg3[%c85] : memref<98xf32, #tpu.memory_space<smem>>
      %c86 = arith.constant 86 : index
      %103 = memref.load %arg3[%c86] : memref<98xf32, #tpu.memory_space<smem>>
      %c87 = arith.constant 87 : index
      %104 = memref.load %arg3[%c87] : memref<98xf32, #tpu.memory_space<smem>>
      %c88 = arith.constant 88 : index
      %105 = memref.load %arg3[%c88] : memref<98xf32, #tpu.memory_space<smem>>
      %c89 = arith.constant 89 : index
      %106 = memref.load %arg3[%c89] : memref<98xf32, #tpu.memory_space<smem>>
      %c90 = arith.constant 90 : index
      %107 = memref.load %arg3[%c90] : memref<98xf32, #tpu.memory_space<smem>>
      %c91 = arith.constant 91 : index
      %108 = memref.load %arg3[%c91] : memref<98xf32, #tpu.memory_space<smem>>
      %c92 = arith.constant 92 : index
      %109 = memref.load %arg3[%c92] : memref<98xf32, #tpu.memory_space<smem>>
      %c93 = arith.constant 93 : index
      %110 = memref.load %arg3[%c93] : memref<98xf32, #tpu.memory_space<smem>>
      %c94 = arith.constant 94 : index
      %111 = memref.load %arg3[%c94] : memref<98xf32, #tpu.memory_space<smem>>
      %c95 = arith.constant 95 : index
      %112 = memref.load %arg3[%c95] : memref<98xf32, #tpu.memory_space<smem>>
      %c96 = arith.constant 96 : index
      %113 = memref.load %arg3[%c96] : memref<98xf32, #tpu.memory_space<smem>>
      %c97 = arith.constant 97 : index
      %114 = memref.load %arg3[%c97] : memref<98xf32, #tpu.memory_space<smem>>
      %115 = tpu.iota {dimensions = array<i32: 1>} : vector<1x256xi32>
      %c16_i32 = arith.constant 16 : i32
      %c0_i32_12 = arith.constant 0 : i32
      %116 = arith.cmpi eq, %c16_i32, %c0_i32_12 : i32
      %c1_i32_13 = arith.constant 1 : i32
      %117 = arith.select %116, %c1_i32_13, %c16_i32 : i32
      %118 = vector.broadcast %117 : i32 to vector<1x256xi32>
      %119 = arith.remsi %115, %118 : vector<1x256xi32>
      %c0_i32_14 = arith.constant 0 : i32
      %120 = vector.broadcast %c0_i32_14 : i32 to vector<1x256xi32>
      %121 = arith.cmpi ne, %119, %120 : vector<1x256xi32>
      %c0_i32_15 = arith.constant 0 : i32
      %122 = vector.broadcast %c0_i32_15 : i32 to vector<1x256xi32>
      %123 = arith.cmpi slt, %119, %122 : vector<1x256xi32>
      %c0_i32_16 = arith.constant 0 : i32
      %124 = arith.cmpi slt, %117, %c0_i32_16 : i32
      %125 = vector.broadcast %124 : i1 to vector<1x256xi1>
      %126 = vector.broadcast %125 : vector<1x256xi1> to vector<1x256xi1>
      %127 = arith.xori %123, %126 : vector<1x256xi1>
      %128 = arith.andi %127, %121 : vector<1x256xi1>
      %129 = vector.broadcast %117 : i32 to vector<1x256xi32>
      %130 = arith.addi %119, %129 : vector<1x256xi32>
      %131 = arith.select %128, %130, %119 : vector<1x256xi1>, vector<1x256xi32>
      %c48_i32 = arith.constant 48 : i32
      %132 = vector.broadcast %c48_i32 : i32 to vector<1x256xi32>
      %133 = arith.cmpi sge, %115, %132 : vector<1x256xi32>
      %c304_i32 = arith.constant 304 : i32
      %134 = vector.broadcast %c304_i32 : i32 to vector<1x256xi32>
      %135 = arith.cmpi slt, %115, %134 : vector<1x256xi32>
      %136 = arith.andi %133, %135 : vector<1x256xi1>
      %c3_i32 = arith.constant 3 : i32
      %137 = vector.broadcast %c3_i32 : i32 to vector<1x256xi32>
      %138 = arith.cmpi sge, %131, %137 : vector<1x256xi32>
      %c19_i32 = arith.constant 19 : i32
      %139 = vector.broadcast %c19_i32 : i32 to vector<1x256xi32>
      %140 = arith.cmpi slt, %131, %139 : vector<1x256xi32>
      %141 = arith.andi %138, %140 : vector<1x256xi1>
      %c32_i32 = arith.constant 32 : i32
      %142 = vector.broadcast %c32_i32 : i32 to vector<1x256xi32>
      %143 = arith.cmpi sge, %115, %142 : vector<1x256xi32>
      %c288_i32 = arith.constant 288 : i32
      %144 = vector.broadcast %c288_i32 : i32 to vector<1x256xi32>
      %145 = arith.cmpi slt, %115, %144 : vector<1x256xi32>
      %146 = arith.andi %143, %145 : vector<1x256xi1>
      %c2_i32 = arith.constant 2 : i32
      %147 = vector.broadcast %c2_i32 : i32 to vector<1x256xi32>
      %148 = arith.cmpi sge, %131, %147 : vector<1x256xi32>
      %c18_i32 = arith.constant 18 : i32
      %149 = vector.broadcast %c18_i32 : i32 to vector<1x256xi32>
      %150 = arith.cmpi slt, %131, %149 : vector<1x256xi32>
      %151 = arith.andi %148, %150 : vector<1x256xi1>
      %c16_i32_17 = arith.constant 16 : i32
      %152 = vector.broadcast %c16_i32_17 : i32 to vector<1x256xi32>
      %153 = arith.cmpi sge, %115, %152 : vector<1x256xi32>
      %c272_i32 = arith.constant 272 : i32
      %154 = vector.broadcast %c272_i32 : i32 to vector<1x256xi32>
      %155 = arith.cmpi slt, %115, %154 : vector<1x256xi32>
      %156 = arith.andi %153, %155 : vector<1x256xi1>
      %c1_i32_18 = arith.constant 1 : i32
      %157 = vector.broadcast %c1_i32_18 : i32 to vector<1x256xi32>
      %158 = arith.cmpi sge, %131, %157 : vector<1x256xi32>
      %c17_i32 = arith.constant 17 : i32
      %159 = vector.broadcast %c17_i32 : i32 to vector<1x256xi32>
      %160 = arith.cmpi slt, %131, %159 : vector<1x256xi32>
      %161 = arith.andi %158, %160 : vector<1x256xi1>
      %c0_i32_19 = arith.constant 0 : i32
      %162 = vector.broadcast %c0_i32_19 : i32 to vector<1x256xi32>
      %163 = arith.cmpi sge, %115, %162 : vector<1x256xi32>
      %c256_i32 = arith.constant 256 : i32
      %164 = vector.broadcast %c256_i32 : i32 to vector<1x256xi32>
      %165 = arith.cmpi slt, %115, %164 : vector<1x256xi32>
      %166 = arith.andi %163, %165 : vector<1x256xi1>
      %c0_i32_20 = arith.constant 0 : i32
      %167 = vector.broadcast %c0_i32_20 : i32 to vector<1x256xi32>
      %168 = arith.cmpi sge, %131, %167 : vector<1x256xi32>
      %c16_i32_21 = arith.constant 16 : i32
      %169 = vector.broadcast %c16_i32_21 : i32 to vector<1x256xi32>
      %170 = arith.cmpi slt, %131, %169 : vector<1x256xi32>
      %171 = arith.andi %168, %170 : vector<1x256xi1>
      %c-16_i32 = arith.constant -16 : i32
      %172 = vector.broadcast %c-16_i32 : i32 to vector<1x256xi32>
      %173 = arith.cmpi sge, %115, %172 : vector<1x256xi32>
      %c240_i32 = arith.constant 240 : i32
      %174 = vector.broadcast %c240_i32 : i32 to vector<1x256xi32>
      %175 = arith.cmpi slt, %115, %174 : vector<1x256xi32>
      %176 = arith.andi %173, %175 : vector<1x256xi1>
      %c-1_i32 = arith.constant -1 : i32
      %177 = vector.broadcast %c-1_i32 : i32 to vector<1x256xi32>
      %178 = arith.cmpi sge, %131, %177 : vector<1x256xi32>
      %c15_i32 = arith.constant 15 : i32
      %179 = vector.broadcast %c15_i32 : i32 to vector<1x256xi32>
      %180 = arith.cmpi slt, %131, %179 : vector<1x256xi32>
      %181 = arith.andi %178, %180 : vector<1x256xi1>
      %c-32_i32 = arith.constant -32 : i32
      %182 = vector.broadcast %c-32_i32 : i32 to vector<1x256xi32>
      %183 = arith.cmpi sge, %115, %182 : vector<1x256xi32>
      %c224_i32 = arith.constant 224 : i32
      %184 = vector.broadcast %c224_i32 : i32 to vector<1x256xi32>
      %185 = arith.cmpi slt, %115, %184 : vector<1x256xi32>
      %186 = arith.andi %183, %185 : vector<1x256xi1>
      %c-2_i32 = arith.constant -2 : i32
      %187 = vector.broadcast %c-2_i32 : i32 to vector<1x256xi32>
      %188 = arith.cmpi sge, %131, %187 : vector<1x256xi32>
      %c14_i32 = arith.constant 14 : i32
      %189 = vector.broadcast %c14_i32 : i32 to vector<1x256xi32>
      %190 = arith.cmpi slt, %131, %189 : vector<1x256xi32>
      %191 = arith.andi %188, %190 : vector<1x256xi1>
      %c-48_i32 = arith.constant -48 : i32
      %192 = vector.broadcast %c-48_i32 : i32 to vector<1x256xi32>
      %193 = arith.cmpi sge, %115, %192 : vector<1x256xi32>
      %c208_i32 = arith.constant 208 : i32
      %194 = vector.broadcast %c208_i32 : i32 to vector<1x256xi32>
      %195 = arith.cmpi slt, %115, %194 : vector<1x256xi32>
      %196 = arith.andi %193, %195 : vector<1x256xi1>
      %c-3_i32 = arith.constant -3 : i32
      %197 = vector.broadcast %c-3_i32 : i32 to vector<1x256xi32>
      %198 = arith.cmpi sge, %131, %197 : vector<1x256xi32>
      %c13_i32 = arith.constant 13 : i32
      %199 = vector.broadcast %c13_i32 : i32 to vector<1x256xi32>
      %200 = arith.cmpi slt, %131, %199 : vector<1x256xi32>
      %201 = arith.andi %198, %200 : vector<1x256xi1>
      %cst_22 = arith.constant 0.000000e+00 : f32
      %202 = vector.broadcast %cst_22 : f32 to vector<1x256xf32>
      %cst_23 = arith.constant 0.000000e+00 : f32
      %203 = vector.broadcast %cst_23 : f32 to vector<1x256xf32>
      %cst_24 = arith.constant 0.000000e+00 : f32
      %204 = vector.broadcast %cst_24 : f32 to vector<1x256xf32>
      %cst_25 = arith.constant 0.000000e+00 : f32
      %205 = vector.broadcast %cst_25 : f32 to vector<1x256xf32>
      %c51_i32 = arith.constant 51 : i32
      %206 = tpu.dynamic_rotate %15 by %c51_i32 dim 1 : vector<1x256xf32>, i32 -> vector<1x256xf32>
      %c51_i32_26 = arith.constant 51 : i32
      %207 = tpu.dynamic_rotate %16 by %c51_i32_26 dim 1 : vector<1x256xf32>, i32 -> vector<1x256xf32>
      %208 = vector.broadcast %17 : f32 to vector<1x256xf32>
      %209 = arith.mulf %208, %206 : vector<1x256xf32>
      %210 = vector.broadcast %66 : f32 to vector<1x256xf32>
      %211 = arith.mulf %210, %207 : vector<1x256xf32>
      %212 = arith.addf %209, %211 : vector<1x256xf32>
      %213 = arith.andi %136, %141 : vector<1x256xi1>
      %cst_27 = arith.constant 0.000000e+00 : f32
      %214 = vector.broadcast %cst_27 : f32 to vector<1x256xf32>
      %215 = arith.select %213, %212, %214 : vector<1x256xi1>, vector<1x256xf32>
      %216 = arith.addf %202, %215 : vector<1x256xf32>
      %c50_i32 = arith.constant 50 : i32
      %217 = tpu.dynamic_rotate %15 by %c50_i32 dim 1 : vector<1x256xf32>, i32 -> vector<1x256xf32>
      %c50_i32_28 = arith.constant 50 : i32
      %218 = tpu.dynamic_rotate %16 by %c50_i32_28 dim 1 : vector<1x256xf32>, i32 -> vector<1x256xf32>
      %219 = vector.broadcast %18 : f32 to vector<1x256xf32>
      %220 = arith.mulf %219, %217 : vector<1x256xf32>
      %221 = vector.broadcast %67 : f32 to vector<1x256xf32>
      %222 = arith.mulf %221, %218 : vector<1x256xf32>
      %223 = arith.addf %220, %222 : vector<1x256xf32>
      %224 = arith.andi %136, %151 : vector<1x256xi1>
      %cst_29 = arith.constant 0.000000e+00 : f32
      %225 = vector.broadcast %cst_29 : f32 to vector<1x256xf32>
      %226 = arith.select %224, %223, %225 : vector<1x256xi1>, vector<1x256xf32>
      %227 = arith.addf %203, %226 : vector<1x256xf32>
      %c49_i32 = arith.constant 49 : i32
      %228 = tpu.dynamic_rotate %15 by %c49_i32 dim 1 : vector<1x256xf32>, i32 -> vector<1x256xf32>
      %c49_i32_30 = arith.constant 49 : i32
      %229 = tpu.dynamic_rotate %16 by %c49_i32_30 dim 1 : vector<1x256xf32>, i32 -> vector<1x256xf32>
      %230 = vector.broadcast %19 : f32 to vector<1x256xf32>
      %231 = arith.mulf %230, %228 : vector<1x256xf32>
      %232 = vector.broadcast %68 : f32 to vector<1x256xf32>
      %233 = arith.mulf %232, %229 : vector<1x256xf32>
      %234 = arith.addf %231, %233 : vector<1x256xf32>
      %235 = arith.andi %136, %161 : vector<1x256xi1>
      %cst_31 = arith.constant 0.000000e+00 : f32
      %236 = vector.broadcast %cst_31 : f32 to vector<1x256xf32>
      %237 = arith.select %235, %234, %236 : vector<1x256xi1>, vector<1x256xf32>
      %238 = arith.addf %204, %237 : vector<1x256xf32>
      %c48_i32_32 = arith.constant 48 : i32
      %239 = tpu.dynamic_rotate %15 by %c48_i32_32 dim 1 : vector<1x256xf32>, i32 -> vector<1x256xf32>
      %c48_i32_33 = arith.constant 48 : i32
      %240 = tpu.dynamic_rotate %16 by %c48_i32_33 dim 1 : vector<1x256xf32>, i32 -> vector<1x256xf32>
      %241 = vector.broadcast %20 : f32 to vector<1x256xf32>
      %242 = arith.mulf %241, %239 : vector<1x256xf32>
      %243 = vector.broadcast %69 : f32 to vector<1x256xf32>
      %244 = arith.mulf %243, %240 : vector<1x256xf32>
      %245 = arith.addf %242, %244 : vector<1x256xf32>
      %246 = arith.andi %136, %171 : vector<1x256xi1>
      %cst_34 = arith.constant 0.000000e+00 : f32
      %247 = vector.broadcast %cst_34 : f32 to vector<1x256xf32>
      %248 = arith.select %246, %245, %247 : vector<1x256xi1>, vector<1x256xf32>
      %249 = arith.addf %205, %248 : vector<1x256xf32>
      %c47_i32 = arith.constant 47 : i32
      %250 = tpu.dynamic_rotate %15 by %c47_i32 dim 1 : vector<1x256xf32>, i32 -> vector<1x256xf32>
      %c47_i32_35 = arith.constant 47 : i32
      %251 = tpu.dynamic_rotate %16 by %c47_i32_35 dim 1 : vector<1x256xf32>, i32 -> vector<1x256xf32>
      %252 = vector.broadcast %21 : f32 to vector<1x256xf32>
      %253 = arith.mulf %252, %250 : vector<1x256xf32>
      %254 = vector.broadcast %70 : f32 to vector<1x256xf32>
      %255 = arith.mulf %254, %251 : vector<1x256xf32>
      %256 = arith.addf %253, %255 : vector<1x256xf32>
      %257 = arith.andi %136, %181 : vector<1x256xi1>
      %cst_36 = arith.constant 0.000000e+00 : f32
      %258 = vector.broadcast %cst_36 : f32 to vector<1x256xf32>
      %259 = arith.select %257, %256, %258 : vector<1x256xi1>, vector<1x256xf32>
      %260 = arith.addf %216, %259 : vector<1x256xf32>
      %c46_i32 = arith.constant 46 : i32
      %261 = tpu.dynamic_rotate %15 by %c46_i32 dim 1 : vector<1x256xf32>, i32 -> vector<1x256xf32>
      %c46_i32_37 = arith.constant 46 : i32
      %262 = tpu.dynamic_rotate %16 by %c46_i32_37 dim 1 : vector<1x256xf32>, i32 -> vector<1x256xf32>
      %263 = vector.broadcast %22 : f32 to vector<1x256xf32>
      %264 = arith.mulf %263, %261 : vector<1x256xf32>
      %265 = vector.broadcast %71 : f32 to vector<1x256xf32>
      %266 = arith.mulf %265, %262 : vector<1x256xf32>
      %267 = arith.addf %264, %266 : vector<1x256xf32>
      %268 = arith.andi %136, %191 : vector<1x256xi1>
      %cst_38 = arith.constant 0.000000e+00 : f32
      %269 = vector.broadcast %cst_38 : f32 to vector<1x256xf32>
      %270 = arith.select %268, %267, %269 : vector<1x256xi1>, vector<1x256xf32>
      %271 = arith.addf %227, %270 : vector<1x256xf32>
      %c45_i32 = arith.constant 45 : i32
      %272 = tpu.dynamic_rotate %15 by %c45_i32 dim 1 : vector<1x256xf32>, i32 -> vector<1x256xf32>
      %c45_i32_39 = arith.constant 45 : i32
      %273 = tpu.dynamic_rotate %16 by %c45_i32_39 dim 1 : vector<1x256xf32>, i32 -> vector<1x256xf32>
      %274 = vector.broadcast %23 : f32 to vector<1x256xf32>
      %275 = arith.mulf %274, %272 : vector<1x256xf32>
      %276 = vector.broadcast %72 : f32 to vector<1x256xf32>
      %277 = arith.mulf %276, %273 : vector<1x256xf32>
      %278 = arith.addf %275, %277 : vector<1x256xf32>
      %279 = arith.andi %136, %201 : vector<1x256xi1>
      %cst_40 = arith.constant 0.000000e+00 : f32
      %280 = vector.broadcast %cst_40 : f32 to vector<1x256xf32>
      %281 = arith.select %279, %278, %280 : vector<1x256xi1>, vector<1x256xf32>
      %282 = arith.addf %238, %281 : vector<1x256xf32>
      %c35_i32 = arith.constant 35 : i32
      %283 = tpu.dynamic_rotate %15 by %c35_i32 dim 1 : vector<1x256xf32>, i32 -> vector<1x256xf32>
      %c35_i32_41 = arith.constant 35 : i32
      %284 = tpu.dynamic_rotate %16 by %c35_i32_41 dim 1 : vector<1x256xf32>, i32 -> vector<1x256xf32>
      %285 = vector.broadcast %24 : f32 to vector<1x256xf32>
      %286 = arith.mulf %285, %283 : vector<1x256xf32>
      %287 = vector.broadcast %73 : f32 to vector<1x256xf32>
      %288 = arith.mulf %287, %284 : vector<1x256xf32>
      %289 = arith.addf %286, %288 : vector<1x256xf32>
      %290 = arith.andi %146, %141 : vector<1x256xi1>
      %cst_42 = arith.constant 0.000000e+00 : f32
      %291 = vector.broadcast %cst_42 : f32 to vector<1x256xf32>
      %292 = arith.select %290, %289, %291 : vector<1x256xi1>, vector<1x256xf32>
      %293 = arith.addf %249, %292 : vector<1x256xf32>
      %c34_i32 = arith.constant 34 : i32
      %294 = tpu.dynamic_rotate %15 by %c34_i32 dim 1 : vector<1x256xf32>, i32 -> vector<1x256xf32>
      %c34_i32_43 = arith.constant 34 : i32
      %295 = tpu.dynamic_rotate %16 by %c34_i32_43 dim 1 : vector<1x256xf32>, i32 -> vector<1x256xf32>
      %296 = vector.broadcast %25 : f32 to vector<1x256xf32>
      %297 = arith.mulf %296, %294 : vector<1x256xf32>
      %298 = vector.broadcast %74 : f32 to vector<1x256xf32>
      %299 = arith.mulf %298, %295 : vector<1x256xf32>
      %300 = arith.addf %297, %299 : vector<1x256xf32>
      %301 = arith.andi %146, %151 : vector<1x256xi1>
      %cst_44 = arith.constant 0.000000e+00 : f32
      %302 = vector.broadcast %cst_44 : f32 to vector<1x256xf32>
      %303 = arith.select %301, %300, %302 : vector<1x256xi1>, vector<1x256xf32>
      %304 = arith.addf %260, %303 : vector<1x256xf32>
      %c33_i32 = arith.constant 33 : i32
      %305 = tpu.dynamic_rotate %15 by %c33_i32 dim 1 : vector<1x256xf32>, i32 -> vector<1x256xf32>
      %c33_i32_45 = arith.constant 33 : i32
      %306 = tpu.dynamic_rotate %16 by %c33_i32_45 dim 1 : vector<1x256xf32>, i32 -> vector<1x256xf32>
      %307 = vector.broadcast %26 : f32 to vector<1x256xf32>
      %308 = arith.mulf %307, %305 : vector<1x256xf32>
      %309 = vector.broadcast %75 : f32 to vector<1x256xf32>
      %310 = arith.mulf %309, %306 : vector<1x256xf32>
      %311 = arith.addf %308, %310 : vector<1x256xf32>
      %312 = arith.andi %146, %161 : vector<1x256xi1>
      %cst_46 = arith.constant 0.000000e+00 : f32
      %313 = vector.broadcast %cst_46 : f32 to vector<1x256xf32>
      %314 = arith.select %312, %311, %313 : vector<1x256xi1>, vector<1x256xf32>
      %315 = arith.addf %271, %314 : vector<1x256xf32>
      %c32_i32_47 = arith.constant 32 : i32
      %316 = tpu.dynamic_rotate %15 by %c32_i32_47 dim 1 : vector<1x256xf32>, i32 -> vector<1x256xf32>
      %c32_i32_48 = arith.constant 32 : i32
      %317 = tpu.dynamic_rotate %16 by %c32_i32_48 dim 1 : vector<1x256xf32>, i32 -> vector<1x256xf32>
      %318 = vector.broadcast %27 : f32 to vector<1x256xf32>
      %319 = arith.mulf %318, %316 : vector<1x256xf32>
      %320 = vector.broadcast %76 : f32 to vector<1x256xf32>
      %321 = arith.mulf %320, %317 : vector<1x256xf32>
      %322 = arith.addf %319, %321 : vector<1x256xf32>
      %323 = arith.andi %146, %171 : vector<1x256xi1>
      %cst_49 = arith.constant 0.000000e+00 : f32
      %324 = vector.broadcast %cst_49 : f32 to vector<1x256xf32>
      %325 = arith.select %323, %322, %324 : vector<1x256xi1>, vector<1x256xf32>
      %326 = arith.addf %282, %325 : vector<1x256xf32>
      %c31_i32 = arith.constant 31 : i32
      %327 = tpu.dynamic_rotate %15 by %c31_i32 dim 1 : vector<1x256xf32>, i32 -> vector<1x256xf32>
      %c31_i32_50 = arith.constant 31 : i32
      %328 = tpu.dynamic_rotate %16 by %c31_i32_50 dim 1 : vector<1x256xf32>, i32 -> vector<1x256xf32>
      %329 = vector.broadcast %28 : f32 to vector<1x256xf32>
      %330 = arith.mulf %329, %327 : vector<1x256xf32>
      %331 = vector.broadcast %77 : f32 to vector<1x256xf32>
      %332 = arith.mulf %331, %328 : vector<1x256xf32>
      %333 = arith.addf %330, %332 : vector<1x256xf32>
      %334 = arith.andi %146, %181 : vector<1x256xi1>
      %cst_51 = arith.constant 0.000000e+00 : f32
      %335 = vector.broadcast %cst_51 : f32 to vector<1x256xf32>
      %336 = arith.select %334, %333, %335 : vector<1x256xi1>, vector<1x256xf32>
      %337 = arith.addf %293, %336 : vector<1x256xf32>
      %c30_i32 = arith.constant 30 : i32
      %338 = tpu.dynamic_rotate %15 by %c30_i32 dim 1 : vector<1x256xf32>, i32 -> vector<1x256xf32>
      %c30_i32_52 = arith.constant 30 : i32
      %339 = tpu.dynamic_rotate %16 by %c30_i32_52 dim 1 : vector<1x256xf32>, i32 -> vector<1x256xf32>
      %340 = vector.broadcast %29 : f32 to vector<1x256xf32>
      %341 = arith.mulf %340, %338 : vector<1x256xf32>
      %342 = vector.broadcast %78 : f32 to vector<1x256xf32>
      %343 = arith.mulf %342, %339 : vector<1x256xf32>
      %344 = arith.addf %341, %343 : vector<1x256xf32>
      %345 = arith.andi %146, %191 : vector<1x256xi1>
      %cst_53 = arith.constant 0.000000e+00 : f32
      %346 = vector.broadcast %cst_53 : f32 to vector<1x256xf32>
      %347 = arith.select %345, %344, %346 : vector<1x256xi1>, vector<1x256xf32>
      %348 = arith.addf %304, %347 : vector<1x256xf32>
      %c29_i32 = arith.constant 29 : i32
      %349 = tpu.dynamic_rotate %15 by %c29_i32 dim 1 : vector<1x256xf32>, i32 -> vector<1x256xf32>
      %c29_i32_54 = arith.constant 29 : i32
      %350 = tpu.dynamic_rotate %16 by %c29_i32_54 dim 1 : vector<1x256xf32>, i32 -> vector<1x256xf32>
      %351 = vector.broadcast %30 : f32 to vector<1x256xf32>
      %352 = arith.mulf %351, %349 : vector<1x256xf32>
      %353 = vector.broadcast %79 : f32 to vector<1x256xf32>
      %354 = arith.mulf %353, %350 : vector<1x256xf32>
      %355 = arith.addf %352, %354 : vector<1x256xf32>
      %356 = arith.andi %146, %201 : vector<1x256xi1>
      %cst_55 = arith.constant 0.000000e+00 : f32
      %357 = vector.broadcast %cst_55 : f32 to vector<1x256xf32>
      %358 = arith.select %356, %355, %357 : vector<1x256xi1>, vector<1x256xf32>
      %359 = arith.addf %315, %358 : vector<1x256xf32>
      %c19_i32_56 = arith.constant 19 : i32
      %360 = tpu.dynamic_rotate %15 by %c19_i32_56 dim 1 : vector<1x256xf32>, i32 -> vector<1x256xf32>
      %c19_i32_57 = arith.constant 19 : i32
      %361 = tpu.dynamic_rotate %16 by %c19_i32_57 dim 1 : vector<1x256xf32>, i32 -> vector<1x256xf32>
      %362 = vector.broadcast %31 : f32 to vector<1x256xf32>
      %363 = arith.mulf %362, %360 : vector<1x256xf32>
      %364 = vector.broadcast %80 : f32 to vector<1x256xf32>
      %365 = arith.mulf %364, %361 : vector<1x256xf32>
      %366 = arith.addf %363, %365 : vector<1x256xf32>
      %367 = arith.andi %156, %141 : vector<1x256xi1>
      %cst_58 = arith.constant 0.000000e+00 : f32
      %368 = vector.broadcast %cst_58 : f32 to vector<1x256xf32>
      %369 = arith.select %367, %366, %368 : vector<1x256xi1>, vector<1x256xf32>
      %370 = arith.addf %326, %369 : vector<1x256xf32>
      %c18_i32_59 = arith.constant 18 : i32
      %371 = tpu.dynamic_rotate %15 by %c18_i32_59 dim 1 : vector<1x256xf32>, i32 -> vector<1x256xf32>
      %c18_i32_60 = arith.constant 18 : i32
      %372 = tpu.dynamic_rotate %16 by %c18_i32_60 dim 1 : vector<1x256xf32>, i32 -> vector<1x256xf32>
      %373 = vector.broadcast %32 : f32 to vector<1x256xf32>
      %374 = arith.mulf %373, %371 : vector<1x256xf32>
      %375 = vector.broadcast %81 : f32 to vector<1x256xf32>
      %376 = arith.mulf %375, %372 : vector<1x256xf32>
      %377 = arith.addf %374, %376 : vector<1x256xf32>
      %378 = arith.andi %156, %151 : vector<1x256xi1>
      %cst_61 = arith.constant 0.000000e+00 : f32
      %379 = vector.broadcast %cst_61 : f32 to vector<1x256xf32>
      %380 = arith.select %378, %377, %379 : vector<1x256xi1>, vector<1x256xf32>
      %381 = arith.addf %337, %380 : vector<1x256xf32>
      %c17_i32_62 = arith.constant 17 : i32
      %382 = tpu.dynamic_rotate %15 by %c17_i32_62 dim 1 : vector<1x256xf32>, i32 -> vector<1x256xf32>
      %c17_i32_63 = arith.constant 17 : i32
      %383 = tpu.dynamic_rotate %16 by %c17_i32_63 dim 1 : vector<1x256xf32>, i32 -> vector<1x256xf32>
      %384 = vector.broadcast %33 : f32 to vector<1x256xf32>
      %385 = arith.mulf %384, %382 : vector<1x256xf32>
      %386 = vector.broadcast %82 : f32 to vector<1x256xf32>
      %387 = arith.mulf %386, %383 : vector<1x256xf32>
      %388 = arith.addf %385, %387 : vector<1x256xf32>
      %389 = arith.andi %156, %161 : vector<1x256xi1>
      %cst_64 = arith.constant 0.000000e+00 : f32
      %390 = vector.broadcast %cst_64 : f32 to vector<1x256xf32>
      %391 = arith.select %389, %388, %390 : vector<1x256xi1>, vector<1x256xf32>
      %392 = arith.addf %348, %391 : vector<1x256xf32>
      %c16_i32_65 = arith.constant 16 : i32
      %393 = tpu.dynamic_rotate %15 by %c16_i32_65 dim 1 : vector<1x256xf32>, i32 -> vector<1x256xf32>
      %c16_i32_66 = arith.constant 16 : i32
      %394 = tpu.dynamic_rotate %16 by %c16_i32_66 dim 1 : vector<1x256xf32>, i32 -> vector<1x256xf32>
      %395 = vector.broadcast %34 : f32 to vector<1x256xf32>
      %396 = arith.mulf %395, %393 : vector<1x256xf32>
      %397 = vector.broadcast %83 : f32 to vector<1x256xf32>
      %398 = arith.mulf %397, %394 : vector<1x256xf32>
      %399 = arith.addf %396, %398 : vector<1x256xf32>
      %400 = arith.andi %156, %171 : vector<1x256xi1>
      %cst_67 = arith.constant 0.000000e+00 : f32
      %401 = vector.broadcast %cst_67 : f32 to vector<1x256xf32>
      %402 = arith.select %400, %399, %401 : vector<1x256xi1>, vector<1x256xf32>
      %403 = arith.addf %359, %402 : vector<1x256xf32>
      %c15_i32_68 = arith.constant 15 : i32
      %404 = tpu.dynamic_rotate %15 by %c15_i32_68 dim 1 : vector<1x256xf32>, i32 -> vector<1x256xf32>
      %c15_i32_69 = arith.constant 15 : i32
      %405 = tpu.dynamic_rotate %16 by %c15_i32_69 dim 1 : vector<1x256xf32>, i32 -> vector<1x256xf32>
      %406 = vector.broadcast %35 : f32 to vector<1x256xf32>
      %407 = arith.mulf %406, %404 : vector<1x256xf32>
      %408 = vector.broadcast %84 : f32 to vector<1x256xf32>
      %409 = arith.mulf %408, %405 : vector<1x256xf32>
      %410 = arith.addf %407, %409 : vector<1x256xf32>
      %411 = arith.andi %156, %181 : vector<1x256xi1>
      %cst_70 = arith.constant 0.000000e+00 : f32
      %412 = vector.broadcast %cst_70 : f32 to vector<1x256xf32>
      %413 = arith.select %411, %410, %412 : vector<1x256xi1>, vector<1x256xf32>
      %414 = arith.addf %370, %413 : vector<1x256xf32>
      %c14_i32_71 = arith.constant 14 : i32
      %415 = tpu.dynamic_rotate %15 by %c14_i32_71 dim 1 : vector<1x256xf32>, i32 -> vector<1x256xf32>
      %c14_i32_72 = arith.constant 14 : i32
      %416 = tpu.dynamic_rotate %16 by %c14_i32_72 dim 1 : vector<1x256xf32>, i32 -> vector<1x256xf32>
      %417 = vector.broadcast %36 : f32 to vector<1x256xf32>
      %418 = arith.mulf %417, %415 : vector<1x256xf32>
      %419 = vector.broadcast %85 : f32 to vector<1x256xf32>
      %420 = arith.mulf %419, %416 : vector<1x256xf32>
      %421 = arith.addf %418, %420 : vector<1x256xf32>
      %422 = arith.andi %156, %191 : vector<1x256xi1>
      %cst_73 = arith.constant 0.000000e+00 : f32
      %423 = vector.broadcast %cst_73 : f32 to vector<1x256xf32>
      %424 = arith.select %422, %421, %423 : vector<1x256xi1>, vector<1x256xf32>
      %425 = arith.addf %381, %424 : vector<1x256xf32>
      %c13_i32_74 = arith.constant 13 : i32
      %426 = tpu.dynamic_rotate %15 by %c13_i32_74 dim 1 : vector<1x256xf32>, i32 -> vector<1x256xf32>
      %c13_i32_75 = arith.constant 13 : i32
      %427 = tpu.dynamic_rotate %16 by %c13_i32_75 dim 1 : vector<1x256xf32>, i32 -> vector<1x256xf32>
      %428 = vector.broadcast %37 : f32 to vector<1x256xf32>
      %429 = arith.mulf %428, %426 : vector<1x256xf32>
      %430 = vector.broadcast %86 : f32 to vector<1x256xf32>
      %431 = arith.mulf %430, %427 : vector<1x256xf32>
      %432 = arith.addf %429, %431 : vector<1x256xf32>
      %433 = arith.andi %156, %201 : vector<1x256xi1>
      %cst_76 = arith.constant 0.000000e+00 : f32
      %434 = vector.broadcast %cst_76 : f32 to vector<1x256xf32>
      %435 = arith.select %433, %432, %434 : vector<1x256xi1>, vector<1x256xf32>
      %436 = arith.addf %392, %435 : vector<1x256xf32>
      %c3_i32_77 = arith.constant 3 : i32
      %437 = tpu.dynamic_rotate %15 by %c3_i32_77 dim 1 : vector<1x256xf32>, i32 -> vector<1x256xf32>
      %c3_i32_78 = arith.constant 3 : i32
      %438 = tpu.dynamic_rotate %16 by %c3_i32_78 dim 1 : vector<1x256xf32>, i32 -> vector<1x256xf32>
      %439 = vector.broadcast %38 : f32 to vector<1x256xf32>
      %440 = arith.mulf %439, %437 : vector<1x256xf32>
      %441 = vector.broadcast %87 : f32 to vector<1x256xf32>
      %442 = arith.mulf %441, %438 : vector<1x256xf32>
      %443 = arith.addf %440, %442 : vector<1x256xf32>
      %444 = arith.andi %166, %141 : vector<1x256xi1>
      %cst_79 = arith.constant 0.000000e+00 : f32
      %445 = vector.broadcast %cst_79 : f32 to vector<1x256xf32>
      %446 = arith.select %444, %443, %445 : vector<1x256xi1>, vector<1x256xf32>
      %447 = arith.addf %403, %446 : vector<1x256xf32>
      %c2_i32_80 = arith.constant 2 : i32
      %448 = tpu.dynamic_rotate %15 by %c2_i32_80 dim 1 : vector<1x256xf32>, i32 -> vector<1x256xf32>
      %c2_i32_81 = arith.constant 2 : i32
      %449 = tpu.dynamic_rotate %16 by %c2_i32_81 dim 1 : vector<1x256xf32>, i32 -> vector<1x256xf32>
      %450 = vector.broadcast %39 : f32 to vector<1x256xf32>
      %451 = arith.mulf %450, %448 : vector<1x256xf32>
      %452 = vector.broadcast %88 : f32 to vector<1x256xf32>
      %453 = arith.mulf %452, %449 : vector<1x256xf32>
      %454 = arith.addf %451, %453 : vector<1x256xf32>
      %455 = arith.andi %166, %151 : vector<1x256xi1>
      %cst_82 = arith.constant 0.000000e+00 : f32
      %456 = vector.broadcast %cst_82 : f32 to vector<1x256xf32>
      %457 = arith.select %455, %454, %456 : vector<1x256xi1>, vector<1x256xf32>
      %458 = arith.addf %414, %457 : vector<1x256xf32>
      %c1_i32_83 = arith.constant 1 : i32
      %459 = tpu.dynamic_rotate %15 by %c1_i32_83 dim 1 : vector<1x256xf32>, i32 -> vector<1x256xf32>
      %c1_i32_84 = arith.constant 1 : i32
      %460 = tpu.dynamic_rotate %16 by %c1_i32_84 dim 1 : vector<1x256xf32>, i32 -> vector<1x256xf32>
      %461 = vector.broadcast %40 : f32 to vector<1x256xf32>
      %462 = arith.mulf %461, %459 : vector<1x256xf32>
      %463 = vector.broadcast %89 : f32 to vector<1x256xf32>
      %464 = arith.mulf %463, %460 : vector<1x256xf32>
      %465 = arith.addf %462, %464 : vector<1x256xf32>
      %466 = arith.andi %166, %161 : vector<1x256xi1>
      %cst_85 = arith.constant 0.000000e+00 : f32
      %467 = vector.broadcast %cst_85 : f32 to vector<1x256xf32>
      %468 = arith.select %466, %465, %467 : vector<1x256xi1>, vector<1x256xf32>
      %469 = arith.addf %425, %468 : vector<1x256xf32>
      %470 = vector.broadcast %41 : f32 to vector<1x256xf32>
      %471 = arith.mulf %470, %15 : vector<1x256xf32>
      %472 = vector.broadcast %90 : f32 to vector<1x256xf32>
      %473 = arith.mulf %472, %16 : vector<1x256xf32>
      %474 = arith.addf %471, %473 : vector<1x256xf32>
      %475 = arith.andi %166, %171 : vector<1x256xi1>
      %cst_86 = arith.constant 0.000000e+00 : f32
      %476 = vector.broadcast %cst_86 : f32 to vector<1x256xf32>
      %477 = arith.select %475, %474, %476 : vector<1x256xi1>, vector<1x256xf32>
      %478 = arith.addf %436, %477 : vector<1x256xf32>
      %c255_i32 = arith.constant 255 : i32
      %479 = tpu.dynamic_rotate %15 by %c255_i32 dim 1 : vector<1x256xf32>, i32 -> vector<1x256xf32>
      %c255_i32_87 = arith.constant 255 : i32
      %480 = tpu.dynamic_rotate %16 by %c255_i32_87 dim 1 : vector<1x256xf32>, i32 -> vector<1x256xf32>
      %481 = vector.broadcast %42 : f32 to vector<1x256xf32>
      %482 = arith.mulf %481, %479 : vector<1x256xf32>
      %483 = vector.broadcast %91 : f32 to vector<1x256xf32>
      %484 = arith.mulf %483, %480 : vector<1x256xf32>
      %485 = arith.addf %482, %484 : vector<1x256xf32>
      %486 = arith.andi %166, %181 : vector<1x256xi1>
      %cst_88 = arith.constant 0.000000e+00 : f32
      %487 = vector.broadcast %cst_88 : f32 to vector<1x256xf32>
      %488 = arith.select %486, %485, %487 : vector<1x256xi1>, vector<1x256xf32>
      %489 = arith.addf %447, %488 : vector<1x256xf32>
      %c254_i32 = arith.constant 254 : i32
      %490 = tpu.dynamic_rotate %15 by %c254_i32 dim 1 : vector<1x256xf32>, i32 -> vector<1x256xf32>
      %c254_i32_89 = arith.constant 254 : i32
      %491 = tpu.dynamic_rotate %16 by %c254_i32_89 dim 1 : vector<1x256xf32>, i32 -> vector<1x256xf32>
      %492 = vector.broadcast %43 : f32 to vector<1x256xf32>
      %493 = arith.mulf %492, %490 : vector<1x256xf32>
      %494 = vector.broadcast %92 : f32 to vector<1x256xf32>
      %495 = arith.mulf %494, %491 : vector<1x256xf32>
      %496 = arith.addf %493, %495 : vector<1x256xf32>
      %497 = arith.andi %166, %191 : vector<1x256xi1>
      %cst_90 = arith.constant 0.000000e+00 : f32
      %498 = vector.broadcast %cst_90 : f32 to vector<1x256xf32>
      %499 = arith.select %497, %496, %498 : vector<1x256xi1>, vector<1x256xf32>
      %500 = arith.addf %458, %499 : vector<1x256xf32>
      %c253_i32 = arith.constant 253 : i32
      %501 = tpu.dynamic_rotate %15 by %c253_i32 dim 1 : vector<1x256xf32>, i32 -> vector<1x256xf32>
      %c253_i32_91 = arith.constant 253 : i32
      %502 = tpu.dynamic_rotate %16 by %c253_i32_91 dim 1 : vector<1x256xf32>, i32 -> vector<1x256xf32>
      %503 = vector.broadcast %44 : f32 to vector<1x256xf32>
      %504 = arith.mulf %503, %501 : vector<1x256xf32>
      %505 = vector.broadcast %93 : f32 to vector<1x256xf32>
      %506 = arith.mulf %505, %502 : vector<1x256xf32>
      %507 = arith.addf %504, %506 : vector<1x256xf32>
      %508 = arith.andi %166, %201 : vector<1x256xi1>
      %cst_92 = arith.constant 0.000000e+00 : f32
      %509 = vector.broadcast %cst_92 : f32 to vector<1x256xf32>
      %510 = arith.select %508, %507, %509 : vector<1x256xi1>, vector<1x256xf32>
      %511 = arith.addf %469, %510 : vector<1x256xf32>
      %c243_i32 = arith.constant 243 : i32
      %512 = tpu.dynamic_rotate %15 by %c243_i32 dim 1 : vector<1x256xf32>, i32 -> vector<1x256xf32>
      %c243_i32_93 = arith.constant 243 : i32
      %513 = tpu.dynamic_rotate %16 by %c243_i32_93 dim 1 : vector<1x256xf32>, i32 -> vector<1x256xf32>
      %514 = vector.broadcast %45 : f32 to vector<1x256xf32>
      %515 = arith.mulf %514, %512 : vector<1x256xf32>
      %516 = vector.broadcast %94 : f32 to vector<1x256xf32>
      %517 = arith.mulf %516, %513 : vector<1x256xf32>
      %518 = arith.addf %515, %517 : vector<1x256xf32>
      %519 = arith.andi %176, %141 : vector<1x256xi1>
      %cst_94 = arith.constant 0.000000e+00 : f32
      %520 = vector.broadcast %cst_94 : f32 to vector<1x256xf32>
      %521 = arith.select %519, %518, %520 : vector<1x256xi1>, vector<1x256xf32>
      %522 = arith.addf %478, %521 : vector<1x256xf32>
      %c242_i32 = arith.constant 242 : i32
      %523 = tpu.dynamic_rotate %15 by %c242_i32 dim 1 : vector<1x256xf32>, i32 -> vector<1x256xf32>
      %c242_i32_95 = arith.constant 242 : i32
      %524 = tpu.dynamic_rotate %16 by %c242_i32_95 dim 1 : vector<1x256xf32>, i32 -> vector<1x256xf32>
      %525 = vector.broadcast %46 : f32 to vector<1x256xf32>
      %526 = arith.mulf %525, %523 : vector<1x256xf32>
      %527 = vector.broadcast %95 : f32 to vector<1x256xf32>
      %528 = arith.mulf %527, %524 : vector<1x256xf32>
      %529 = arith.addf %526, %528 : vector<1x256xf32>
      %530 = arith.andi %176, %151 : vector<1x256xi1>
      %cst_96 = arith.constant 0.000000e+00 : f32
      %531 = vector.broadcast %cst_96 : f32 to vector<1x256xf32>
      %532 = arith.select %530, %529, %531 : vector<1x256xi1>, vector<1x256xf32>
      %533 = arith.addf %489, %532 : vector<1x256xf32>
      %c241_i32 = arith.constant 241 : i32
      %534 = tpu.dynamic_rotate %15 by %c241_i32 dim 1 : vector<1x256xf32>, i32 -> vector<1x256xf32>
      %c241_i32_97 = arith.constant 241 : i32
      %535 = tpu.dynamic_rotate %16 by %c241_i32_97 dim 1 : vector<1x256xf32>, i32 -> vector<1x256xf32>
      %536 = vector.broadcast %47 : f32 to vector<1x256xf32>
      %537 = arith.mulf %536, %534 : vector<1x256xf32>
      %538 = vector.broadcast %96 : f32 to vector<1x256xf32>
      %539 = arith.mulf %538, %535 : vector<1x256xf32>
      %540 = arith.addf %537, %539 : vector<1x256xf32>
      %541 = arith.andi %176, %161 : vector<1x256xi1>
      %cst_98 = arith.constant 0.000000e+00 : f32
      %542 = vector.broadcast %cst_98 : f32 to vector<1x256xf32>
      %543 = arith.select %541, %540, %542 : vector<1x256xi1>, vector<1x256xf32>
      %544 = arith.addf %500, %543 : vector<1x256xf32>
      %c240_i32_99 = arith.constant 240 : i32
      %545 = tpu.dynamic_rotate %15 by %c240_i32_99 dim 1 : vector<1x256xf32>, i32 -> vector<1x256xf32>
      %c240_i32_100 = arith.constant 240 : i32
      %546 = tpu.dynamic_rotate %16 by %c240_i32_100 dim 1 : vector<1x256xf32>, i32 -> vector<1x256xf32>
      %547 = vector.broadcast %48 : f32 to vector<1x256xf32>
      %548 = arith.mulf %547, %545 : vector<1x256xf32>
      %549 = vector.broadcast %97 : f32 to vector<1x256xf32>
      %550 = arith.mulf %549, %546 : vector<1x256xf32>
      %551 = arith.addf %548, %550 : vector<1x256xf32>
      %552 = arith.andi %176, %171 : vector<1x256xi1>
      %cst_101 = arith.constant 0.000000e+00 : f32
      %553 = vector.broadcast %cst_101 : f32 to vector<1x256xf32>
      %554 = arith.select %552, %551, %553 : vector<1x256xi1>, vector<1x256xf32>
      %555 = arith.addf %511, %554 : vector<1x256xf32>
      %c239_i32 = arith.constant 239 : i32
      %556 = tpu.dynamic_rotate %15 by %c239_i32 dim 1 : vector<1x256xf32>, i32 -> vector<1x256xf32>
      %c239_i32_102 = arith.constant 239 : i32
      %557 = tpu.dynamic_rotate %16 by %c239_i32_102 dim 1 : vector<1x256xf32>, i32 -> vector<1x256xf32>
      %558 = vector.broadcast %49 : f32 to vector<1x256xf32>
      %559 = arith.mulf %558, %556 : vector<1x256xf32>
      %560 = vector.broadcast %98 : f32 to vector<1x256xf32>
      %561 = arith.mulf %560, %557 : vector<1x256xf32>
      %562 = arith.addf %559, %561 : vector<1x256xf32>
      %563 = arith.andi %176, %181 : vector<1x256xi1>
      %cst_103 = arith.constant 0.000000e+00 : f32
      %564 = vector.broadcast %cst_103 : f32 to vector<1x256xf32>
      %565 = arith.select %563, %562, %564 : vector<1x256xi1>, vector<1x256xf32>
      %566 = arith.addf %522, %565 : vector<1x256xf32>
      %c238_i32 = arith.constant 238 : i32
      %567 = tpu.dynamic_rotate %15 by %c238_i32 dim 1 : vector<1x256xf32>, i32 -> vector<1x256xf32>
      %c238_i32_104 = arith.constant 238 : i32
      %568 = tpu.dynamic_rotate %16 by %c238_i32_104 dim 1 : vector<1x256xf32>, i32 -> vector<1x256xf32>
      %569 = vector.broadcast %50 : f32 to vector<1x256xf32>
      %570 = arith.mulf %569, %567 : vector<1x256xf32>
      %571 = vector.broadcast %99 : f32 to vector<1x256xf32>
      %572 = arith.mulf %571, %568 : vector<1x256xf32>
      %573 = arith.addf %570, %572 : vector<1x256xf32>
      %574 = arith.andi %176, %191 : vector<1x256xi1>
      %cst_105 = arith.constant 0.000000e+00 : f32
      %575 = vector.broadcast %cst_105 : f32 to vector<1x256xf32>
      %576 = arith.select %574, %573, %575 : vector<1x256xi1>, vector<1x256xf32>
      %577 = arith.addf %533, %576 : vector<1x256xf32>
      %c237_i32 = arith.constant 237 : i32
      %578 = tpu.dynamic_rotate %15 by %c237_i32 dim 1 : vector<1x256xf32>, i32 -> vector<1x256xf32>
      %c237_i32_106 = arith.constant 237 : i32
      %579 = tpu.dynamic_rotate %16 by %c237_i32_106 dim 1 : vector<1x256xf32>, i32 -> vector<1x256xf32>
      %580 = vector.broadcast %51 : f32 to vector<1x256xf32>
      %581 = arith.mulf %580, %578 : vector<1x256xf32>
      %582 = vector.broadcast %100 : f32 to vector<1x256xf32>
      %583 = arith.mulf %582, %579 : vector<1x256xf32>
      %584 = arith.addf %581, %583 : vector<1x256xf32>
      %585 = arith.andi %176, %201 : vector<1x256xi1>
      %cst_107 = arith.constant 0.000000e+00 : f32
      %586 = vector.broadcast %cst_107 : f32 to vector<1x256xf32>
      %587 = arith.select %585, %584, %586 : vector<1x256xi1>, vector<1x256xf32>
      %588 = arith.addf %544, %587 : vector<1x256xf32>
      %c227_i32 = arith.constant 227 : i32
      %589 = tpu.dynamic_rotate %15 by %c227_i32 dim 1 : vector<1x256xf32>, i32 -> vector<1x256xf32>
      %c227_i32_108 = arith.constant 227 : i32
      %590 = tpu.dynamic_rotate %16 by %c227_i32_108 dim 1 : vector<1x256xf32>, i32 -> vector<1x256xf32>
      %591 = vector.broadcast %52 : f32 to vector<1x256xf32>
      %592 = arith.mulf %591, %589 : vector<1x256xf32>
      %593 = vector.broadcast %101 : f32 to vector<1x256xf32>
      %594 = arith.mulf %593, %590 : vector<1x256xf32>
      %595 = arith.addf %592, %594 : vector<1x256xf32>
      %596 = arith.andi %186, %141 : vector<1x256xi1>
      %cst_109 = arith.constant 0.000000e+00 : f32
      %597 = vector.broadcast %cst_109 : f32 to vector<1x256xf32>
      %598 = arith.select %596, %595, %597 : vector<1x256xi1>, vector<1x256xf32>
      %599 = arith.addf %555, %598 : vector<1x256xf32>
      %c226_i32 = arith.constant 226 : i32
      %600 = tpu.dynamic_rotate %15 by %c226_i32 dim 1 : vector<1x256xf32>, i32 -> vector<1x256xf32>
      %c226_i32_110 = arith.constant 226 : i32
      %601 = tpu.dynamic_rotate %16 by %c226_i32_110 dim 1 : vector<1x256xf32>, i32 -> vector<1x256xf32>
      %602 = vector.broadcast %53 : f32 to vector<1x256xf32>
      %603 = arith.mulf %602, %600 : vector<1x256xf32>
      %604 = vector.broadcast %102 : f32 to vector<1x256xf32>
      %605 = arith.mulf %604, %601 : vector<1x256xf32>
      %606 = arith.addf %603, %605 : vector<1x256xf32>
      %607 = arith.andi %186, %151 : vector<1x256xi1>
      %cst_111 = arith.constant 0.000000e+00 : f32
      %608 = vector.broadcast %cst_111 : f32 to vector<1x256xf32>
      %609 = arith.select %607, %606, %608 : vector<1x256xi1>, vector<1x256xf32>
      %610 = arith.addf %566, %609 : vector<1x256xf32>
      %c225_i32 = arith.constant 225 : i32
      %611 = tpu.dynamic_rotate %15 by %c225_i32 dim 1 : vector<1x256xf32>, i32 -> vector<1x256xf32>
      %c225_i32_112 = arith.constant 225 : i32
      %612 = tpu.dynamic_rotate %16 by %c225_i32_112 dim 1 : vector<1x256xf32>, i32 -> vector<1x256xf32>
      %613 = vector.broadcast %54 : f32 to vector<1x256xf32>
      %614 = arith.mulf %613, %611 : vector<1x256xf32>
      %615 = vector.broadcast %103 : f32 to vector<1x256xf32>
      %616 = arith.mulf %615, %612 : vector<1x256xf32>
      %617 = arith.addf %614, %616 : vector<1x256xf32>
      %618 = arith.andi %186, %161 : vector<1x256xi1>
      %cst_113 = arith.constant 0.000000e+00 : f32
      %619 = vector.broadcast %cst_113 : f32 to vector<1x256xf32>
      %620 = arith.select %618, %617, %619 : vector<1x256xi1>, vector<1x256xf32>
      %621 = arith.addf %577, %620 : vector<1x256xf32>
      %c224_i32_114 = arith.constant 224 : i32
      %622 = tpu.dynamic_rotate %15 by %c224_i32_114 dim 1 : vector<1x256xf32>, i32 -> vector<1x256xf32>
      %c224_i32_115 = arith.constant 224 : i32
      %623 = tpu.dynamic_rotate %16 by %c224_i32_115 dim 1 : vector<1x256xf32>, i32 -> vector<1x256xf32>
      %624 = vector.broadcast %55 : f32 to vector<1x256xf32>
      %625 = arith.mulf %624, %622 : vector<1x256xf32>
      %626 = vector.broadcast %104 : f32 to vector<1x256xf32>
      %627 = arith.mulf %626, %623 : vector<1x256xf32>
      %628 = arith.addf %625, %627 : vector<1x256xf32>
      %629 = arith.andi %186, %171 : vector<1x256xi1>
      %cst_116 = arith.constant 0.000000e+00 : f32
      %630 = vector.broadcast %cst_116 : f32 to vector<1x256xf32>
      %631 = arith.select %629, %628, %630 : vector<1x256xi1>, vector<1x256xf32>
      %632 = arith.addf %588, %631 : vector<1x256xf32>
      %c223_i32 = arith.constant 223 : i32
      %633 = tpu.dynamic_rotate %15 by %c223_i32 dim 1 : vector<1x256xf32>, i32 -> vector<1x256xf32>
      %c223_i32_117 = arith.constant 223 : i32
      %634 = tpu.dynamic_rotate %16 by %c223_i32_117 dim 1 : vector<1x256xf32>, i32 -> vector<1x256xf32>
      %635 = vector.broadcast %56 : f32 to vector<1x256xf32>
      %636 = arith.mulf %635, %633 : vector<1x256xf32>
      %637 = vector.broadcast %105 : f32 to vector<1x256xf32>
      %638 = arith.mulf %637, %634 : vector<1x256xf32>
      %639 = arith.addf %636, %638 : vector<1x256xf32>
      %640 = arith.andi %186, %181 : vector<1x256xi1>
      %cst_118 = arith.constant 0.000000e+00 : f32
      %641 = vector.broadcast %cst_118 : f32 to vector<1x256xf32>
      %642 = arith.select %640, %639, %641 : vector<1x256xi1>, vector<1x256xf32>
      %643 = arith.addf %599, %642 : vector<1x256xf32>
      %c222_i32 = arith.constant 222 : i32
      %644 = tpu.dynamic_rotate %15 by %c222_i32 dim 1 : vector<1x256xf32>, i32 -> vector<1x256xf32>
      %c222_i32_119 = arith.constant 222 : i32
      %645 = tpu.dynamic_rotate %16 by %c222_i32_119 dim 1 : vector<1x256xf32>, i32 -> vector<1x256xf32>
      %646 = vector.broadcast %57 : f32 to vector<1x256xf32>
      %647 = arith.mulf %646, %644 : vector<1x256xf32>
      %648 = vector.broadcast %106 : f32 to vector<1x256xf32>
      %649 = arith.mulf %648, %645 : vector<1x256xf32>
      %650 = arith.addf %647, %649 : vector<1x256xf32>
      %651 = arith.andi %186, %191 : vector<1x256xi1>
      %cst_120 = arith.constant 0.000000e+00 : f32
      %652 = vector.broadcast %cst_120 : f32 to vector<1x256xf32>
      %653 = arith.select %651, %650, %652 : vector<1x256xi1>, vector<1x256xf32>
      %654 = arith.addf %610, %653 : vector<1x256xf32>
      %c221_i32 = arith.constant 221 : i32
      %655 = tpu.dynamic_rotate %15 by %c221_i32 dim 1 : vector<1x256xf32>, i32 -> vector<1x256xf32>
      %c221_i32_121 = arith.constant 221 : i32
      %656 = tpu.dynamic_rotate %16 by %c221_i32_121 dim 1 : vector<1x256xf32>, i32 -> vector<1x256xf32>
      %657 = vector.broadcast %58 : f32 to vector<1x256xf32>
      %658 = arith.mulf %657, %655 : vector<1x256xf32>
      %659 = vector.broadcast %107 : f32 to vector<1x256xf32>
      %660 = arith.mulf %659, %656 : vector<1x256xf32>
      %661 = arith.addf %658, %660 : vector<1x256xf32>
      %662 = arith.andi %186, %201 : vector<1x256xi1>
      %cst_122 = arith.constant 0.000000e+00 : f32
      %663 = vector.broadcast %cst_122 : f32 to vector<1x256xf32>
      %664 = arith.select %662, %661, %663 : vector<1x256xi1>, vector<1x256xf32>
      %665 = arith.addf %621, %664 : vector<1x256xf32>
      %c211_i32 = arith.constant 211 : i32
      %666 = tpu.dynamic_rotate %15 by %c211_i32 dim 1 : vector<1x256xf32>, i32 -> vector<1x256xf32>
      %c211_i32_123 = arith.constant 211 : i32
      %667 = tpu.dynamic_rotate %16 by %c211_i32_123 dim 1 : vector<1x256xf32>, i32 -> vector<1x256xf32>
      %668 = vector.broadcast %59 : f32 to vector<1x256xf32>
      %669 = arith.mulf %668, %666 : vector<1x256xf32>
      %670 = vector.broadcast %108 : f32 to vector<1x256xf32>
      %671 = arith.mulf %670, %667 : vector<1x256xf32>
      %672 = arith.addf %669, %671 : vector<1x256xf32>
      %673 = arith.andi %196, %141 : vector<1x256xi1>
      %cst_124 = arith.constant 0.000000e+00 : f32
      %674 = vector.broadcast %cst_124 : f32 to vector<1x256xf32>
      %675 = arith.select %673, %672, %674 : vector<1x256xi1>, vector<1x256xf32>
      %676 = arith.addf %632, %675 : vector<1x256xf32>
      %c210_i32 = arith.constant 210 : i32
      %677 = tpu.dynamic_rotate %15 by %c210_i32 dim 1 : vector<1x256xf32>, i32 -> vector<1x256xf32>
      %c210_i32_125 = arith.constant 210 : i32
      %678 = tpu.dynamic_rotate %16 by %c210_i32_125 dim 1 : vector<1x256xf32>, i32 -> vector<1x256xf32>
      %679 = vector.broadcast %60 : f32 to vector<1x256xf32>
      %680 = arith.mulf %679, %677 : vector<1x256xf32>
      %681 = vector.broadcast %109 : f32 to vector<1x256xf32>
      %682 = arith.mulf %681, %678 : vector<1x256xf32>
      %683 = arith.addf %680, %682 : vector<1x256xf32>
      %684 = arith.andi %196, %151 : vector<1x256xi1>
      %cst_126 = arith.constant 0.000000e+00 : f32
      %685 = vector.broadcast %cst_126 : f32 to vector<1x256xf32>
      %686 = arith.select %684, %683, %685 : vector<1x256xi1>, vector<1x256xf32>
      %687 = arith.addf %643, %686 : vector<1x256xf32>
      %c209_i32 = arith.constant 209 : i32
      %688 = tpu.dynamic_rotate %15 by %c209_i32 dim 1 : vector<1x256xf32>, i32 -> vector<1x256xf32>
      %c209_i32_127 = arith.constant 209 : i32
      %689 = tpu.dynamic_rotate %16 by %c209_i32_127 dim 1 : vector<1x256xf32>, i32 -> vector<1x256xf32>
      %690 = vector.broadcast %61 : f32 to vector<1x256xf32>
      %691 = arith.mulf %690, %688 : vector<1x256xf32>
      %692 = vector.broadcast %110 : f32 to vector<1x256xf32>
      %693 = arith.mulf %692, %689 : vector<1x256xf32>
      %694 = arith.addf %691, %693 : vector<1x256xf32>
      %695 = arith.andi %196, %161 : vector<1x256xi1>
      %cst_128 = arith.constant 0.000000e+00 : f32
      %696 = vector.broadcast %cst_128 : f32 to vector<1x256xf32>
      %697 = arith.select %695, %694, %696 : vector<1x256xi1>, vector<1x256xf32>
      %698 = arith.addf %654, %697 : vector<1x256xf32>
      %c208_i32_129 = arith.constant 208 : i32
      %699 = tpu.dynamic_rotate %15 by %c208_i32_129 dim 1 : vector<1x256xf32>, i32 -> vector<1x256xf32>
      %c208_i32_130 = arith.constant 208 : i32
      %700 = tpu.dynamic_rotate %16 by %c208_i32_130 dim 1 : vector<1x256xf32>, i32 -> vector<1x256xf32>
      %701 = vector.broadcast %62 : f32 to vector<1x256xf32>
      %702 = arith.mulf %701, %699 : vector<1x256xf32>
      %703 = vector.broadcast %111 : f32 to vector<1x256xf32>
      %704 = arith.mulf %703, %700 : vector<1x256xf32>
      %705 = arith.addf %702, %704 : vector<1x256xf32>
      %706 = arith.andi %196, %171 : vector<1x256xi1>
      %cst_131 = arith.constant 0.000000e+00 : f32
      %707 = vector.broadcast %cst_131 : f32 to vector<1x256xf32>
      %708 = arith.select %706, %705, %707 : vector<1x256xi1>, vector<1x256xf32>
      %709 = arith.addf %665, %708 : vector<1x256xf32>
      %c207_i32 = arith.constant 207 : i32
      %710 = tpu.dynamic_rotate %15 by %c207_i32 dim 1 : vector<1x256xf32>, i32 -> vector<1x256xf32>
      %c207_i32_132 = arith.constant 207 : i32
      %711 = tpu.dynamic_rotate %16 by %c207_i32_132 dim 1 : vector<1x256xf32>, i32 -> vector<1x256xf32>
      %712 = vector.broadcast %63 : f32 to vector<1x256xf32>
      %713 = arith.mulf %712, %710 : vector<1x256xf32>
      %714 = vector.broadcast %112 : f32 to vector<1x256xf32>
      %715 = arith.mulf %714, %711 : vector<1x256xf32>
      %716 = arith.addf %713, %715 : vector<1x256xf32>
      %717 = arith.andi %196, %181 : vector<1x256xi1>
      %cst_133 = arith.constant 0.000000e+00 : f32
      %718 = vector.broadcast %cst_133 : f32 to vector<1x256xf32>
      %719 = arith.select %717, %716, %718 : vector<1x256xi1>, vector<1x256xf32>
      %720 = arith.addf %676, %719 : vector<1x256xf32>
      %c206_i32 = arith.constant 206 : i32
      %721 = tpu.dynamic_rotate %15 by %c206_i32 dim 1 : vector<1x256xf32>, i32 -> vector<1x256xf32>
      %c206_i32_134 = arith.constant 206 : i32
      %722 = tpu.dynamic_rotate %16 by %c206_i32_134 dim 1 : vector<1x256xf32>, i32 -> vector<1x256xf32>
      %723 = vector.broadcast %64 : f32 to vector<1x256xf32>
      %724 = arith.mulf %723, %721 : vector<1x256xf32>
      %725 = vector.broadcast %113 : f32 to vector<1x256xf32>
      %726 = arith.mulf %725, %722 : vector<1x256xf32>
      %727 = arith.addf %724, %726 : vector<1x256xf32>
      %728 = arith.andi %196, %191 : vector<1x256xi1>
      %cst_135 = arith.constant 0.000000e+00 : f32
      %729 = vector.broadcast %cst_135 : f32 to vector<1x256xf32>
      %730 = arith.select %728, %727, %729 : vector<1x256xi1>, vector<1x256xf32>
      %731 = arith.addf %687, %730 : vector<1x256xf32>
      %c205_i32 = arith.constant 205 : i32
      %732 = tpu.dynamic_rotate %15 by %c205_i32 dim 1 : vector<1x256xf32>, i32 -> vector<1x256xf32>
      %c205_i32_136 = arith.constant 205 : i32
      %733 = tpu.dynamic_rotate %16 by %c205_i32_136 dim 1 : vector<1x256xf32>, i32 -> vector<1x256xf32>
      %734 = vector.broadcast %65 : f32 to vector<1x256xf32>
      %735 = arith.mulf %734, %732 : vector<1x256xf32>
      %736 = vector.broadcast %114 : f32 to vector<1x256xf32>
      %737 = arith.mulf %736, %733 : vector<1x256xf32>
      %738 = arith.addf %735, %737 : vector<1x256xf32>
      %739 = arith.andi %196, %201 : vector<1x256xi1>
      %cst_137 = arith.constant 0.000000e+00 : f32
      %740 = vector.broadcast %cst_137 : f32 to vector<1x256xf32>
      %741 = arith.select %739, %738, %740 : vector<1x256xi1>, vector<1x256xf32>
      %742 = arith.addf %698, %741 : vector<1x256xf32>
      %743 = arith.addf %742, %709 : vector<1x256xf32>
      %744 = arith.addf %720, %731 : vector<1x256xf32>
      %745 = arith.addf %743, %744 : vector<1x256xf32>
      %746 = arith.negf %745 : vector<1x256xf32>
      %747 = math.exp %746 : vector<1x256xf32>
      %cst_138 = arith.constant 1.000000e+00 : f32
      %748 = vector.broadcast %cst_138 : f32 to vector<1x256xf32>
      %749 = arith.addf %748, %747 : vector<1x256xf32>
      %750 = arith.divf %748, %749 : vector<1x256xf32>
      %c0_139 = arith.constant 0 : index
      %c0_140 = arith.constant 0 : index
      %751 = vector.load %arg8[%c0_139, %c0_140] : memref<1x256xf32, #tpu.memory_space<vmem>>, vector<1x256xf32>
      tpu.vector_store %arg8[%c0_139, %c0_140], %750 {strides = array<i32>} : memref<1x256xf32, #tpu.memory_space<vmem>>, vector<1x256xf32>,
    } else {
    }
    %c1_i32_5 = arith.constant 1 : i32
    %10 = arith.cmpi eq, %arg1, %c1_i32_5 : i32
    %11 = arith.extui %10 : i1 to i32
    %c0_i32_6 = arith.constant 0 : i32
    %12 = arith.cmpi ne, %11, %c0_i32_6 : i32
    scf.if %12 {
      %c0_7 = arith.constant 0 : index
      %c0_8 = arith.constant 0 : index
      %13 = vector.load %arg8[%c0_7, %c0_8] : memref<1x256xf32, #tpu.memory_space<vmem>>, vector<1x256xf32>
      %14 = vector.broadcast %13 : vector<1x256xf32> to vector<4x256xf32>
      %15 = arith.mulf %1, %14 : vector<4x256xf32>
      %c0_9 = arith.constant 0 : index
      %c0_10 = arith.constant 0 : index
      %c0_11 = arith.constant 0 : index
      %16 = vector.load %arg5[%c0_9, %c0_10, %c0_11] : memref<1x4x256xf32, #tpu.memory_space<vmem>>, vector<1x4x256xf32>
      %17 = vector.shape_cast %16 : vector<1x4x256xf32> to vector<4x256xf32>
      %18 = vector.shape_cast %15 : vector<4x256xf32> to vector<1x4x256xf32>
      tpu.vector_store %arg5[%c0_9, %c0_10, %c0_11], %18 {strides = array<i32>} : memref<1x4x256xf32, #tpu.memory_space<vmem>>, vector<1x4x256xf32>,
    } else {
    }
    return
  }
  func.func @transform_0(%arg0: i32, %arg1: i32, %arg2: i32) -> i32 {
    %c0_i32 = arith.constant 0 : i32
    %c0_i32_0 = arith.constant 0 : i32
    return %c0_i32 : i32
  }
  func.func @transform_1(%arg0: i32, %arg1: i32, %arg2: i32) -> (i32, i32, i32) {
    %c0_i32 = arith.constant 0 : i32
    %c0_i32_0 = arith.constant 0 : i32
    return %arg0, %arg2, %c0_i32 : i32, i32, i32
  }
  func.func @transform_2(%arg0: i32, %arg1: i32, %arg2: i32) -> (i32, i32, i32) {
    %0 = arith.muli %arg2, %arg1 : i32
    %c0_i32 = arith.constant 0 : i32
    %c0_i32_0 = arith.constant 0 : i32
    return %arg0, %0, %c0_i32 : i32, i32, i32
  }
}

</mosaic_0001>

<bundles_post_ra>
// kernel: tpu_custom_call.1
= control target key start
LH: loop header
LB: loop body
LE: loop exit
PB: predicated region body
PF: predicated region fallthrough
CT: control target
= control target key end

     0   :  { %s5086_s0 = inlined_call_operand.hbm [shape: f32[98], index: 0, kind: input, shape index: {}]   ;;  %s5087_s1 = inlined_call_operand.hbm [shape: f32[2,4,256], index: 1, kind: input, shape index: {}]   ;;  %s5088_s2 = inlined_call_operand.hbm [shape: f32[2,4,256], index: 2, kind: output, shape index: {}]  }
   0x1   :  { %5179 = sst [smem:[#allocation74_spill]] %s5086_s0 }
   0x2   :  { %5180 = sst [smem:[#allocation75_spill]] %s5087_s1 }
   0x3   :  { %5181 = sst [smem:[#allocation76_spill]] %s5088_s2 }
   0x4   :  { %7 = vsyncpa [#allocation8], 0 }
   0x5   :  { %8 = vsyncpa [#allocation6], 0 }
   0x6   :  { %10 = vsyncpa [#allocation6 + $0x1], 0 }
   0x7   :  { %11 = vsyncpa [#allocation7], 0 }
   0x8   :  { %13 = vsyncpa [#allocation7 + $0x1], 0  ;;  %s2517_s9 = smov 0   ;;  %s2519_s10 = smov 0  }
   0x9   :  { %s2521_s11 = smov 0   ;;  %s2523_s12 = smov 0  }
   0xa   :  { %s2525_s13 = smov 0   ;;  %s2527_s14 = smov 0  }
   0xb   :  { %s2529_s15 = smov 0   ;;  %s2531_s16 = smov 0  }
   0xc LB: > { %5182 = sst [smem:[#allocation14_spill]] %s2417_s9  ;;  %s2029_s17 = sadd.s32 4294967295, %s2445_s16   ;;  %s2445_s16 = sphi %s2531_s16, %s19_s16   ;;  %s2441_s15 = sphi %s2529_s15, %s5547_s15   ;;  %s2437_s14 = sphi %s2527_s14, %s5546_s14   ;;  %s2433_s13 = sphi %s2525_s13, %s5545_s13   ;;  %s2429_s12 = sphi %s2523_s12, %s5544_s12   ;;  %s2425_s11 = sphi %s2521_s11, %s5543_s11   ;;  %s2421_s10 = sphi %s2519_s10, %s5542_s10   ;;  %s2417_s9 = sphi %s2517_s9, %s5541_s9  }
   0xd   : > { %5183 = sst [smem:[#allocation15_spill]] %s2421_s10  ;;  %s2030_s18 = sadd.s32 4294967294, %s2445_s16  }
   0xe   : > { %5184 = sst [smem:[#allocation16_spill]] %s2425_s11  ;;  %p81_p0 = scmp.ne.s32.totalorder %s2421_s10, %s2417_s9 }
   0xf   : > { %5185 = sst [smem:[#allocation17_spill]] %s2429_s12  ;;  %p2561_p1 = scmp.eq.s32.totalorder %s2029_s17, 0 }
  0x10   : > { %5186 = sst [smem:[#allocation18_spill]] %s2433_s13  ;;  %p2565_p2 = scmp.eq.s32.totalorder %s2029_s17, 3 }
  0x11   : > { %5187 = sst [smem:[#allocation19_spill]] %s2437_s14  ;;  %p115_p3 = scmp.eq.s32.totalorder %s2030_s18, 3 }
  0x12   : > { %5188 = sst [smem:[#allocation20_spill]] %s2441_s15  ;;  %p2571_p4 = por %p2561_p1, %p81_p0 }
  0x13   : > { %5189 = sst [smem:[#allocation21_spill]] %s2445_s16  ;;  %p2031_p5 = scmp.ge.s32.totalorder %s2445_s16, 1 }
  0x14   : > { %s5190_s19 = scalar_select %p2561_p1, 1, 0 }
  0x15   : > { %s5192_s21 = scalar_select %p2571_p4, 1, 0 }
  0x16   : > { %p2576_p6 = por %p115_p3, %p81_p0  ;;  %p122_p7 = scmp.lt.s32.totalorder %s2445_s16, 5 }
  0x17   : > { %s34_s24 = sadd.s32 1, %s2437_s14  ;;  %s38_s25 = sadd.s32 1, %s2441_s15 }
  0x18   : > { %s5193_s22 = scalar_select %p2576_p6, 1, 0 }
  0x19   : > { %p2581_p8 = pnand %p2031_p5, %p122_p7  ;;  %p36_p11 = scmp.ge.s32.totalorder %s34_s24, 2 }
  0x1a   : > { %5194 = sst [smem:[#allocation22_spill]] %s5193_s22  ;;  %s5196_s0 = sld [smem:[#allocation74_spill]] }
  0x1b   : > { %p2159_p9 = pneg %p2581_p8 }
  0x1d   : > { %p2160_p10 = pnand %p2159_p9, %p2561_p1 }
  0x1f   : > { %p2302_p13 = pneg %p2160_p10 }
  0x20   : > { %s2300_s28 = scalar_lea.hbm %s5196_s0, 16 }
  0x21   : > { %p2301_p12 = scmp.ne.s32.totalorder %s5196_s0, %s2300_s28  ;;  %p2307_p5 = scmp.lt.u32.totalorder %s2300_s28, %s5196_s0 }
  0x23   : > { %p2303_p0 = pnand %p2302_p13, %p2301_p12 }
  0x25   : > { %p2304_p3 = pneg %p2303_p0 }
  0x27   : > { %p2309_p7 = pnand %p2307_p5, %p2304_p3 }
  0x29   : > { %2312 = shalt.err (!%p2309_p7)
}
  0x2a   : > { %s2447_s5 = smov [#allocation5]   ;;  %s5549_s24 = smov (%p36_p11, %s34_s24), 0 }
  0x2b   : > { %2162 = dma.hbm_to_smem (!%p2160_p10), %s5196_s0, 16, %s2447_s5, [#allocation8]  }
  0x2c   : > { %5197 = sst [smem:[#allocation23_spill]] %s5549_s24  ;;  %s5551_s25 = smov (!%p36_p11, %s38_s25), %s2441_s15 }
  0x2d   : > { %s68_s8 = sadd.s32 1, %s2425_s11  ;;  %p75_p9 = scmp.ne.s32.totalorder %s2425_s11, %s2421_s10 }
  0x2e   : > { %p40_p12 = scmp.ge.s32.totalorder %s5551_s25, 2  ;;  %p76_p13 = scmp.eq.s32.totalorder %s2445_s16, 0 }
  0x2f   : > { %p2612_p0 = por %p2565_p2, %p75_p9  ;;  %p2172_p3 = scmp.lt.s32.totalorder %s2445_s16, 4 }
  0x30   : > { %s5553_s25 = smov (%p40_p12, %s5551_s25), 0  ;;  %p77_p5 = por %p76_p13, %p75_p9 }
  0x31   : > { %s5198_s17 = scalar_select %p2612_p0, 1, 0 }
  0x32   : > { %5200 = sst [smem:[#allocation25_spill]] %s5553_s25  ;;  %s144_s18 = sand.u32 1, %s2425_s11  }
  0x33   : > { %5199 = sst [smem:[#allocation24_spill]] %s5198_s17  ;;  %s63_s26 = ssub.s32 %s2441_s15, %s5553_s25 }
  0x34   : > { %p66_p10 = scmp.eq.s32.totalorder %s63_s26, 0  ;;  %s2034_s27 = sshll.u32 %s144_s18, 3 }
  0x35   : > { %s2148_s28 = sshll.u32 %s2441_s15, 7  ;;  %s5202_s1 = sld [smem:[#allocation75_spill]] }
  0x36   : > { %s2624_s29 = scalar_select %p66_p10, %s2425_s11, %s68_s8  }
  0x37   : > { %s148_s4 = scalar_lea.vmem [#allocation9], %s2034_s27  ;;  %p2635_p2 = pnand %p2172_p3, %p77_p5 }
  0x38   : > { %5201 = sst [smem:[#allocation26_spill]] %s2624_s29  ;;  %s158_s5 = sshll.u32 %s148_s4, 4  ;;  %s2631_s5 = int_to_ptr.vmem [resolvable:$true] %s158_s5 }
  0x39   : > { %s145_s7 = scalar_lea.sflag [#allocation6], %s144_s18  ;;  %p2315_p7 = pneg %p2635_p2 }
  0x3b   : > { %s2629_s20 = scalar_lea.hbm %s5202_s1, %s2148_s28  ;;  %s2318_s28 = scalar_lea.hbm %s5202_s1, 256 }
  0x3c   : > { %s2313_s8 = scalar_lea.hbm %s2629_s20, 128  ;;  %p2319_p13 = scmp.lt.u32.totalorder %s2629_s20, %s5202_s1 }
  0x3d   : > { %p2314_p11 = scmp.ne.s32.totalorder %s2629_s20, %s2313_s8  ;;  %p2320_p3 = scmp.lt.u32.totalorder %s2318_s28, %s2313_s8 }
  0x3e   : > { %p2322_p10 = scmp.lt.u32.totalorder %s2313_s8, %s2629_s20 }
  0x3f   : > { %p2316_p9 = pnand %p2315_p7, %p2314_p11  ;;  %p2321_p5 = por %p2320_p3, %p2319_p13 }
  0x41   : > { %p2317_p12 = pneg %p2316_p9  ;;  %p2323_p6 = por %p2322_p10, %p2321_p5 }
  0x43   : > { %p2324_p0 = pnand %p2323_p6, %p2317_p12 }
  0x45   : > { %2327 = shalt.err (!%p2324_p0)
}
  0x46   : > { %s2328_s18 = scalar_lea.vmem %s2631_s5, 128  ;;  %s2448_s4 = smov [#allocation9]  }
  0x47   : > { %p2329_p11 = scmp.ne.s32.totalorder %s2631_s5, %s2328_s18  ;;  %s2333_s26 = sshll.u32 %s2448_s4, 4  ;;  %s2334_s26 = int_to_ptr.vmem [resolvable:$false] %s2333_s26 }
  0x48   : > { %s2335_s27 = scalar_lea.vmem %s2334_s26, 256  ;;  %p2336_p1 = scmp.lt.s32.totalorder %s2631_s5, %s2334_s26 }
  0x49   : > { %p2331_p9 = pnand %p2329_p11, %p2315_p7  ;;  %p2337_p13 = scmp.lt.s32.totalorder %s2335_s27, %s2328_s18 }
  0x4b   : > { %p2332_p4 = pneg %p2331_p9  ;;  %p2338_p3 = por %p2337_p13, %p2336_p1 }
  0x4d   : > { %p2339_p5 = pnand %p2338_p3, %p2332_p4 }
  0x4f   : > { %2342 = shalt.err (!%p2339_p5)
}
  0x50   : > { %2166 = dma.hbm_to_vmem [thread:$0]  (!%p2635_p2), %s2629_s20, 128, %s2631_s5, %s145_s7  }
  0x51   : > { %167 = sbr.rel (%p2581_p8) target bundleno = 755 (0x2f3), region = 28 }
  0x58   : > { %p5204_p6 = scmp.ne.s32.totalorder %s5190_s19, 0 }
  0x5a   : > { %2404 = dma.done.wait (%p5204_p6), [#allocation8], 16  }
  0x5b   : > { %2406 = vsyncadd (%p5204_p6), [#allocation8], 4294967280  ;;  %s2671_s8 = sand.u32 1, %s2421_s10   ;;  %p5206_p1 = scmp.ne.s32.totalorder %s5192_s21, 0 }
  0x5c   : > { %5205 = sst [smem:[#allocation27_spill]] %s2671_s8  ;;  %s2039_s28 = sshll.u32 %s2671_s8, 3 }
  0x5d   : > { %s174_s6 = scalar_lea.sflag [#allocation6], %s2671_s8  ;;  %s177_s30 = scalar_lea.vmem [#allocation9], %s2039_s28 }
  0x5e   : > { %2408 = dma.done.wait (%p5206_p1), %s174_s6, 128  }
  0x5f   : > { %2410 = vsyncadd (%p5206_p1), %s174_s6, 4294967168 }
  0x60   : > { %182 = sfence }
  0x61   : > { %v2679_v0 = vld [vmem:[%s177_s30] sm:$0xff]  ;;  %s2681_s23 = scalar_lea.vmem [#allocation10], %s2039_s28  ;;  %p2041_p4 = scmp.ne.s32.totalorder %s2429_s12, 0 }
  0x62   : > { %5207 = vst [vmem:[#allocation28_spill] sm:$0xff] %v2679_v0  ;;  %5208 = sst [smem:[#allocation29_spill]] %s2681_s23  ;;  %v209_v1 = vlaneseq (!%p2041_p4)  ;;  %v217_v2 = vcombine.high (!%p2041_p4), %v2679_v0, %v2679_v0  ;;  %vm219_vm0 = vcmask (!%p2041_p4), 1043456   ;;  %v2449_v6 = vmov (!%p2041_p4), 0.0  }
  0x63   : > { %204 = sbr.rel (%p2041_p4) target bundleno = 123 (0x7b), region = 40  ;;  %v220_v4 = vsel (!%p2041_p4), %vm219_vm0, %v2679_v0, 0.0  ;;  %v259_v5 = vsel (!%p2041_p4), %vm219_vm0, %v2679_v0, -inf  ;;  %v2450_v7 = vmov (!%p2041_p4), -inf   ;;  %v2451_v16 = vmov (!%p2041_p4), 1966171168  }
  0x64   : > { %vm2686_vm1 = vcmp.lt.s32.totalorder (!%p2041_p4), %v209_v1, 256  ;;  %v221_v8 = vrot.slane (!%p2041_p4), %v220_v4, 4  ;;  %v227_v9 = vsel (!%p2041_p4), %vm219_vm0, %v217_v2, 0.0  ;;  %v260_v10 = vrot.slane (!%p2041_p4), %v259_v5, 4 }
  0x65   : > { %213 = vst.msk [vmem:[#allocation2] sm:$0x3] (!%p2041_p4), %vm2686_vm1, %v2449_v6  ;;  %214 = vst.msk [vmem:[#allocation3] sm:$0x3] (!%p2041_p4), %vm2686_vm1, %v2450_v7  ;;  %v228_v11 = vrot.slane (!%p2041_p4), %v227_v9, 4  ;;  %v266_v12 = vsel (!%p2041_p4), %vm219_vm0, %v217_v2, -inf  ;;  %v238_v17 = vunpack.c.l.s4 (!%p2041_p4), %v2451_v16 }
  0x66   : > { %v222_v13 = vadd.f32 (!%p2041_p4), %v221_v8, %v220_v4  ;;  %v261_v14 = vmax.f32 (!%p2041_p4), %v259_v5, %v260_v10  ;;  %v267_v15 = vrot.slane (!%p2041_p4), %v266_v12, 4  ;;  %v241_v27 = vshrl.u32 (!%p2041_p4), %v209_v1, 7 }
  0x67   : > { %v229_v18 = vadd.f32 (!%p2041_p4), %v228_v11, %v227_v9  ;;  %v239_v26 = vunpack.c.0.s8 (!%p2041_p4), %v238_v17 }
  0x68   : > { %v223_v19 = vrot.slane (!%p2041_p4), %v222_v13, 2  ;;  %v262_v20 = vrot.slane (!%p2041_p4), %v261_v14, 2  ;;  %v268_v21 = vmax.f32 (!%p2041_p4), %v266_v12, %v267_v15 }
  0x69   : > { %v230_v22 = vrot.slane (!%p2041_p4), %v229_v18, 2  ;;  %v242_v36 = vsub.s32 (!%p2041_p4), %v239_v26, %v241_v27 }
  0x6a   : > { %v224_v23 = vadd.f32 %v223_v19, %v222_v13  ;;  %v263_v24 = vmax.f32 %v261_v14, %v262_v20  ;;  %v269_v25 = vrot.slane %v268_v21, 2 }
  0x6b   : > { %v231_v28 = vadd.f32 %v230_v22, %v229_v18 }
  0x6c   : > { %v225_v29 = vrot.slane %v224_v23, 1  ;;  %v264_v30 = vrot.slane %v263_v24, 1  ;;  %v270_v31 = vmax.f32 %v268_v21, %v269_v25  ;;  %v215_v42 = vld [vmem:[#allocation2] sm:$0x3]  ;;  %v258_v45 = vld [vmem:[#allocation3] sm:$0x3] }
  0x6d   : > { %v232_v32 = vrot.slane %v231_v28, 1 }
  0x6e   : > { %v226_v33 = vadd.f32 %v225_v29, %v224_v23  ;;  %v265_v34 = vmax.f32 %v263_v24, %v264_v30  ;;  %v271_v35 = vrot.slane %v270_v31, 1 }
  0x6f   : > { %v233_v37 = vadd.f32 %v232_v32, %v231_v28 }
  0x70   : > { %v272_v38 = vmax.f32 %v270_v31, %v271_v35 }
  0x71   : > { %v236_v39 = vcombine.low %v226_v33, %v233_v37 }
  0x72   : > { %v275_v40 = vcombine.low %v265_v34, %v272_v38 }
  0x73   : > { %v243_v41 = vrot.slane %v236_v39, %v242_v36 }
  0x74   : > { %v282_v43 = vrot.slane %v275_v40, %v242_v36 }
  0x75   : > { %v250_v44 = vrot.slane %v243_v41, %v242_v36 }
  0x76   : > { %v289_v46 = vrot.slane %v282_v43, %v242_v36 }
  0x77   : > { %v252_v47 = vadd.f32 %v250_v44, %v215_v42 }
  0x78   : > { %v291_v48 = vmax.f32 %v258_v45, %v289_v46 }
  0x79   : > { %257 = vst.msk [vmem:[#allocation2] sm:$0x3] %vm2686_vm1, %v252_v47 }
  0x7a   : > { %292 = vst.msk [vmem:[#allocation3] sm:$0x3] %vm2686_vm1, %v291_v48 }
  0x7b PF: > { %p293_p8 = scmp.eq.s32.totalorder %s2429_s12, 1 }
  0x7d   : > { %298 = sbr.rel (!%p293_p8) target bundleno = 705 (0x2c1), region = 48 }
  0x84   : > { %v5093_v49 = vlaneseq  ;;  %v299_v50 = vld [vmem:[#allocation2] sm:$0x3]  ;;  %v2706_v53 = vld [vmem:[#allocation3] sm:$0x3]  ;;  %s2452_s19 = smov 51   ;;  %s2453_s21 = smov 50  }
  0x85   : > { %v2704_v52 = vmul.f32 0.25, %v299_v50  ;;  %s2454_s20 = smov 49   ;;  %s2455_s5 = smov 48  }
  0x86   : > { %v2702_v51 = vshrl.u32 %v5093_v49, 7  ;;  %s2456_s7 = smov 47   ;;  %s2457_s3 = smov 46  }
  0x87   : > { %s2458_s18 = smov 45   ;;  %s2459_s4 = smov 35  }
  0x88   : > { %5211 = vst [vmem:[#allocation30_spill] sm:$0xff] %v2702_v51  ;;  %v2709_v54 = vsub.s32 0, %v2702_v51  ;;  %v2712_v55 = vsub.s32 1, %v2702_v51  ;;  %s2460_s26 = smov 34   ;;  %s2461_s27 = smov 33  }
  0x89   : > { %s2462_s28 = smov 32   ;;  %s2463_s6 = smov 31  }
  0x8a   : > { %5212 = vst [vmem:[#allocation31_spill] sm:$0xff] %v2709_v54  ;;  %5213 = vst [vmem:[#allocation32_spill] sm:$0xff] %v2712_v55  ;;  %v2716_v56 = vrot.slane %v2706_v53, %v2709_v54  ;;  %v2720_v57 = vrot.slane %v2704_v52, %v2709_v54  ;;  %v2726_v58 = vrot.slane %v2706_v53, %v2712_v55  ;;  %s2464_s30 = smov 30   ;;  %s2999_s0 = sld [smem:[#allocation5 + $0x6]] }
  0x8b   : > { %v2730_v59 = vrot.slane %v2704_v52, %v2712_v55  ;;  %s3002_s1 = sld [smem:[#allocation5 + $0x37]]  ;;  %s3007_s24 = sld [smem:[#allocation5 + $0x38]] }
  0x8c   : > { %540 = vrot.lane.b32.xlu1 %v2716_v56, %s2452_s19  ;;  %522 = vrot.lane.b32.xlu0 %v2720_v57, %s2452_s19  ;;  %s3005_s25 = sld [smem:[#allocation5 + $0x7]]  ;;  %s3011_s15 = sld [smem:[#allocation5 + $0x8]] }
  0x8d   : > { %s3013_s14 = sld [smem:[#allocation5 + $0x39]]  ;;  %s5123_s11 = smov 112  }
  0x8e   : > { %s3020_s29 = sld [smem:[#allocation5 + $0x9]]  ;;  %s3029_s10 = sld [smem:[#allocation5 + $0xa]] }
  0x8f   : > { %s3031_s22 = sld [smem:[#allocation5 + $0x3b]]  ;;  %s3040_s16 = sld [smem:[#allocation5 + $0x3c]] }
  0x90   : > { %542 = vrot.lane.b32.xlu1 %v2726_v58, %s2452_s19  ;;  %524 = vrot.lane.b32.xlu0 %v2730_v59, %s2452_s19  ;;  %s2465_s19 = smov 29   ;;  %s3038_s9 = sld [smem:[#allocation5 + $0xb]] }
  0x91   : > { %s3050_s2 = sld [smem:[#allocation5 + $0x3d]]  ;;  %s5242_s17 = smov 112  }
  0x92   : > { %5233 = sst [smem:[#allocation51_spill]] %s3005_s25  ;;  %s3071_s8 = sld [smem:[#allocation5 + $0xe]] }
  0x93   : > { %5235 = sst [smem:[#allocation53_spill]] %s3011_s15  ;;  %s3079_s13 = sld [smem:[#allocation5 + $0x3f]] }
  0x94   : > { %562 = vrot.lane.b32.xlu1 %v2730_v59, %s2453_s21  ;;  %560 = vrot.lane.b32.xlu0 %v2720_v57, %s2453_s21  ;;  %s3095_s23 = sld [smem:[#allocation5 + $0x40]]  ;;  %s5145_s12 = smov 111  }
  0x95   : > { %5239 = sst [smem:[#allocation57_spill]] %s3040_s16  ;;  %s3117_s15 = sld [smem:[#allocation5 + $0x10]] }
  0x96   : > { %5238 = sst [smem:[#allocation56_spill]] %s3038_s9  ;;  %s5249_s9 = smov 111  }
  0x97   : > { %s3119_s25 = sld [smem:[#allocation5 + $0x41]]  ;;  %s3148_s16 = sld [smem:[#allocation5 + $0x42]] }
  0x98   : > { %569 = vrot.lane.b32.xlu1 %v2726_v58, %s2453_s21  ;;  %567 = vrot.lane.b32.xlu0 %v2716_v56, %s2453_s21  ;;  %s2466_s21 = smov 19  }
  0x9b   : > { %5245 = sst [smem:[#allocation62_spill]] %s3117_s15 }
  0x9c   : > { %589 = vrot.lane.b32.xlu1 %v2730_v59, %s2454_s20  ;;  %587 = vrot.lane.b32.xlu0 %v2720_v57, %s2454_s20  ;;  %s3266_s15 = sld [smem:[#allocation5 + $0x13]] }
  0x9d   : > { %5246 = sst [smem:[#allocation63_spill]] %s3119_s25  ;;  %s3254_s25 = sld [smem:[#allocation5 + $0x49]] }
  0xa0   : > { %596 = vrot.lane.b32.xlu1 %v2726_v58, %s2454_s20  ;;  %594 = vrot.lane.b32.xlu0 %v2716_v56, %s2454_s20  ;;  %s2467_s20 = smov 18  }
  0xa4   : > { %616 = vrot.lane.b32.xlu1 %v2730_v59, %s2455_s5  ;;  %614 = vrot.lane.b32.xlu0 %v2720_v57, %s2455_s5 }
  0xa8   : > { %623 = vrot.lane.b32.xlu1 %v2726_v58, %s2455_s5  ;;  %621 = vrot.lane.b32.xlu0 %v2716_v56, %s2455_s5  ;;  %s2468_s5 = smov 17  }
  0xac   : > { %643 = vrot.lane.b32.xlu1 %v2730_v59, %s2456_s7  ;;  %641 = vrot.lane.b32.xlu0 %v2720_v57, %s2456_s7 }
  0xb0   : > { %650 = vrot.lane.b32.xlu1 %v2726_v58, %s2456_s7  ;;  %648 = vrot.lane.b32.xlu0 %v2716_v56, %s2456_s7  ;;  %s2469_s7 = smov 16  }
  0xb4   : > { %670 = vrot.lane.b32.xlu1 %v2730_v59, %s2457_s3  ;;  %668 = vrot.lane.b32.xlu0 %v2720_v57, %s2457_s3 }
  0xb8   : > { %677 = vrot.lane.b32.xlu1 %v2726_v58, %s2457_s3  ;;  %675 = vrot.lane.b32.xlu0 %v2716_v56, %s2457_s3  ;;  %s2470_s3 = smov 15  }
  0xbc   : > { %697 = vrot.lane.b32.xlu1 %v2730_v59, %s2458_s18  ;;  %695 = vrot.lane.b32.xlu0 %v2720_v57, %s2458_s18 }
  0xc0   : > { %704 = vrot.lane.b32.xlu1 %v2726_v58, %s2458_s18  ;;  %702 = vrot.lane.b32.xlu0 %v2716_v56, %s2458_s18  ;;  %s2471_s18 = smov 14  }
  0xc4   : > { %724 = vrot.lane.b32.xlu1 %v2730_v59, %s2459_s4  ;;  %722 = vrot.lane.b32.xlu0 %v2720_v57, %s2459_s4 }
  0xc8   : > { %731 = vrot.lane.b32.xlu1 %v2726_v58, %s2459_s4  ;;  %729 = vrot.lane.b32.xlu0 %v2716_v56, %s2459_s4  ;;  %s2472_s4 = smov 13  }
  0xcc   : > { %751 = vrot.lane.b32.xlu1 %v2730_v59, %s2460_s26  ;;  %749 = vrot.lane.b32.xlu0 %v2720_v57, %s2460_s26 }
  0xd0   : > { %758 = vrot.lane.b32.xlu1 %v2726_v58, %s2460_s26  ;;  %756 = vrot.lane.b32.xlu0 %v2716_v56, %s2460_s26  ;;  %s2473_s26 = smov 3  }
  0xd4   : > { %778 = vrot.lane.b32.xlu1 %v2730_v59, %s2461_s27  ;;  %776 = vrot.lane.b32.xlu0 %v2720_v57, %s2461_s27 }
  0xd8   : > { %785 = vrot.lane.b32.xlu1 %v2726_v58, %s2461_s27  ;;  %783 = vrot.lane.b32.xlu0 %v2716_v56, %s2461_s27  ;;  %s2474_s27 = smov 2  }
  0xdc   : > { %805 = vrot.lane.b32.xlu1 %v2730_v59, %s2462_s28  ;;  %803 = vrot.lane.b32.xlu0 %v2720_v57, %s2462_s28 }
  0xe0   : > { %812 = vrot.lane.b32.xlu1 %v2726_v58, %s2462_s28  ;;  %810 = vrot.lane.b32.xlu0 %v2716_v56, %s2462_s28  ;;  %s2475_s28 = smov 1  }
  0xe4   : > { %832 = vrot.lane.b32.xlu1 %v2730_v59, %s2463_s6  ;;  %830 = vrot.lane.b32.xlu0 %v2720_v57, %s2463_s6 }
  0xe8   : > { %839 = vrot.lane.b32.xlu1 %v2726_v58, %s2463_s6  ;;  %837 = vrot.lane.b32.xlu0 %v2716_v56, %s2463_s6  ;;  %s2476_s6 = smov 127  }
  0xec   : > { %859 = vrot.lane.b32.xlu1 %v2730_v59, %s2464_s30  ;;  %857 = vrot.lane.b32.xlu0 %v2720_v57, %s2464_s30 }
  0xf0   : > { %866 = vrot.lane.b32.xlu1 %v2726_v58, %s2464_s30  ;;  %864 = vrot.lane.b32.xlu0 %v2716_v56, %s2464_s30  ;;  %s2477_s30 = smov 126  }
  0xf4   : > { %886 = vrot.lane.b32.xlu1 %v2730_v59, %s2465_s19  ;;  %884 = vrot.lane.b32.xlu0 %v2720_v57, %s2465_s19 }
  0xf8   : > { %893 = vrot.lane.b32.xlu1 %v2726_v58, %s2465_s19  ;;  %891 = vrot.lane.b32.xlu0 %v2716_v56, %s2465_s19  ;;  %s2478_s19 = smov 125  }
  0xfc   : > { %913 = vrot.lane.b32.xlu1 %v2730_v59, %s2466_s21  ;;  %911 = vrot.lane.b32.xlu0 %v2720_v57, %s2466_s21 }
  0xfe   : > { %v2788_v60 = vpop.permute.xlu1 %540  ;;  %v2790_v61 = vpop.permute.xlu0 %522 }
 0x100   : > { %920 = vrot.lane.b32.xlu1 %v2726_v58, %s2466_s21  ;;  %918 = vrot.lane.b32.xlu0 %v2716_v56, %s2466_s21  ;;  %s2479_s21 = smov 115  }
 0x102   : > { %v2794_v62 = vpop.permute.xlu1 %542  ;;  %v2796_v63 = vpop.permute.xlu0 %524 }
 0x104   : > { %940 = vrot.lane.b32.xlu1 %v2730_v59, %s2467_s20  ;;  %938 = vrot.lane.b32.xlu0 %v2720_v57, %s2467_s20 }
 0x106   : > { %v2800_v1 = vpop.permute.xlu1 %562  ;;  %v2802_v2 = vpop.permute.xlu0 %560 }
 0x108   : > { %947 = vrot.lane.b32.xlu1 %v2726_v58, %s2467_s20  ;;  %945 = vrot.lane.b32.xlu0 %v2716_v56, %s2467_s20  ;;  %s2480_s20 = smov 114  }
 0x10a   : > { %v2806_v3 = vpop.permute.xlu1 %569  ;;  %v2808_v4 = vpop.permute.xlu0 %567 }
 0x10c   : > { %967 = vrot.lane.b32.xlu1 %v2730_v59, %s2468_s5  ;;  %965 = vrot.lane.b32.xlu0 %v2720_v57, %s2468_s5 }
 0x10e   : > { %v2812_v5 = vpop.permute.xlu1 %589  ;;  %v2814_v6 = vpop.permute.xlu0 %587 }
 0x110   : > { %974 = vrot.lane.b32.xlu1 %v2726_v58, %s2468_s5  ;;  %972 = vrot.lane.b32.xlu0 %v2716_v56, %s2468_s5  ;;  %s2962_s5 = sld [smem:[#allocation5 + $0x31]] }
 0x112   : > { %v2818_v7 = vpop.permute.xlu1 %596  ;;  %v2820_v8 = vpop.permute.xlu0 %594 }
 0x114   : > { %994 = vrot.lane.b32.xlu1 %v2730_v59, %s2469_s7  ;;  %992 = vrot.lane.b32.xlu0 %v2720_v57, %s2469_s7 }
 0x116   : > { %v2824_v9 = vpop.permute.xlu1 %616  ;;  %v2826_v10 = vpop.permute.xlu0 %614 }
 0x118   : > { %1001 = vrot.lane.b32.xlu1 %v2726_v58, %s2469_s7  ;;  %999 = vrot.lane.b32.xlu0 %v2716_v56, %s2469_s7  ;;  %s2968_s7 = sld [smem:[#allocation5]] }
 0x11a   : > { %v2830_v11 = vpop.permute.xlu1 %623  ;;  %v2832_v12 = vpop.permute.xlu0 %621 }
 0x11c   : > { %1021 = vrot.lane.b32.xlu1 %v2730_v59, %s2470_s3  ;;  %1019 = vrot.lane.b32.xlu0 %v2720_v57, %s2470_s3 }
 0x11e   : > { %v2836_v13 = vpop.permute.xlu1 %643  ;;  %v2838_v14 = vpop.permute.xlu0 %641 }
 0x120   : > { %1028 = vrot.lane.b32.xlu1 %v2726_v58, %s2470_s3  ;;  %1026 = vrot.lane.b32.xlu0 %v2716_v56, %s2470_s3  ;;  %s2970_s3 = sld [smem:[#allocation5 + $0x1]] }
 0x122   : > { %v2842_v15 = vpop.permute.xlu1 %650  ;;  %v2844_v16 = vpop.permute.xlu0 %648 }
 0x124   : > { %1048 = vrot.lane.b32.xlu1 %v2730_v59, %s2471_s18  ;;  %1046 = vrot.lane.b32.xlu0 %v2720_v57, %s2471_s18 }
 0x126   : > { %v2848_v17 = vpop.permute.xlu1 %670  ;;  %v2850_v18 = vpop.permute.xlu0 %668 }
 0x128   : > { %1055 = vrot.lane.b32.xlu1 %v2726_v58, %s2471_s18  ;;  %1053 = vrot.lane.b32.xlu0 %v2716_v56, %s2471_s18  ;;  %s2972_s18 = sld [smem:[#allocation5 + $0x32]] }
 0x12a   : > { %v2854_v19 = vpop.permute.xlu1 %677  ;;  %v2856_v20 = vpop.permute.xlu0 %675 }
 0x12c   : > { %1075 = vrot.lane.b32.xlu1 %v2730_v59, %s2472_s4  ;;  %1073 = vrot.lane.b32.xlu0 %v2720_v57, %s2472_s4 }
 0x12e   : > { %v2860_v21 = vpop.permute.xlu1 %697  ;;  %v2862_v22 = vpop.permute.xlu0 %695 }
 0x130   : > { %1082 = vrot.lane.b32.xlu1 %v2726_v58, %s2472_s4  ;;  %1080 = vrot.lane.b32.xlu0 %v2716_v56, %s2472_s4  ;;  %s2974_s4 = sld [smem:[#allocation5 + $0x2]] }
 0x132   : > { %v2866_v23 = vpop.permute.xlu1 %704  ;;  %v2868_v24 = vpop.permute.xlu0 %702 }
 0x134   : > { %1102 = vrot.lane.b32.xlu1 %v2730_v59, %s2473_s26  ;;  %1100 = vrot.lane.b32.xlu0 %v2720_v57, %s2473_s26 }
 0x136   : > { %v2872_v25 = vpop.permute.xlu1 %724  ;;  %v2874_v26 = vpop.permute.xlu0 %722 }
 0x138   : > { %1109 = vrot.lane.b32.xlu1 %v2726_v58, %s2473_s26  ;;  %1107 = vrot.lane.b32.xlu0 %v2716_v56, %s2473_s26  ;;  %s2481_s26 = smov 113  }
 0x13a   : > { %v2878_v27 = vpop.permute.xlu1 %731  ;;  %v2880_v28 = vpop.permute.xlu0 %729 }
 0x13c   : > { %1129 = vrot.lane.b32.xlu1 %v2730_v59, %s2474_s27  ;;  %1127 = vrot.lane.b32.xlu0 %v2720_v57, %s2474_s27 }
 0x13e   : > { %v2884_v29 = vpop.permute.xlu1 %751  ;;  %v2886_v30 = vpop.permute.xlu0 %749 }
 0x140   : > { %1136 = vrot.lane.b32.xlu1 %v2726_v58, %s2474_s27  ;;  %1134 = vrot.lane.b32.xlu0 %v2716_v56, %s2474_s27  ;;  %s2977_s27 = sld [smem:[#allocation5 + $0x33]] }
 0x142   : > { %v2890_v31 = vpop.permute.xlu1 %758  ;;  %v2892_v32 = vpop.permute.xlu0 %756 }
 0x144   : > { %1156 = vrot.lane.b32.xlu1 %v2730_v59, %s2475_s28  ;;  %1154 = vrot.lane.b32.xlu0 %v2720_v57, %s2475_s28 }
 0x146   : > { %v2896_v33 = vpop.permute.xlu1 %778  ;;  %v2898_v34 = vpop.permute.xlu0 %776 }
 0x148   : > { %1163 = vrot.lane.b32.xlu1 %v2726_v58, %s2475_s28  ;;  %1161 = vrot.lane.b32.xlu0 %v2716_v56, %s2475_s28  ;;  %s2979_s28 = sld [smem:[#allocation5 + $0x3]] }
 0x14a   : > { %v2902_v35 = vpop.permute.xlu1 %785  ;;  %v2904_v36 = vpop.permute.xlu0 %783 }
 0x14c   : > { %1205 = vrot.lane.b32.xlu1 %v2730_v59, %s2476_s6  ;;  %1203 = vrot.lane.b32.xlu0 %v2720_v57, %s2476_s6 }
 0x14e   : > { %v2908_v37 = vpop.permute.xlu1 %805  ;;  %v2910_v38 = vpop.permute.xlu0 %803 }
 0x150   : > { %1212 = vrot.lane.b32.xlu1 %v2726_v58, %s2476_s6  ;;  %1210 = vrot.lane.b32.xlu0 %v2716_v56, %s2476_s6  ;;  %s2982_s6 = sld [smem:[#allocation5 + $0x34]] }
 0x152   : > { %v2914_v39 = vpop.permute.xlu1 %812  ;;  %v2916_v40 = vpop.permute.xlu0 %810 }
 0x154   : > { %1232 = vrot.lane.b32.xlu1 %v2730_v59, %s2477_s30  ;;  %1230 = vrot.lane.b32.xlu0 %v2720_v57, %s2477_s30 }
 0x156   : > { %v2920_v41 = vpop.permute.xlu1 %832  ;;  %v2922_v42 = vpop.permute.xlu0 %830 }
 0x157   : > { %5214 = vst [vmem:[#allocation33_spill] sm:$0xff] %v2920_v41  ;;  %5215 = vst [vmem:[#allocation34_spill] sm:$0xff] %v2922_v42 }
 0x158   : > { %1239 = vrot.lane.b32.xlu1 %v2726_v58, %s2477_s30  ;;  %1237 = vrot.lane.b32.xlu0 %v2716_v56, %s2477_s30  ;;  %s2984_s30 = sld [smem:[#allocation5 + $0x4]] }
 0x15a   : > { %v2926_v43 = vpop.permute.xlu1 %839  ;;  %v2928_v44 = vpop.permute.xlu0 %837 }
 0x15b   : > { %5216 = vst [vmem:[#allocation35_spill] sm:$0xff] %v2926_v43  ;;  %5217 = vst [vmem:[#allocation36_spill] sm:$0xff] %v2928_v44 }
 0x15c   : > { %1259 = vrot.lane.b32.xlu1 %v2730_v59, %s2478_s19  ;;  %1257 = vrot.lane.b32.xlu0 %v2720_v57, %s2478_s19 }
 0x15e   : > { %v2932_v45 = vpop.permute.xlu1 %859  ;;  %v2934_v46 = vpop.permute.xlu0 %857 }
 0x15f   : > { %5218 = vst [vmem:[#allocation37_spill] sm:$0xff] %v2932_v45  ;;  %5219 = vst [vmem:[#allocation38_spill] sm:$0xff] %v2934_v46 }
 0x160   : > { %1266 = vrot.lane.b32.xlu1 %v2726_v58, %s2478_s19  ;;  %1264 = vrot.lane.b32.xlu0 %v2716_v56, %s2478_s19  ;;  %s2988_s19 = sld [smem:[#allocation5 + $0x35]] }
 0x162   : > { %v2938_v47 = vpop.permute.xlu1 %866  ;;  %v2940_v48 = vpop.permute.xlu0 %864 }
 0x163   : > { %5220 = vst [vmem:[#allocation39_spill] sm:$0xff] %v2938_v47  ;;  %5221 = vst [vmem:[#allocation40_spill] sm:$0xff] %v2940_v48  ;;  %v5232_v47 = vlaneseq }
 0x164   : > { %1286 = vrot.lane.b32.xlu1 %v2730_v59, %s2479_s21  ;;  %1284 = vrot.lane.b32.xlu0 %v2720_v57, %s2479_s21 }
 0x165   : > { %v2995_v48 = vand.u32 127, %v5232_v47 }
 0x166   : > { %v2944_v50 = vpop.permute.xlu1 %886  ;;  %v2946_v49 = vpop.permute.xlu0 %884 }
 0x167   : > { %5222 = vst [vmem:[#allocation41_spill] sm:$0xff] %v2944_v50  ;;  %5223 = vst [vmem:[#allocation42_spill] sm:$0xff] %v2946_v49  ;;  %vm526_vm2 = vcmp.lt.s32.totalorder %v2995_v48, 51  ;;  %vm564_vm3 = vcmp.lt.s32.totalorder %v2995_v48, 50  ;;  %v546_v50 = vstv %s2968_s7  ;;  %vm427_vm4 = vcmp.ge.s32.totalorder %v2995_v48, 48  ;;  %s3063_s7 = sld [smem:[#allocation5 + $0x3e]] }
 0x168   : > { %1293 = vrot.lane.b32.xlu1 %v2726_v58, %s2479_s21  ;;  %1291 = vrot.lane.b32.xlu0 %v2716_v56, %s2479_s21  ;;  %s2990_s21 = sld [smem:[#allocation5 + $0x5]]  ;;  %vm591_vm8 = vcmp.lt.s32.totalorder %v2995_v48, 49  ;;  %vm618_vm11 = vcmp.lt.s32.totalorder %v2995_v48, 48  ;;  %vm645_vm12 = vcmp.lt.s32.totalorder %v2995_v48, 47  ;;  %vm672_vm15 = vcmp.lt.s32.totalorder %v2995_v48, 46 }
 0x16a   : > { %v2950_v0 = vpop.permute.xlu1 %893  ;;  %v2952_v51 = vpop.permute.xlu0 %891 }
 0x16b   : > { %5224 = vst [vmem:[#allocation43_spill] sm:$0xff] %v2950_v0  ;;  %5225 = vst [vmem:[#allocation44_spill] sm:$0xff] %v2952_v51  ;;  %v544_v51 = vsel %vm526_vm2, %v2788_v60, %v2794_v62 }
 0x16c   : > { %1313 = vrot.lane.b32.xlu1 %v2730_v59, %s2480_s20  ;;  %1311 = vrot.lane.b32.xlu0 %v2720_v57, %s2480_s20 }
 0x16e   : > { %v2956_v55 = vpop.permute.xlu1 %913  ;;  %v2958_v54 = vpop.permute.xlu0 %911 }
 0x16f   : > { %5226 = vst [vmem:[#allocation45_spill] sm:$0xff] %v2956_v55  ;;  %5227 = vst [vmem:[#allocation46_spill] sm:$0xff] %v2958_v54 }
 0x170   : > { %1320 = vrot.lane.b32.xlu1 %v2726_v58, %s2480_s20  ;;  %1318 = vrot.lane.b32.xlu0 %v2716_v56, %s2480_s20  ;;  %s2997_s20 = sld [smem:[#allocation5 + $0x36]] }
 0x172   : > { %v2964_v45 = vpop.permute.xlu1 %920  ;;  %v2966_v46 = vpop.permute.xlu0 %918 }
 0x173   : > { %5228 = vst [vmem:[#allocation47_spill] sm:$0xff] %v2964_v45  ;;  %5229 = vst [vmem:[#allocation48_spill] sm:$0xff] %v2966_v46  ;;  %v527_v46 = vsel %vm526_vm2, %v2790_v61, %v2796_v63 }
 0x174   : > { %1340 = vrot.lane.b32.xlu1 %v2730_v59, %s2481_s26  ;;  %1338 = vrot.lane.b32.xlu0 %v2720_v57, %s2481_s26 }
 0x176   : > { %v2986_v55 = vpop.permute.xlu1 %940  ;;  %v2992_v54 = vpop.permute.xlu0 %938 }
 0x177   : > { %5230 = vst [vmem:[#allocation49_spill] sm:$0xff] %v2986_v55  ;;  %5231 = vst [vmem:[#allocation50_spill] sm:$0xff] %v2992_v54  ;;  %v3018_v54 = vadd.s32 128, %v2995_v48 }
 0x178   : > { %1347 = vrot.lane.b32.xlu1 %v2726_v58, %s2481_s26  ;;  %1345 = vrot.lane.b32.xlu0 %v2716_v56, %s2481_s26  ;;  %s3022_s26 = sld [smem:[#allocation5 + $0x3a]] }
 0x179   : > { %5237 = vst [vmem:[#allocation55_spill] sm:$0xff] %v3018_v54  ;;  %v3055_v41 = vand.u32 15, %v3018_v54 }
 0x17a   : > { %v3009_v55 = vpop.permute.xlu1 %947  ;;  %v3015_v47 = vpop.permute.xlu0 %945 }
 0x17b   : > { %5234 = vst [vmem:[#allocation52_spill] sm:$0xff] %v3009_v55  ;;  %5236 = vst [vmem:[#allocation54_spill] sm:$0xff] %v3015_v47  ;;  %v3027_v55 = vand.u32 15, %v2995_v48  ;;  %v549_v47 = vstv %s2962_s5  ;;  %s3061_s5 = sld [smem:[#allocation5 + $0xd]]  ;;  %vm434_vm6 = vcmp.ge.s32.totalorder %v3055_v41, 3  ;;  %vm5165_vm9 = vcmp.ge.s32.totalorder %v3055_v41, 2 }
 0x17c   : > { %1367 = vrot.lane.b32.xlu1 %v2730_v59, %s5123_s11  ;;  %1365 = vrot.lane.b32.xlu0 %v2720_v57, %s5123_s11  ;;  %s3048_s11 = sld [smem:[#allocation5 + $0xc]]  ;;  %v551_v44 = vmul.f32 %v549_v47, %v544_v51  ;;  %vm5169_vm0 = vcmp.ge.s32.totalorder %v3055_v41, 1 }
 0x17d   : > { %vm5174_vm5 = vcmp.ge.s32.totalorder %v3027_v55, 3  ;;  %vm445_vm7 = vcmp.ge.s32.totalorder %v3027_v55, 2  ;;  %vm5166_vm10 = vcmp.ge.s32.totalorder %v3027_v55, 1  ;;  %vm5167_vm14 = vcmp.lt.s32.totalorder %v3027_v55, 15 }
 0x17e   : > { %v3042_v49 = vpop.permute.xlu1 %967  ;;  %v3052_v0 = vpop.permute.xlu0 %965  ;;  %vm3178_vm13 = vmand %vm427_vm4, %vm5174_vm5 }
 0x17f   : > { %5240 = vst [vmem:[#allocation58_spill] sm:$0xff] %v3042_v49  ;;  %5241 = vst [vmem:[#allocation59_spill] sm:$0xff] %v3052_v0  ;;  %v545_v0 = vsel %vm526_vm2, %v2794_v62, %v2788_v60  ;;  %v528_v49 = vsel %vm526_vm2, %v2796_v63, %v2790_v61  ;;  %v548_v60 = vmul.f32 %v546_v50, %v527_v46  ;;  %vm5170_vm2 = vcmp.lt.s32.totalorder %v3055_v41, 15 }
 0x180   : > { %1374 = vrot.lane.b32.xlu1 %v2726_v58, %s5242_s17  ;;  %1372 = vrot.lane.b32.xlu0 %v2716_v56, %s5242_s17  ;;  %s3093_s17 = sld [smem:[#allocation5 + $0xf]]  ;;  %v550_v61 = vmul.f32 %v549_v47, %v545_v0  ;;  %v547_v63 = vmul.f32 %v546_v50, %v528_v49  ;;  %v571_v62 = vsel %vm564_vm3, %v2808_v4, %v2806_v3  ;;  %v5250_v47 = vstv %s2972_s18  ;;  %s5153_s18 = smov 110   ;;  %vm3237_vm1 = vmand %vm427_vm4, %vm445_vm7 }
 0x181   : > { %v572_v0 = vsel %vm564_vm3, %v2806_v3, %v2808_v4  ;;  %v565_v3 = vsel %vm564_vm3, %v2802_v2, %v2800_v1  ;;  %v566_v4 = vsel %vm564_vm3, %v2800_v1, %v2802_v2  ;;  %v5251_v45 = vmov %v5250_v47 }
 0x182   : > { %v3081_v43 = vpop.permute.xlu1 %974  ;;  %v3097_v42 = vpop.permute.xlu0 %972  ;;  %v3162_v46 = vadd.f32 %v550_v61, %v547_v63  ;;  %v577_v54 = vmul.f32 %v5250_v47, %v572_v0  ;;  %v553_v2 = vadd.f32 %v551_v44, %v548_v60  ;;  %v5257_v0 = vstv %s2970_s3  ;;  %s3206_s3 = sld [smem:[#allocation5 + $0x43]] }
 0x183   : > { %5243 = vst [vmem:[#allocation60_spill] sm:$0xff] %v3081_v43  ;;  %5244 = vst [vmem:[#allocation61_spill] sm:$0xff] %v3097_v42  ;;  %v578_v42 = vmul.f32 %v5251_v45, %v571_v62  ;;  %v574_v47 = vmul.f32 %v5257_v0, %v566_v4  ;;  %v5258_v51 = vmov %v5257_v0  ;;  %v593_v44 = vsel %vm591_vm8, %v2812_v5, %v2814_v6 }
 0x184   : > { %1394 = vrot.lane.b32.xlu1 %v2730_v59, %s5145_s12  ;;  %1392 = vrot.lane.b32.xlu0 %v2720_v57, %s5145_s12  ;;  %s3144_s12 = sld [smem:[#allocation5 + $0x11]]  ;;  %v575_v50 = vmul.f32 %v5258_v51, %v565_v3  ;;  %v598_v60 = vsel %vm591_vm8, %v2820_v8, %v2818_v7  ;;  %v592_v51 = vsel %vm591_vm8, %v2814_v6, %v2812_v5  ;;  %v5259_v3 = vstv %s2977_s27  ;;  %s5267_s27 = smov 110  }
 0x185   : > { %v653_v5 = vsel %vm645_vm12, %v2842_v15, %v2844_v16  ;;  %vm495_vm3 = vcmp.lt.s32.totalorder %v3027_v55, 14 }
 0x186   : > { %v3125_v43 = vpop.permute.xlu1 %994  ;;  %v3138_v49 = vpop.permute.xlu0 %992  ;;  %v580_v61 = vadd.f32 %v578_v42, %v575_v50  ;;  %v5263_v42 = vstv %s2974_s4  ;;  %s3283_s4 = sld [smem:[#allocation5 + $0x44]] }
 0x187   : > { %5247 = vst [vmem:[#allocation64_spill] sm:$0xff] %v3125_v43  ;;  %5248 = vst [vmem:[#allocation65_spill] sm:$0xff] %v3138_v49  ;;  %v599_v43 = vsel %vm591_vm8, %v2818_v7, %v2820_v8  ;;  %v3221_v8 = vadd.f32 %v577_v54, %v574_v47  ;;  %v601_v50 = vmul.f32 %v5263_v42, %v593_v44  ;;  %v5264_v47 = vmov %v5259_v3 }
 0x188   : > { %1401 = vrot.lane.b32.xlu1 %v2726_v58, %s5249_s9  ;;  %1399 = vrot.lane.b32.xlu0 %v2716_v56, %s5249_s9  ;;  %s3189_s9 = sld [smem:[#allocation5 + $0x12]]  ;;  %v604_v4 = vmul.f32 %v5259_v3, %v599_v43  ;;  %v3231_v43 = vsel %vm434_vm6, %v553_v2, 0.0  ;;  %v605_v3 = vmul.f32 %v5264_v47, %v598_v60  ;;  %v652_v2 = vsel %vm645_vm12, %v2844_v16, %v2842_v15  ;;  %vm3296_vm8 = vmand %vm427_vm4, %vm5166_vm10 }
 0x189   : > { %v5266_v0 = vmov %v5263_v42  ;;  %v647_v44 = vsel %vm645_vm12, %v2836_v13, %v2838_v14  ;;  %v626_v16 = vsel %vm618_vm11, %v2830_v11, %v2832_v12  ;;  %v625_v60 = vsel %vm618_vm11, %v2832_v12, %v2830_v11  ;;  %vm3351_vm10 = vmand %vm427_vm4, %vm5167_vm14 }
 0x18a   : > { %v3172_v49 = vpop.permute.xlu1 %1001  ;;  %v3187_v63 = vpop.permute.xlu0 %999  ;;  %v602_v45 = vmul.f32 %v5266_v0, %v592_v51  ;;  %v3268_v15 = vadd.f32 %v604_v4, %v601_v50  ;;  %v646_v51 = vsel %vm645_vm12, %v2838_v14, %v2836_v13  ;;  %v5268_v0 = vstv %s2988_s19  ;;  %s2485_s19 = smov 109  }
 0x18b   : > { %5252 = vst [vmem:[#allocation66_spill] sm:$0xff] %v3172_v49  ;;  %5255 = vst [vmem:[#allocation67_spill] sm:$0xff] %v3187_v63  ;;  %v658_v47 = vmul.f32 %v5268_v0, %v653_v5  ;;  %v3290_v50 = vsel %vm5165_vm9, %v580_v61, 0.0  ;;  %v620_v14 = vsel %vm618_vm11, %v2824_v9, %v2826_v10  ;;  %v5271_v5 = vmov %v5268_v0 }
 0x18c   : > { %1421 = vrot.lane.b32.xlu1 %v2730_v59, %s5153_s18  ;;  %1419 = vrot.lane.b32.xlu0 %v2720_v57, %s5153_s18  ;;  %s3252_s18 = sld [smem:[#allocation5 + $0x18]]  ;;  %v659_v0 = vmul.f32 %v5271_v5, %v652_v2  ;;  %vm699_vm12 = vcmp.lt.s32.totalorder %v2995_v48, 45  ;;  %v607_v61 = vadd.f32 %v605_v3, %v602_v45  ;;  %v5272_v4 = vstv %s2984_s30  ;;  %s3376_s30 = sld [smem:[#allocation5 + $0x46]] }
 0x18d   : > { %v655_v7 = vmul.f32 %v5272_v4, %v647_v44  ;;  %v5274_v63 = vstv %s2982_s6  ;;  %v5275_v2 = vmov %v5272_v4  ;;  %v680_v45 = vsel %vm672_vm15, %v2854_v19, %v2856_v20 }
 0x18e   : > { %5256 = sst [smem:[#allocation68_spill]] %s3189_s9  ;;  %v3227_v6 = vpop.permute.xlu1 %1021  ;;  %v3250_v62 = vpop.permute.xlu0 %1019  ;;  %v631_v49 = vmul.f32 %v5274_v63, %v626_v16  ;;  %v656_v5 = vmul.f32 %v5275_v2, %v646_v51  ;;  %v619_v12 = vsel %vm618_vm11, %v2826_v10, %v2824_v9  ;;  %v5277_v63 = vstv %s2979_s28  ;;  %s3458_s28 = sld [smem:[#allocation5 + $0x16]] }
 0x18f   : > { %5260 = vst [vmem:[#allocation69_spill] sm:$0xff] %v3227_v6  ;;  %5265 = vst [vmem:[#allocation70_spill] sm:$0xff] %v3250_v62  ;;  %s3331_s9 = sld [smem:[#allocation5 + $0x45]]  ;;  %v628_v44 = vmul.f32 %v5277_v63, %v620_v14  ;;  %v660_v16 = vadd.f32 %v658_v47, %v655_v7  ;;  %vm726_vm9 = vcmp.lt.s32.totalorder %v2995_v48, 35  ;;  %v5278_v51 = vstv %s2982_s6 }
 0x190   : > { %1428 = vrot.lane.b32.xlu1 %v2726_v58, %s5267_s27  ;;  %1426 = vrot.lane.b32.xlu0 %v2716_v56, %s5267_s27  ;;  %s3329_s27 = sld [smem:[#allocation5 + $0x14]]  ;;  %v632_v4 = vmul.f32 %v5278_v51, %v625_v60  ;;  %v661_v9 = vadd.f32 %v659_v0, %v656_v5  ;;  %v674_v10 = vsel %vm672_vm15, %v2848_v17, %v2850_v18  ;;  %v3367_v47 = vsel %vm5169_vm0, %v607_v61, 0.0  ;;  %s3374_s6 = sld [smem:[#allocation5 + $0x15]] }
 0x191   : > { %v679_v7 = vsel %vm672_vm15, %v2856_v20, %v2854_v19  ;;  %vm5175_vm11 = vcmp.lt.s32.totalorder %v3055_v41, 14  ;;  %v5281_v14 = vstv %s2997_s20  ;;  %v1183_v20 = vstv %s3254_s25  ;;  %s2486_s25 = smov 99  }
 0x192   : > { %v3307_v42 = vpop.permute.xlu1 %1028  ;;  %v3316_v6 = vpop.permute.xlu0 %1026  ;;  %v685_v0 = vmul.f32 %v5281_v14, %v680_v45  ;;  %v1181_v19 = vstv %s3252_s18  ;;  %v629_v51 = vmul.f32 %v5277_v63, %v619_v12  ;;  %v633_v3 = vadd.f32 %v631_v49, %v628_v44  ;;  %s3584_s18 = sld [smem:[#allocation5 + $0x19]] }
 0x193   : > { %5273 = vst [vmem:[#allocation71_spill] sm:$0xff] %v3316_v6  ;;  %v673_v61 = vsel %vm672_vm15, %v2850_v18, %v2848_v17  ;;  %vm753_vm14 = vcmp.lt.s32.totalorder %v2995_v48, 34  ;;  %v664_v14 = vsel %vm3351_vm10, %v660_v16, 0.0  ;;  %v5282_v62 = vstv %s2990_s21  ;;  %vm3435_vm15 = vmand %vm427_vm4, %vm495_vm3 }
 0x194   : > { %1448 = vrot.lane.b32.xlu1 %v2730_v59, %s2485_s19  ;;  %1446 = vrot.lane.b32.xlu0 %v2720_v57, %s2485_s19  ;;  %v682_v11 = vmul.f32 %v5282_v62, %v674_v10  ;;  %v5283_v6 = vstv %s2997_s20  ;;  %vm5173_vm0 = vcmp.lt.s32.totalorder %v3027_v55, 13  ;;  %v3400_v17 = vadd.f32 %v632_v4, %v629_v51  ;;  %s3559_s20 = sld [smem:[#allocation5 + $0x17]] }
 0x195   : > { %v686_v12 = vmul.f32 %v5283_v6, %v679_v7  ;;  %v665_v18 = vsel %vm5170_vm2, %v661_v9, 0.0  ;;  %v1182_v16 = vmul.f32 %v1181_v19, %v2704_v52  ;;  %v1184_v62 = vmul.f32 %v1183_v20, %v2706_v53 }
 0x196   : > { %5276 = sst [smem:[#allocation72_spill]] %s3329_s27  ;;  %v3363_v60 = vpop.permute.xlu1 %1048  ;;  %v3372_v5 = vpop.permute.xlu0 %1046  ;;  %v5284_v6 = vstv %s2990_s21  ;;  %v687_v10 = vadd.f32 %v685_v0, %v682_v11  ;;  %v706_v4 = vsel %vm699_vm12, %v2868_v24, %v2866_v23  ;;  %v707_v9 = vsel %vm699_vm12, %v2866_v23, %v2868_v24  ;;  %s3497_s21 = sld [smem:[#allocation5 + $0x47]] }
 0x197   : > { %v683_v2 = vmul.f32 %v5284_v6, %v673_v61  ;;  %vm780_vm10 = vcmp.lt.s32.totalorder %v2995_v48, 33  ;;  %v3423_v52 = vsel %vm427_vm4, %v633_v3, 0.0  ;;  %v5285_v53 = vsel %vm3178_vm13, %v3162_v46, 0.0  ;;  %s5328_s27 = sld [smem:[#allocation56_spill]]  ;;  %v5346_v6 = vld [vmem:[#allocation45_spill] sm:$0xff] }
 0x198   : > { %1455 = vrot.lane.b32.xlu1 %v2726_v58, %s2485_s19  ;;  %1453 = vrot.lane.b32.xlu0 %v2716_v56, %s2485_s19  ;;  %v3429_v11 = vadd.f32 %v664_v14, %v5285_v53  ;;  %vm439_vm2 = vcmp.ge.s32.totalorder %v2995_v48, 32  ;;  %v3445_v46 = vadd.f32 %v665_v18, %v3231_v43  ;;  %v700_v0 = vsel %vm699_vm12, %v2862_v22, %v2860_v21  ;;  %s3606_s19 = sld [smem:[#allocation5 + $0x4a]]  ;;  %v5345_v18 = vld [vmem:[#allocation46_spill] sm:$0xff] }
 0x199   : > { %v688_v3 = vadd.f32 %v686_v12, %v683_v2  ;;  %v701_v19 = vsel %vm699_vm12, %v2860_v21, %v2862_v22  ;;  %vm508_vm13 = vcmp.lt.s32.totalorder %v3055_v41, 13  ;;  %v5288_v43 = vstv %s3002_s1  ;;  %s5293_s1 = sld [smem:[#allocation51_spill]] }
 0x19a   : > { %v3404_v44 = vpop.permute.xlu1 %1055  ;;  %v3419_v7 = vpop.permute.xlu0 %1053  ;;  %v712_v20 = vmul.f32 %v5288_v43, %v707_v9  ;;  %v5289_v63 = vmov %v5288_v43  ;;  %v733_v61 = vsel %vm726_vm9, %v2880_v28, %v2878_v27  ;;  %v734_v21 = vsel %vm726_vm9, %v2878_v27, %v2880_v28 }
 0x19b   : > { %v713_v51 = vmul.f32 %v5289_v63, %v706_v4  ;;  %vm807_vm12 = vcmp.lt.s32.totalorder %v2995_v48, 32  ;;  %v691_v14 = vsel %vm3435_vm15, %v687_v10, 0.0  ;;  %v3481_v2 = vadd.f32 %v1184_v62, %v1182_v16 }
 0x19c   : > { %1475 = vrot.lane.b32.xlu1 %v2730_v59, %s2486_s25  ;;  %1473 = vrot.lane.b32.xlu0 %v2720_v57, %s2486_s25  ;;  %v5291_v4 = vstv %s2999_s0  ;;  %v727_v27 = vsel %vm726_vm9, %v2874_v26, %v2872_v25  ;;  %v728_v28 = vsel %vm726_vm9, %v2872_v25, %v2874_v26  ;;  %v5294_v16 = vstv %s3007_s24  ;;  %s5299_s0 = sld [smem:[#allocation53_spill]]  ;;  %vm3541_vm9 = vmand %vm427_vm4, %vm5173_vm0  ;;  %s2487_s24 = smov 98  }
 0x19d   : > { %5290 = vst [vmem:[#allocation73_spill] sm:$0xff] %v3481_v2  ;;  %v709_v9 = vmul.f32 %v5291_v4, %v701_v19  ;;  %v5292_v53 = vmov %v5291_v4  ;;  %v739_v62 = vmul.f32 %v5294_v16, %v734_v21  ;;  %v5295_v10 = vmov %v5294_v16 }
 0x19e   : > { %v3473_v22 = vpop.permute.xlu1 %1075  ;;  %v3477_v12 = vpop.permute.xlu0 %1073  ;;  %v710_v43 = vmul.f32 %v5292_v53, %v700_v0  ;;  %v740_v23 = vmul.f32 %v5295_v10, %v733_v61  ;;  %v760_v0 = vsel %vm753_vm14, %v2892_v32, %v2890_v31  ;;  %v761_v25 = vsel %vm753_vm14, %v2890_v31, %v2892_v32 }
 0x19f   : > { %v692_v26 = vsel %vm5175_vm11, %v688_v3, 0.0  ;;  %v5296_v19 = vsel %vm3237_vm1, %v3221_v8, 0.0  ;;  %v714_v61 = vadd.f32 %v712_v20, %v709_v9  ;;  %v5297_v53 = vstv %s5293_s1  ;;  %vm3617_vm1 = vmand %vm439_vm2, %vm445_vm7  ;;  %s2488_s1 = smov 97  }
 0x1a0   : > { %1482 = vrot.lane.b32.xlu1 %v2726_v58, %s2486_s25  ;;  %1480 = vrot.lane.b32.xlu0 %v2716_v56, %s2486_s25  ;;  %v3519_v63 = vadd.f32 %v691_v14, %v5296_v19  ;;  %v715_v21 = vadd.f32 %v713_v51, %v710_v43  ;;  %v736_v16 = vmul.f32 %v5297_v53, %v728_v28  ;;  %v5302_v20 = vstv %s3013_s14  ;;  %s3568_s14 = sld [smem:[#allocation5 + $0x48]]  ;;  %s3637_s25 = sld [smem:[#allocation5 + $0x4b]]  ;;  %vm3918_vm11 = vmand %vm439_vm2, %vm495_vm3 }
 0x1a1   : > { %v5298_v10 = vmov %v5297_v53  ;;  %v754_v32 = vsel %vm753_vm14, %v2886_v30, %v2884_v29  ;;  %v755_v8 = vsel %vm753_vm14, %v2884_v29, %v2886_v30  ;;  %v766_v51 = vmul.f32 %v5302_v20, %v761_v25  ;;  %vm3592_vm14 = vmand %vm439_vm2, %vm5174_vm5 }
 0x1a2   : > { %v3521_v4 = vpop.permute.xlu1 %1082  ;;  %v737_v31 = vmul.f32 %v5298_v10, %v727_v27  ;;  %v3535_v54 = vpop.permute.xlu0 %1080  ;;  %v5303_v14 = vmov %v5302_v20  ;;  %v787_v29 = vsel %vm780_vm10, %v2904_v36, %v2902_v35  ;;  %v788_v30 = vsel %vm780_vm10, %v2902_v35, %v2904_v36 }
 0x1a3   : > { %v767_v9 = vmul.f32 %v5303_v14, %v760_v0  ;;  %v3562_v43 = vadd.f32 %v692_v26, %v3290_v50  ;;  %v741_v27 = vadd.f32 %v739_v62, %v736_v16  ;;  %vm834_vm4 = vcmp.lt.s32.totalorder %v2995_v48, 31 }
 0x1a4   : > { %1502 = vrot.lane.b32.xlu1 %v2730_v59, %s2487_s24  ;;  %v742_v28 = vadd.f32 %v740_v23, %v737_v31  ;;  %1500 = vrot.lane.b32.xlu0 %v2720_v57, %s2487_s24  ;;  %v5304_v35 = vstv %s5299_s0  ;;  %v781_v50 = vsel %vm780_vm10, %v2898_v34, %v2896_v33  ;;  %v782_v62 = vsel %vm780_vm10, %v2896_v33, %v2898_v34  ;;  %s3680_s0 = sld [smem:[#allocation5 + $0x4c]] }
 0x1a5   : > { %v763_v36 = vmul.f32 %v5304_v35, %v755_v8  ;;  %v5305_v25 = vmov %v5304_v35  ;;  %v718_v26 = vsel %vm3541_vm9, %v714_v61, 0.0  ;;  %v5308_v16 = vstv %s3022_s26  ;;  %s3635_s26 = sld [smem:[#allocation5 + $0x1a]] }
 0x1a6   : > { %v764_v19 = vmul.f32 %v5305_v25, %v754_v32  ;;  %v3582_v23 = vpop.permute.xlu1 %1102  ;;  %v793_v10 = vmul.f32 %v5308_v16, %v788_v30  ;;  %v5309_v33 = vmov %v5308_v16  ;;  %v815_v31 = vsel %vm807_vm12, %v2914_v39, %v2916_v40  ;;  %v3604_v32 = vpop.permute.xlu0 %1100 }
 0x1a7   : > { %v794_v34 = vmul.f32 %v5309_v33, %v787_v29  ;;  %v719_v61 = vsel %vm508_vm13, %v715_v21, 0.0  ;;  %v768_v8 = vadd.f32 %v766_v51, %v763_v36  ;;  %v5312_v29 = vstv %s3020_s29  ;;  %s3654_s29 = sld [smem:[#allocation5 + $0x1b]] }
 0x1a8   : > { %v769_v3 = vadd.f32 %v767_v9, %v764_v19  ;;  %1509 = vrot.lane.b32.xlu1 %v2726_v58, %s2487_s24  ;;  %v790_v30 = vmul.f32 %v5312_v29, %v782_v62  ;;  %v5313_v35 = vmov %v5312_v29  ;;  %v809_v21 = vsel %vm807_vm12, %v2908_v37, %v2910_v38  ;;  %1507 = vrot.lane.b32.xlu0 %v2716_v56, %s2487_s24  ;;  %s3714_s24 = sld [smem:[#allocation5 + $0x4d]] }
 0x1a9   : > { %v791_v25 = vmul.f32 %v5313_v35, %v781_v50  ;;  %v814_v51 = vsel %vm807_vm12, %v2916_v40, %v2914_v39  ;;  %v5314_v9 = vsel %vm3296_vm8, %v3268_v15, 0.0  ;;  %v745_v19 = vsel %vm3592_vm14, %v741_v27, 0.0  ;;  %v5323_v35 = vld [vmem:[#allocation36_spill] sm:$0xff] }
 0x1aa   : > { %v3643_v36 = vadd.f32 %v718_v26, %v5314_v9  ;;  %v746_v39 = vsel %vm434_vm6, %v742_v28, 0.0  ;;  %v5315_v40 = vstv %s3031_s22  ;;  %vm888_vm10 = vcmp.lt.s32.totalorder %v2995_v48, 29  ;;  %v3652_v62 = vpop.permute.xlu1 %1109  ;;  %v3662_v28 = vpop.permute.xlu0 %1107  ;;  %s5325_s22 = sld [smem:[#allocation57_spill]] }
 0x1ab   : > { %v820_v50 = vmul.f32 %v5315_v40, %v815_v31  ;;  %v721_v15 = vadd.f32 %v719_v61, %v3367_v47  ;;  %v795_v13 = vadd.f32 %v793_v10, %v790_v30  ;;  %v796_v26 = vadd.f32 %v794_v34, %v791_v25  ;;  %v5324_v25 = vld [vmem:[#allocation35_spill] sm:$0xff] }
 0x1ac   : > { %v808_v27 = vsel %vm807_vm12, %v2910_v38, %v2908_v37  ;;  %vm915_vm8 = vcmp.lt.s32.totalorder %v2995_v48, 19  ;;  %v772_v53 = vsel %vm3617_vm1, %v768_v8, 0.0  ;;  %vm5316_vm15 = vcmp.ge.s32.totalorder %v3027_v55, 1  ;;  %1529 = vrot.lane.b32.xlu1 %v2730_v59, %s2488_s1  ;;  %1527 = vrot.lane.b32.xlu0 %v2720_v57, %s2488_s1 }
 0x1ad   : > { %vm3670_vm9 = vmand %vm439_vm2, %vm5316_vm15  ;;  %v5319_v16 = vstv %s3029_s10  ;;  %v5320_v37 = vmov %v5315_v40  ;;  %v3683_v34 = vadd.f32 %v745_v19, %v3423_v52  ;;  %v3686_v31 = vadd.f32 %v746_v39, %v3400_v17  ;;  %s3712_s10 = sld [smem:[#allocation5 + $0x1c]] }
 0x1ae   : > { %v817_v10 = vmul.f32 %v5319_v16, %v809_v21  ;;  %v821_v38 = vmul.f32 %v5320_v37, %v814_v51  ;;  %vm5321_vm12 = vcmp.ge.s32.totalorder %v3055_v41, 2  ;;  %vm861_vm14 = vcmp.lt.s32.totalorder %v2995_v48, 30  ;;  %v3699_v21 = vpop.permute.xlu1 %1129  ;;  %v3709_v19 = vpop.permute.xlu0 %1127 }
 0x1af   : > { %v773_v61 = vsel %vm5321_vm12, %v769_v3, 0.0  ;;  %v5322_v14 = vmov %v5319_v16  ;;  %v842_v52 = vsel %vm834_vm4, %v5324_v25, %v5323_v35  ;;  %v3703_v51 = vadd.f32 %v772_v53, %v3429_v11  ;;  %v5352_v16 = vld [vmem:[#allocation37_spill] sm:$0xff] }
 0x1b0   : > { %v818_v29 = vmul.f32 %v5322_v14, %v808_v27  ;;  %v822_v30 = vadd.f32 %v820_v50, %v817_v10  ;;  %v799_v3 = vsel %vm3670_vm9, %v795_v13, 0.0  ;;  %vm5326_vm1 = vcmp.ge.s32.totalorder %v3055_v41, 1  ;;  %v5329_v50 = vld [vmem:[#allocation34_spill] sm:$0xff]  ;;  %v5330_v27 = vld [vmem:[#allocation33_spill] sm:$0xff]  ;;  %1536 = vrot.lane.b32.xlu1 %v2726_v58, %s2488_s1  ;;  %1534 = vrot.lane.b32.xlu0 %v2716_v56, %s2488_s1  ;;  %s2489_s1 = smov 96  }
 0x1b1   : > { %v800_v9 = vsel %vm5326_vm1, %v796_v26, 0.0  ;;  %v3717_v40 = vadd.f32 %v773_v61, %v3445_v46  ;;  %v836_v13 = vsel %vm834_vm4, %v5330_v27, %v5329_v50  ;;  %v841_v26 = vsel %vm834_vm4, %v5323_v35, %v5324_v25  ;;  %v5351_v10 = vld [vmem:[#allocation38_spill] sm:$0xff] }
 0x1b2   : > { %v823_v11 = vadd.f32 %v821_v38, %v818_v29  ;;  %v835_v46 = vsel %vm834_vm4, %v5329_v50, %v5330_v27  ;;  %v5331_v53 = vstv %s5325_s22  ;;  %vm451_vm15 = vcmp.ge.s32.totalorder %v2995_v48, 16  ;;  %v3746_v14 = vpop.permute.xlu1 %1136  ;;  %v5334_v27 = vld [vmem:[#allocation43_spill] sm:$0xff]  ;;  %s3854_s22 = sld [smem:[#allocation5 + $0x4f]] }
 0x1b3   : > { %5327 = vst [vmem:[#allocation36_spill] sm:$0xff] %v3717_v40  ;;  %v847_v47 = vmul.f32 %v5331_v53, %v842_v52  ;;  %v3739_v37 = vadd.f32 %v799_v3, %v3519_v63  ;;  %v3742_v38 = vadd.f32 %v800_v9, %v3562_v43  ;;  %v826_v61 = vsel %vm439_vm2, %v822_v30, 0.0  ;;  %v3761_v3 = vpop.permute.xlu0 %1134 }
 0x1b4   : > { %v5332_v35 = vstv %s5328_s27  ;;  %v5333_v52 = vmov %v5331_v53  ;;  %v5335_v53 = vld [vmem:[#allocation44_spill] sm:$0xff]  ;;  %vm1158_vm4 = vcmp.lt.s32.totalorder %v2995_v48, 1  ;;  %v3764_v30 = vadd.f32 %v823_v11, %v721_v15  ;;  %1556 = vrot.lane.b32.xlu1 %v2730_v59, %s2489_s1  ;;  %v5339_v11 = vld [vmem:[#allocation41_spill] sm:$0xff]  ;;  %1554 = vrot.lane.b32.xlu0 %v2720_v57, %s2489_s1  ;;  %s3852_s27 = sld [smem:[#allocation5 + $0x1e]] }
 0x1b5   : > { %v844_v25 = vmul.f32 %v5332_v35, %v836_v13  ;;  %v848_v50 = vmul.f32 %v5333_v52, %v841_v26  ;;  %v895_v63 = vsel %vm888_vm10, %v5335_v53, %v5334_v27  ;;  %v896_v43 = vsel %vm888_vm10, %v5334_v27, %v5335_v53  ;;  %v5337_v26 = vld [vmem:[#allocation48_spill] sm:$0xff] }
 0x1b6   : > { %v5336_v9 = vmov %v5332_v35  ;;  %v5338_v35 = vld [vmem:[#allocation47_spill] sm:$0xff]  ;;  %vm942_vm9 = vcmp.lt.s32.totalorder %v2995_v48, 18  ;;  %v3776_v53 = vadd.f32 %v826_v61, %v3643_v36  ;;  %vm1207_vm12 = vcmp.lt.s32.totalorder %v2995_v48, 127  ;;  %v5341_v36 = vld [vmem:[#allocation40_spill] sm:$0xff] }
 0x1b7   : > { %v845_v13 = vmul.f32 %v5336_v9, %v835_v46  ;;  %v923_v52 = vsel %vm915_vm8, %v5338_v35, %v5337_v26  ;;  %v849_v15 = vadd.f32 %v847_v47, %v844_v25  ;;  %v5340_v46 = vld [vmem:[#allocation42_spill] sm:$0xff]  ;;  %v5342_v61 = vld [vmem:[#allocation39_spill] sm:$0xff]  ;;  %v5343_v25 = vstv %s3063_s7  ;;  %s3844_s7 = sld [smem:[#allocation5 + $0x4e]] }
 0x1b8   : > { %v889_v9 = vsel %vm888_vm10, %v5340_v46, %v5339_v11  ;;  %v890_v24 = vsel %vm888_vm10, %v5339_v11, %v5340_v46  ;;  %v869_v47 = vsel %vm861_vm14, %v5342_v61, %v5341_v36  ;;  %v901_v1 = vmul.f32 %v5343_v25, %v896_v43  ;;  %v3800_v46 = vpop.permute.xlu1 %1156  ;;  %1563 = vrot.lane.b32.xlu1 %v2726_v58, %s2489_s1 }
 0x1b9   : > { %v5344_v20 = vmov %v5343_v25  ;;  %v917_v11 = vsel %vm915_vm8, %v5346_v6, %v5345_v18  ;;  %vm5347_vm10 = vcmp.lt.s32.totalorder %v3027_v55, 15  ;;  %v850_v43 = vadd.f32 %v848_v50, %v845_v13  ;;  %1561 = vrot.lane.b32.xlu0 %v2716_v56, %s2489_s1  ;;  %s4629_s1 = sld [smem:[#allocation5 + $0x25]] }
 0x1ba   : > { %v902_v0 = vmul.f32 %v5344_v20, %v895_v63  ;;  %vm3806_vm1 = vmand %vm439_vm2, %vm5347_vm10  ;;  %v5350_v25 = vstv %s3079_s13  ;;  %v3812_v63 = vpop.permute.xlu0 %1154  ;;  %v863_v8 = vsel %vm861_vm14, %v5352_v16, %v5351_v10  ;;  %v5353_v49 = vstv %s3061_s5  ;;  %s3842_s5 = sld [smem:[#allocation5 + $0x1d]]  ;;  %s2492_s13 = smov 93  }
 0x1bb   : > { %v928_v20 = vmul.f32 %v5350_v25, %v923_v52  ;;  %v898_v45 = vmul.f32 %v5353_v49, %v890_v24  ;;  %v5354_v39 = vmov %v5353_v49  ;;  %v922_v50 = vsel %vm915_vm8, %v5337_v26, %v5338_v35  ;;  %vm3864_vm10 = vmand %vm439_vm2, %vm5173_vm0 }
 0x1bc   : > { %v899_v17 = vmul.f32 %v5354_v39, %v889_v9  ;;  %v862_v13 = vsel %vm861_vm14, %v5351_v10, %v5352_v16  ;;  %v868_v49 = vsel %vm861_vm14, %v5341_v36, %v5342_v61  ;;  %v5355_v24 = vstv %s3050_s2  ;;  %v1164_v36 = vpop.permute.xlu1 %1163  ;;  %s2490_s2 = smov 95  }
 0x1bd   : > { %v874_v39 = vmul.f32 %v5355_v24, %v869_v47  ;;  %v5356_v52 = vstv %s3071_s8  ;;  %v853_v16 = vsel %vm3806_vm1, %v849_v15, 0.0  ;;  %v903_v10 = vadd.f32 %v901_v1, %v898_v45  ;;  %1583 = vrot.lane.b32.xlu1 %v2730_v59, %s2490_s2  ;;  %1581 = vrot.lane.b32.xlu0 %v2720_v57, %s2490_s2  ;;  %s2494_s8 = smov 82  }
 0x1be   : > { %v925_v9 = vmul.f32 %v5356_v52, %v917_v11  ;;  %v904_v26 = vadd.f32 %v902_v0, %v899_v17  ;;  %v916_v35 = vsel %vm915_vm8, %v5345_v18, %v5346_v6  ;;  %vm5357_vm14 = vcmp.lt.s32.totalorder %v3055_v41, 15  ;;  %v1162_v0 = vpop.permute.xlu0 %1161 }
 0x1bf   : > { %v854_v61 = vsel %vm5357_vm14, %v850_v43, 0.0  ;;  %v5358_v47 = vstv %s3048_s11  ;;  %v5361_v1 = vmov %v5350_v25  ;;  %vm969_vm8 = vcmp.lt.s32.totalorder %v2995_v48, 17  ;;  %vm3880_vm14 = vmand %vm451_vm15, %vm5174_vm5  ;;  %s2491_s11 = smov 94  }
 0x1c0   : > { %v871_v27 = vmul.f32 %v5358_v47, %v863_v8  ;;  %v929_v18 = vmul.f32 %v5361_v1, %v922_v50  ;;  %v930_v6 = vadd.f32 %v928_v20, %v925_v9  ;;  %vm996_vm1 = vcmp.lt.s32.totalorder %v2995_v48, 16 }
 0x1c1   : > { %v5362_v17 = vmov %v5358_v47  ;;  %v5363_v8 = vmov %v5355_v24  ;;  %vm1050_vm0 = vcmp.lt.s32.totalorder %v2995_v48, 14  ;;  %v3887_v25 = vsel %vm1158_vm4, %v1162_v0, %v1164_v36  ;;  %v5368_v24 = vld [vmem:[#allocation52_spill] sm:$0xff]  ;;  %1590 = vrot.lane.b32.xlu1 %v2726_v58, %s2490_s2  ;;  %1588 = vrot.lane.b32.xlu0 %v2716_v56, %s2490_s2  ;;  %s2130_s2 = sld [smem:[#allocation5 + $0x58]] }
 0x1c2   : > { %v872_v15 = vmul.f32 %v5362_v17, %v862_v13  ;;  %v875_v11 = vmul.f32 %v5363_v8, %v868_v49  ;;  %v3891_v20 = vsel %vm1158_vm4, %v1164_v36, %v1162_v0  ;;  %v3894_v50 = vadd.f32 %v874_v39, %v871_v27  ;;  %v5374_v0 = vld [vmem:[#allocation50_spill] sm:$0xff] }
 0x1c3   : > { %v5367_v13 = vmov %v5356_v52  ;;  %v5369_v52 = vld [vmem:[#allocation54_spill] sm:$0xff]  ;;  %vm1234_vm5 = vcmp.lt.s32.totalorder %v2995_v48, 126  ;;  %v3909_v39 = vadd.f32 %v853_v16, %v3683_v34  ;;  %v5370_v47 = vmov 0  ;;  %v1206_v34 = vpop.permute.xlu1 %1205 }
 0x1c4   : > { %5366 = vst [vmem:[#allocation35_spill] sm:$0xff] %v3894_v50  ;;  %v926_v49 = vmul.f32 %v5367_v13, %v916_v35  ;;  %v949_v9 = vsel %vm942_vm9, %v5369_v52, %v5368_v24  ;;  %v950_v36 = vsel %vm942_vm9, %v5368_v24, %v5369_v52  ;;  %v3912_v35 = vadd.f32 %v854_v61, %v3686_v31  ;;  %v5373_v61 = vld [vmem:[#allocation49_spill] sm:$0xff] }
 0x1c5   : > { %v5371_v47 = vsel %vm3918_vm11, 4294967295, %v5370_v47  ;;  %v907_v27 = vsel %vm3864_vm10, %v903_v10, 0.0  ;;  %v908_v1 = vsel %vm508_vm13, %v904_v26, 0.0  ;;  %v934_v16 = vsel %vm3880_vm14, %v930_v6, 0.0  ;;  %v1204_v26 = vpop.permute.xlu0 %1203  ;;  %1610 = vrot.lane.b32.xlu1 %v2730_v59, %s2491_s11  ;;  %1608 = vrot.lane.b32.xlu0 %v2720_v57, %s2491_s11 }
 0x1c6   : > { %5372 = vst [vmem:[#allocation34_spill] sm:$0xff] %v5371_v47  ;;  %v931_v31 = vadd.f32 %v929_v18, %v926_v49  ;;  %v943_v17 = vsel %vm942_vm9, %v5374_v0, %v5373_v61  ;;  %v944_v10 = vsel %vm942_vm9, %v5373_v61, %v5374_v0  ;;  %v5375_v45 = vstv %s3095_s23  ;;  %vm3994_vm9 = vmand %vm451_vm15, %vm445_vm7  ;;  %s5439_s23 = sld [smem:[#allocation63_spill]] }
 0x1c7   : > { %v955_v8 = vmul.f32 %v5375_v45, %v950_v36  ;;  %v5376_v18 = vmov %v5375_v45  ;;  %v1208_v6 = vsel %vm1207_vm12, %v1204_v26, %v1206_v34  ;;  %v1209_v43 = vsel %vm1207_vm12, %v1206_v34, %v1204_v26 }
 0x1c8   : > { %v956_v13 = vmul.f32 %v5376_v18, %v949_v9  ;;  %v3945_v49 = vadd.f32 %v875_v11, %v872_v15  ;;  %v5377_v61 = vstv %s3093_s17  ;;  %v1213_v18 = vpop.permute.xlu1 %1212  ;;  %v3960_v11 = vadd.f32 %v907_v27, %v3739_v37  ;;  %s2495_s17 = smov 81  }
 0x1c9   : > { %v952_v9 = vmul.f32 %v5377_v61, %v944_v10  ;;  %v5378_v0 = vmov %v5377_v61  ;;  %v3963_v26 = vadd.f32 %v908_v1, %v3742_v38  ;;  %v935_v24 = vsel %vm434_vm6, %v931_v31, 0.0  ;;  %v1211_v61 = vpop.permute.xlu0 %1210  ;;  %1617 = vrot.lane.b32.xlu1 %v2726_v58, %s2491_s11  ;;  %1615 = vrot.lane.b32.xlu0 %v2716_v56, %s2491_s11  ;;  %s2082_s11 = sld [smem:[#allocation5 + $0x28]] }
 0x1ca   : > { %v953_v45 = vmul.f32 %v5378_v0, %v943_v17  ;;  %v3968_v10 = vadd.f32 %v934_v16, %v3776_v53  ;;  %v1214_v34 = vsel %vm1207_vm12, %v1211_v61, %v1213_v18  ;;  %v1215_v37 = vsel %vm1207_vm12, %v1213_v18, %v1211_v61 }
 0x1cb   : > { %v3970_v17 = vadd.f32 %v955_v8, %v952_v9  ;;  %v5379_v38 = vstv %s3584_s18  ;;  %v5381_v15 = vstv %s3606_s19  ;;  %vm1261_vm2 = vcmp.lt.s32.totalorder %v2995_v48, 125  ;;  %s2498_s18 = smov 78   ;;  %s4543_s19 = sld [smem:[#allocation5 + $0x22]] }
 0x1cc   : > { %v958_v0 = vadd.f32 %v956_v13, %v953_v45  ;;  %v1217_v27 = vmul.f32 %v5379_v38, %v1208_v6  ;;  %v5380_v1 = vmov %v5379_v38  ;;  %v1220_v53 = vmul.f32 %v5381_v15, %v1214_v34  ;;  %v5385_v6 = vld [vmem:[#allocation58_spill] sm:$0xff]  ;;  %v1233_v34 = vpop.permute.xlu1 %1232 }
 0x1cd   : > { %v1218_v31 = vmul.f32 %v5380_v1, %v1209_v43  ;;  %v5382_v16 = vmov %v5381_v15  ;;  %v3988_v8 = vadd.f32 %v935_v24, %v3764_v30  ;;  %v5386_v43 = vld [vmem:[#allocation59_spill] sm:$0xff]  ;;  %v5388_v24 = vld [vmem:[#allocation64_spill] sm:$0xff]  ;;  %v1051_v15 = vsel %vm1050_vm0, %v3372_v5, %v3363_v60  ;;  %v1231_v1 = vpop.permute.xlu0 %1230  ;;  %1637 = vrot.lane.b32.xlu1 %v2730_v59, %s2492_s13  ;;  %1635 = vrot.lane.b32.xlu0 %v2720_v57, %s2492_s13 }
 0x1ce   : > { %v1221_v36 = vmul.f32 %v5382_v16, %v1215_v37  ;;  %v970_v9 = vsel %vm969_vm8, %v5386_v43, %v5385_v6  ;;  %v971_v45 = vsel %vm969_vm8, %v5385_v6, %v5386_v43  ;;  %v5387_v30 = vld [vmem:[#allocation65_spill] sm:$0xff]  ;;  %v1052_v61 = vsel %vm1050_vm0, %v3363_v60, %v3372_v5  ;;  %v5391_v6 = vld [vmem:[#allocation66_spill] sm:$0xff]  ;;  %v5392_v43 = vld [vmem:[#allocation67_spill] sm:$0xff] }
 0x1cf   : > { %v998_v18 = vsel %vm996_vm1, %v5388_v24, %v5387_v30  ;;  %v4018_v37 = vadd.f32 %v1220_v53, %v1217_v27  ;;  %vm1023_vm12 = vcmp.lt.s32.totalorder %v2995_v48, 15  ;;  %v1057_v16 = vsel %vm1050_vm0, %v3419_v7, %v3404_v44 }
 0x1d0   : > { %v4020_v38 = vadd.f32 %v1221_v36, %v1218_v31  ;;  %v1058_v60 = vsel %vm1050_vm0, %v3404_v44, %v3419_v7  ;;  %v1235_v5 = vsel %vm1234_vm5, %v1231_v1, %v1233_v34  ;;  %v1236_v36 = vsel %vm1234_vm5, %v1233_v34, %v1231_v1 }
 0x1d1   : > { %v961_v27 = vsel %vm3994_vm9, %v3970_v17, 0.0  ;;  %vm5389_vm10 = vcmp.ge.s32.totalorder %v3055_v41, 2  ;;  %v997_v44 = vsel %vm996_vm1, %v5387_v30, %v5388_v24  ;;  %v5390_v7 = vstv %s3144_s12  ;;  %v1240_v24 = vpop.permute.xlu1 %1239  ;;  %1644 = vrot.lane.b32.xlu1 %v2726_v58, %s2492_s13  ;;  %1642 = vrot.lane.b32.xlu0 %v2716_v56, %s2492_s13  ;;  %s2131_s13 = sld [smem:[#allocation5 + $0x59]] }
 0x1d2   : > { %v962_v31 = vsel %vm5389_vm10, %v958_v0, 0.0  ;;  %v1006_v53 = vmul.f32 %v5390_v7, %v998_v18  ;;  %v1003_v13 = vsel %vm996_vm1, %v5392_v43, %v5391_v6  ;;  %v1004_v17 = vsel %vm996_vm1, %v5391_v6, %v5392_v43  ;;  %v1238_v6 = vpop.permute.xlu0 %1237 }
 0x1d3   : > { %v5393_v0 = vstv %s3266_s15  ;;  %v5395_v18 = vstv %s3283_s4  ;;  %v1159_v29 = vsel %vm1158_vm4, %v3812_v63, %v3800_v46  ;;  %v5401_v2 = vstv %s3637_s25  ;;  %s5406_s15 = sld [smem:[#allocation62_spill]]  ;;  %s4361_s4 = sld [smem:[#allocation5 + $0x50]] }
 0x1d4   : > { %v1060_v34 = vmul.f32 %v5393_v0, %v1052_v61  ;;  %v5394_v1 = vmov %v5393_v0  ;;  %v1063_v7 = vmul.f32 %v5395_v18, %v1058_v60  ;;  %v5396_v52 = vmov %v5395_v18  ;;  %s2499_s25 = smov 77  }
 0x1d5   : > { %v1061_v30 = vmul.f32 %v5394_v1, %v1051_v15  ;;  %v1064_v33 = vmul.f32 %v5396_v52, %v1057_v16  ;;  %v1160_v61 = vsel %vm1158_vm4, %v3800_v46, %v3812_v63  ;;  %v5397_v15 = vstv %s3568_s14  ;;  %vm4110_vm4 = vmand %vm451_vm15, %vm495_vm3  ;;  %s4510_s14 = sld [smem:[#allocation5 + $0x52]] }
 0x1d6   : > { %v1171_v43 = vmul.f32 %v5397_v15, %v3891_v20  ;;  %v5398_v60 = vmov %v5397_v15  ;;  %v1241_v16 = vsel %vm1234_vm5, %v1238_v6, %v1240_v24  ;;  %v1242_v0 = vsel %vm1234_vm5, %v1240_v24, %v1238_v6 }
 0x1d7   : > { %v1172_v52 = vmul.f32 %v5398_v60, %v3887_v25  ;;  %v5399_v1 = vstv %s3635_s26  ;;  %v1247_v40 = vmul.f32 %v5401_v2, %v1241_v16  ;;  %v5402_v20 = vmov %v5401_v2  ;;  %v1260_v2 = vpop.permute.xlu1 %1259  ;;  %s4545_s26 = sld [smem:[#allocation5 + $0x53]] }
 0x1d8   : > { %v1244_v46 = vmul.f32 %v5399_v1, %v1235_v5  ;;  %v5400_v63 = vmov %v5399_v1  ;;  %v1248_v15 = vmul.f32 %v5402_v20, %v1242_v0  ;;  %vm1288_vm0 = vcmp.lt.s32.totalorder %v2995_v48, 115  ;;  %v1258_v20 = vpop.permute.xlu0 %1257 }
 0x1d9   : > { %v1245_v18 = vmul.f32 %v5400_v63, %v1236_v36  ;;  %v5403_v25 = vstv %s3148_s16  ;;  %vm1104_vm5 = vcmp.lt.s32.totalorder %v2995_v48, 3  ;;  %v5405_v24 = vstv %s3559_s20  ;;  %s5424_s16 = sld [smem:[#allocation68_spill]]  ;;  %s4508_s20 = sld [smem:[#allocation5 + $0x21]] }
 0x1da   : > { %v1009_v60 = vmul.f32 %v5403_v25, %v1004_v17  ;;  %v5404_v50 = vmov %v5403_v25  ;;  %v1168_v6 = vmul.f32 %v5405_v24, %v1160_v61  ;;  %v5407_v5 = vmov %v5405_v24 }
 0x1db   : > { %v1010_v47 = vmul.f32 %v5404_v50, %v1003_v13  ;;  %v1169_v36 = vmul.f32 %v5407_v5, %v1159_v29  ;;  %v1065_v16 = vadd.f32 %v1063_v7, %v1060_v34  ;;  %v1066_v0 = vadd.f32 %v1064_v33, %v1061_v30 }
 0x1dc   : > { %v4102_v1 = vadd.f32 %v1247_v40, %v1244_v46  ;;  %v4104_v63 = vadd.f32 %v1248_v15, %v1245_v18  ;;  %v1173_v13 = vadd.f32 %v1171_v43, %v1168_v6  ;;  %v1262_v29 = vsel %vm1261_vm2, %v1258_v20, %v1260_v2  ;;  %v5414_v15 = vld [vmem:[#allocation61_spill] sm:$0xff]  ;;  %v1265_v5 = vpop.permute.xlu0 %1264 }
 0x1dd   : > { %v1174_v17 = vadd.f32 %v1172_v52, %v1169_v36  ;;  %v1263_v33 = vsel %vm1261_vm2, %v1260_v2, %v1258_v20  ;;  %v963_v40 = vadd.f32 %v961_v27, %v3909_v39  ;;  %v5410_v34 = vstv %s5406_s15  ;;  %v5413_v52 = vld [vmem:[#allocation60_spill] sm:$0xff]  ;;  %s4747_s15 = sld [smem:[#allocation5 + $0x29]] }
 0x1de   : > { %v4122_v30 = vmul.f32 %v5410_v34, %v971_v45  ;;  %v5411_v7 = vmov %v5410_v34  ;;  %v5412_v46 = vstv %s3144_s12  ;;  %v964_v43 = vadd.f32 %v962_v31, %v3912_v35  ;;  %v1267_v45 = vpop.permute.xlu1 %1266  ;;  %v5415_v35 = vld [vmem:[#allocation69_spill] sm:$0xff]  ;;  %v5416_v31 = vld [vmem:[#allocation70_spill] sm:$0xff]  ;;  %s2493_s12 = smov 83  }
 0x1df   : > { %v4126_v61 = vmul.f32 %v5411_v7, %v970_v9  ;;  %v1007_v18 = vmul.f32 %v5412_v46, %v997_v44  ;;  %v4136_v25 = vsel %vm969_vm8, %v5414_v15, %v5413_v52  ;;  %v4142_v39 = vsel %vm969_vm8, %v5413_v52, %v5414_v15  ;;  %1664 = vrot.lane.b32.xlu1 %v2730_v59, %s2493_s12 }
 0x1e0   : > { %v1011_v9 = vadd.f32 %v1009_v60, %v1006_v53  ;;  %v1024_v44 = vsel %vm1023_vm12, %v5416_v31, %v5415_v35  ;;  %v1069_v24 = vsel %vm4110_vm4, %v1065_v16, 0.0  ;;  %vm5417_vm1 = vcmp.lt.s32.totalorder %v3055_v41, 14  ;;  %1662 = vrot.lane.b32.xlu0 %v2720_v57, %s2493_s12 }
 0x1e1   : > { %v4144_v27 = vadd.f32 %v1010_v47, %v1007_v18  ;;  %v1070_v6 = vsel %vm5417_vm1, %v1066_v0, 0.0  ;;  %vm1131_vm8 = vcmp.lt.s32.totalorder %v2995_v48, 2  ;;  %vm5418_vm14 = vcmp.ge.s32.totalorder %v3027_v55, 1 }
 0x1e2   : > { %v1177_v53 = vsel %vm5418_vm14, %v1173_v13, 0.0  ;;  %vm5419_vm9 = vcmp.ge.s32.totalorder %v3055_v41, 1  ;;  %v1268_v60 = vsel %vm1261_vm2, %v1265_v5, %v1267_v45  ;;  %v1269_v36 = vsel %vm1261_vm2, %v1267_v45, %v1265_v5  ;;  %v1287_v52 = vpop.permute.xlu1 %1286  ;;  %v1285_v5 = vpop.permute.xlu0 %1284 }
 0x1e3   : > { %v1178_v47 = vsel %vm5419_vm9, %v1174_v17, 0.0  ;;  %v5420_v2 = vstv %s3654_s29  ;;  %v5422_v50 = vstv %s3680_s0  ;;  %vm1315_vm10 = vcmp.lt.s32.totalorder %v2995_v48, 114  ;;  %1671 = vrot.lane.b32.xlu1 %v2726_v58, %s2493_s12  ;;  %s4574_s29 = sld [smem:[#allocation5 + $0x23]]  ;;  %s4576_s0 = sld [smem:[#allocation5 + $0x54]] }
 0x1e4   : > { %v1271_v16 = vmul.f32 %v5420_v2, %v1262_v29  ;;  %v5421_v0 = vmov %v5420_v2  ;;  %v1274_v34 = vmul.f32 %v5422_v50, %v1268_v60  ;;  %v5423_v7 = vmov %v5422_v50  ;;  %1669 = vrot.lane.b32.xlu0 %v2716_v56, %s2493_s12  ;;  %s4749_s12 = sld [smem:[#allocation5 + $0x5a]] }
 0x1e5   : > { %v1272_v20 = vmul.f32 %v5421_v0, %v1263_v33  ;;  %v1275_v13 = vmul.f32 %v5423_v7, %v1269_v36  ;;  %v1015_v17 = vsel %vm451_vm15, %v1011_v9, 0.0  ;;  %v1025_v46 = vsel %vm1023_vm12, %v5415_v35, %v5416_v31 }
 0x1e6   : > { %v1071_v18 = vadd.f32 %v1069_v24, %v963_v40  ;;  %v1072_v29 = vadd.f32 %v1070_v6, %v964_v43  ;;  %v1111_v33 = vsel %vm1104_vm5, %v3662_v28, %v3652_v62  ;;  %v1112_v15 = vsel %vm1104_vm5, %v3652_v62, %v3662_v28 }
 0x1e7   : > { %v1276_v9 = vadd.f32 %v1274_v34, %v1271_v16  ;;  %v1277_v45 = vadd.f32 %v1275_v13, %v1272_v20  ;;  %v1289_v43 = vsel %vm1288_vm0, %v1285_v5, %v1287_v52  ;;  %v1290_v31 = vsel %vm1288_vm0, %v1287_v52, %v1285_v5  ;;  %v5430_v34 = vld [vmem:[#allocation71_spill] sm:$0xff]  ;;  %1691 = vrot.lane.b32.xlu1 %v2730_v59, %s2494_s8 }
 0x1e8   : > { %v1179_v35 = vadd.f32 %v1177_v53, %v1071_v18  ;;  %v1180_v40 = vadd.f32 %v1178_v47, %v1072_v29  ;;  %v1105_v62 = vsel %vm1104_vm5, %v3604_v32, %v3582_v23  ;;  %v1106_v28 = vsel %vm1104_vm5, %v3582_v23, %v3604_v32  ;;  %v1294_v23 = vpop.permute.xlu1 %1293  ;;  %v1292_v18 = vpop.permute.xlu0 %1291  ;;  %1689 = vrot.lane.b32.xlu0 %v2720_v57, %s2494_s8 }
 0x1e9   : > { %vm5425_vm2 = vcmp.lt.s32.totalorder %v3027_v55, 13  ;;  %v1281_v6 = vsel %vm508_vm13, %v1277_v45, 0.0  ;;  %v5426_v53 = vstv %s3376_s30  ;;  %v5428_v32 = vstv %s5424_s16  ;;  %s5467_s30 = sld [smem:[#allocation72_spill]]  ;;  %s4753_s16 = sld [smem:[#allocation5 + $0x2a]] }
 0x1ea   : > { %v1280_v24 = vsel %vm5425_vm2, %v1276_v9, 0.0  ;;  %v1117_v47 = vmul.f32 %v5426_v53, %v1112_v15  ;;  %v5427_v60 = vmov %v5426_v53  ;;  %v4212_v16 = vadd.f32 %v1281_v6, %v1180_v40 }
 0x1eb   : > { %v1118_v36 = vmul.f32 %v5427_v60, %v1111_v33  ;;  %v4210_v2 = vadd.f32 %v1280_v24, %v1179_v35  ;;  %v1033_v0 = vmul.f32 %v5428_v32, %v1025_v46  ;;  %v5429_v20 = vmov %v5428_v32  ;;  %1698 = vrot.lane.b32.xlu1 %v2726_v58, %s2494_s8 }
 0x1ec   : > { %v1034_v50 = vmul.f32 %v5429_v20, %v1024_v44  ;;  %v1030_v7 = vsel %vm1023_vm12, %v5430_v34, %v3307_v42  ;;  %v1031_v13 = vsel %vm1023_vm12, %v3307_v42, %v5430_v34  ;;  %v5431_v29 = vstv %s3374_s6  ;;  %v5435_v42 = vld [vmem:[#allocation55_spill] sm:$0xff]  ;;  %v1314_v20 = vpop.permute.xlu1 %1313  ;;  %1696 = vrot.lane.b32.xlu0 %v2716_v56, %s2494_s8  ;;  %s2496_s6 = smov 80   ;;  %s4755_s8 = sld [smem:[#allocation5 + $0x5b]] }
 0x1ed   : > { %v1114_v52 = vmul.f32 %v5431_v29, %v1106_v28  ;;  %v5432_v33 = vmov %v5431_v29  ;;  %v1295_v44 = vsel %vm1288_vm0, %v1292_v18, %v1294_v23  ;;  %v1296_v46 = vsel %vm1288_vm0, %v1294_v23, %v1292_v18 }
 0x1ee   : > { %v1115_v15 = vmul.f32 %v5432_v33, %v1105_v62  ;;  %v5433_v9 = vstv %s3712_s10  ;;  %vm478_vm12 = vcmp.lt.s32.totalorder %v5435_v42, 240  ;;  %v5436_v40 = vstv %s3714_s24  ;;  %s4601_s10 = sld [smem:[#allocation5 + $0x24]]  ;;  %s4603_s24 = sld [smem:[#allocation5 + $0x55]] }
 0x1ef   : > { %v1298_v45 = vmul.f32 %v5433_v9, %v1289_v43  ;;  %v5434_v5 = vmov %v5433_v9  ;;  %v1301_v24 = vmul.f32 %v5436_v40, %v1295_v44  ;;  %v5437_v28 = vmov %v5436_v40  ;;  %1718 = vrot.lane.b32.xlu1 %v2730_v59, %s2495_s17 }
 0x1f0   : > { %v1299_v35 = vmul.f32 %v5434_v5, %v1290_v31  ;;  %v1302_v6 = vmul.f32 %v5437_v28, %v1296_v46  ;;  %vm1342_vm5 = vcmp.lt.s32.totalorder %v2995_v48, 113  ;;  %v5438_v62 = vstv %s3206_s3  ;;  %1716 = vrot.lane.b32.xlu0 %v2720_v57, %s2495_s17  ;;  %s4359_s3 = sld [smem:[#allocation5 + $0x1f]] }
 0x1f1   : > { %v1036_v53 = vmul.f32 %v5438_v62, %v1031_v13  ;;  %v5440_v60 = vmov %v5438_v62  ;;  %v1119_v32 = vadd.f32 %v1117_v47, %v1114_v52  ;;  %v1120_v43 = vadd.f32 %v1118_v36, %v1115_v15  ;;  %v1312_v13 = vpop.permute.xlu0 %1311 }
 0x1f2   : > { %v1037_v23 = vmul.f32 %v5440_v60, %v1030_v7  ;;  %v1132_v31 = vsel %vm1131_vm8, %v3709_v19, %v3699_v21  ;;  %v1133_v34 = vsel %vm1131_vm8, %v3699_v21, %v3709_v19  ;;  %v4258_v18 = vadd.f32 %v1301_v24, %v1298_v45 }
 0x1f3   : > { %v4260_v29 = vadd.f32 %v1302_v6, %v1299_v35  ;;  %v1138_v47 = vsel %vm1131_vm8, %v3761_v3, %v3746_v14  ;;  %v1139_v36 = vsel %vm1131_vm8, %v3746_v14, %v3761_v3  ;;  %v1316_v7 = vsel %vm1315_vm10, %v1312_v13, %v1314_v20  ;;  %1725 = vrot.lane.b32.xlu1 %v2726_v58, %s2495_s17 }
 0x1f4   : > { %v1317_v21 = vsel %vm1315_vm10, %v1314_v20, %v1312_v13  ;;  %v5441_v19 = vstv %s5439_s23  ;;  %v1017_v14 = vadd.f32 %v1015_v17, %v3960_v11  ;;  %v1018_v3 = vadd.f32 %v4144_v27, %v3963_v26  ;;  %1723 = vrot.lane.b32.xlu0 %v2716_v56, %s2495_s17  ;;  %s4757_s23 = sld [smem:[#allocation5 + $0x2b]]  ;;  %s4759_s17 = sld [smem:[#allocation5 + $0x5c]] }
 0x1f5   : > { %v982_v52 = vmul.f32 %v5441_v19, %v4142_v39  ;;  %v5442_v33 = vmov %v5441_v19  ;;  %v1038_v44 = vadd.f32 %v1036_v53, %v1033_v0  ;;  %v1039_v46 = vadd.f32 %v1037_v23, %v1034_v50  ;;  %v1319_v40 = vpop.permute.xlu0 %1318 }
 0x1f6   : > { %v983_v15 = vmul.f32 %v5442_v33, %v4136_v25  ;;  %vm1077_vm0 = vcmp.lt.s32.totalorder %v2995_v48, 13  ;;  %vm5443_vm4 = vcmp.ge.s32.totalorder %v3027_v55, 3  ;;  %v1124_v39 = vsel %vm434_vm6, %v1120_v43, 0.0  ;;  %v1321_v25 = vpop.permute.xlu1 %1320 }
 0x1f7   : > { %v1123_v9 = vsel %vm5443_vm4, %v1119_v32, 0.0  ;;  %vm5444_vm1 = vcmp.lt.s32.totalorder %v3027_v55, 15  ;;  %v5447_v26 = vstv %s3458_s28  ;;  %v5449_v50 = vstv %s3497_s21  ;;  %1745 = vrot.lane.b32.xlu1 %v2730_v59, %s2496_s6  ;;  %s4445_s28 = sld [smem:[#allocation5 + $0x51]]  ;;  %s2497_s21 = smov 79  }
 0x1f8   : > { %vm4294_vm8 = vmand %vm451_vm15, %vm5444_vm1  ;;  %v1141_v27 = vmul.f32 %v5447_v26, %v1133_v34  ;;  %v5448_v17 = vmov %v5447_v26  ;;  %v1144_v45 = vmul.f32 %v5449_v50, %v1139_v36  ;;  %v5450_v5 = vmov %v5449_v50  ;;  %1743 = vrot.lane.b32.xlu0 %v2720_v57, %s2496_s6 }
 0x1f9   : > { %v1142_v0 = vmul.f32 %v5448_v17, %v1132_v31  ;;  %v1145_v35 = vmul.f32 %v5450_v5, %v1138_v47  ;;  %vm5451_vm14 = vmmov %vm5444_vm1  ;;  %vm5452_vm9 = vcmp.lt.s32.totalorder %v3055_v41, 15  ;;  %v1322_v6 = vsel %vm1315_vm10, %v1319_v40, %v1321_v25  ;;  %v1339_v11 = vpop.permute.xlu0 %1338 }
 0x1fa   : > { %v1226_v24 = vsel %vm5451_vm14, %v4018_v37, 0.0  ;;  %v1227_v28 = vsel %vm5452_vm9, %v4020_v38, 0.0  ;;  %v1323_v62 = vsel %vm1315_vm10, %v1321_v25, %v1319_v40  ;;  %v5453_v53 = vstv %s3842_s5  ;;  %vm5457_vm10 = vmmov %vm5452_vm9  ;;  %s4631_s5 = sld [smem:[#allocation5 + $0x56]] }
 0x1fb   : > { %v1325_v60 = vmul.f32 %v5453_v53, %v1316_v7  ;;  %v5454_v23 = vmov %v5453_v53  ;;  %v5455_v43 = vstv %s3844_s7  ;;  %vm1369_vm2 = vcmp.lt.s32.totalorder %v2995_v48, 112  ;;  %v1341_v7 = vpop.permute.xlu1 %1340  ;;  %1752 = vrot.lane.b32.xlu1 %v2726_v58, %s2496_s6  ;;  %s4656_s7 = sld [smem:[#allocation5 + $0x26]] }
 0x1fc   : > { %v1326_v32 = vmul.f32 %v5454_v23, %v1317_v21  ;;  %v1328_v20 = vmul.f32 %v5455_v43, %v1322_v6  ;;  %v5456_v37 = vmov %v5455_v43  ;;  %v1042_v38 = vsel %vm4294_vm8, %v1038_v44, 0.0  ;;  %1750 = vrot.lane.b32.xlu0 %v2716_v56, %s2496_s6  ;;  %s4769_s6 = sld [smem:[#allocation5 + $0x2d]] }
 0x1fd   : > { %v1329_v31 = vmul.f32 %v5456_v37, %v1323_v62  ;;  %v1043_v34 = vsel %vm5457_vm10, %v1039_v46, 0.0  ;;  %v1125_v13 = vadd.f32 %v1123_v9, %v1017_v14  ;;  %v1126_v47 = vadd.f32 %v1124_v39, %v1018_v3 }
 0x1fe   : > { %vm5458_vm4 = vcmp.ge.s32.totalorder %v3055_v41, 2  ;;  %v1146_v21 = vadd.f32 %v1144_v45, %v1141_v27  ;;  %v1147_v19 = vadd.f32 %v1145_v35, %v1142_v0  ;;  %v1330_v33 = vadd.f32 %v1328_v20, %v1325_v60 }
 0x1ff   : > { %vm4335_vm1 = vmand %vm478_vm12, %vm5458_vm4  ;;  %v1331_v25 = vadd.f32 %v1329_v31, %v1326_v32  ;;  %v1228_v44 = vadd.f32 %v1226_v24, %v1125_v13  ;;  %v1229_v26 = vadd.f32 %v1227_v28, %v1126_v47  ;;  %v1343_v14 = vsel %vm1342_vm5, %v1339_v11, %v1341_v7  ;;  %1772 = vrot.lane.b32.xlu1 %v2730_v59, %s2497_s21 }
 0x200   : > { %v1344_v3 = vsel %vm1342_vm5, %v1341_v7, %v1339_v11  ;;  %v4345_v46 = vadd.f32 %v982_v52, %v4122_v30  ;;  %v985_v9 = vadd.f32 %v983_v15, %v4126_v61  ;;  %v1334_v39 = vsel %vm445_vm7, %v1330_v33, 0.0  ;;  %v1348_v30 = vpop.permute.xlu1 %1347  ;;  %vm5461_vm8 = vmmov %vm5458_vm4  ;;  %v1346_v15 = vpop.permute.xlu0 %1345  ;;  %1770 = vrot.lane.b32.xlu0 %v2720_v57, %s2497_s21 }
 0x201   : > { %v1335_v27 = vsel %vm4335_vm1, %v1331_v25, 0.0  ;;  %v1044_v17 = vadd.f32 %v1042_v38, %v3968_v10  ;;  %v1045_v0 = vadd.f32 %v1043_v34, %v3988_v8  ;;  %v4355_v50 = vadd.f32 %v1334_v39, %v1228_v44 }
 0x202   : > { %v4357_v45 = vadd.f32 %v1335_v27, %v1229_v26  ;;  %v1084_v10 = vsel %vm1077_vm0, %v3535_v54, %v3521_v4  ;;  %v1085_v8 = vsel %vm1077_vm0, %v3521_v4, %v3535_v54  ;;  %v1150_v61 = vsel %vm445_vm7, %v1146_v21, 0.0 }
 0x203   : > { %v1151_v52 = vsel %vm5461_vm8, %v1147_v19, 0.0  ;;  %v1253_v5 = vsel %vm495_vm3, %v4102_v1, 0.0  ;;  %vm5462_vm14 = vcmp.lt.s32.totalorder %v3055_v41, 14  ;;  %v1349_v40 = vsel %vm1342_vm5, %v1346_v15, %v1348_v30  ;;  %1779 = vrot.lane.b32.xlu1 %v2726_v58, %s2497_s21 }
 0x204   : > { %v1254_v35 = vsel %vm5462_vm14, %v4104_v63, 0.0  ;;  %v1350_v4 = vsel %vm1342_vm5, %v1348_v30, %v1346_v15  ;;  %v5463_v54 = vstv %s3852_s27  ;;  %v5465_v1 = vstv %s3854_s22  ;;  %v1368_v37 = vpop.permute.xlu1 %1367  ;;  %vm5479_vm1 = vmmov %vm5462_vm14  ;;  %1777 = vrot.lane.b32.xlu0 %v2716_v56, %s2497_s21  ;;  %s4658_s27 = sld [smem:[#allocation5 + $0x57]] }
 0x205   : > { %v1352_v24 = vmul.f32 %v5463_v54, %v1343_v14  ;;  %v5464_v28 = vmov %v5463_v54  ;;  %v1355_v62 = vmul.f32 %v5465_v1, %v1349_v40  ;;  %v5466_v53 = vmov %v5465_v1  ;;  %s2081_s22 = sld [smem:[#allocation5 + $0x27]] }
 0x206   : > { %v1353_v6 = vmul.f32 %v5464_v28, %v1344_v3  ;;  %v1356_v60 = vmul.f32 %v5466_v53, %v1350_v4  ;;  %v1078_v63 = vsel %vm1077_vm0, %v3477_v12, %v3473_v22  ;;  %v1079_v23 = vsel %vm1077_vm0, %v3473_v22, %v3477_v12  ;;  %v1366_v22 = vpop.permute.xlu0 %1365  ;;  %v5485_v28 = vld [vmem:[#allocation35_spill] sm:$0xff]  ;;  %s4791_s21 = sld [smem:[#allocation5 + $0x2f]] }
 0x207   : > { %v1152_v32 = vadd.f32 %v1150_v61, %v1044_v17  ;;  %v1153_v43 = vadd.f32 %v1151_v52, %v1045_v0  ;;  %vm5468_vm5 = vcmp.ge.s32.totalorder %v3055_v41, 1  ;;  %v5471_v31 = vstv %s3331_s9  ;;  %s4437_s9 = sld [smem:[#allocation5 + $0x20]]  ;;  %1799 = vrot.lane.b32.xlu1 %v2730_v59, %s2498_s18 }
 0x208   : > { %vm4407_vm9 = vmand %vm478_vm12, %vm5468_vm5  ;;  %v1090_v38 = vmul.f32 %v5471_v31, %v1085_v8  ;;  %v5472_v34 = vmov %v5471_v31  ;;  %v1357_v47 = vadd.f32 %v1355_v62, %v1352_v24  ;;  %v1358_v36 = vadd.f32 %v1356_v60, %v1353_v6  ;;  %v1375_v0 = vpop.permute.xlu1 %1374  ;;  %v5487_v62 = vld [vmem:[#allocation36_spill] sm:$0xff]  ;;  %v5488_v60 = vld [vmem:[#allocation31_spill] sm:$0xff]  ;;  %1797 = vrot.lane.b32.xlu0 %v2720_v57, %s2498_s18 }
 0x209   : > { %v1091_v13 = vmul.f32 %v5472_v34, %v1084_v10  ;;  %v1255_v12 = vadd.f32 %v1253_v5, %v1152_v32  ;;  %v1256_v7 = vadd.f32 %v1254_v35, %v1153_v43  ;;  %v1370_v21 = vsel %vm1369_vm2, %v1366_v22, %v1368_v37  ;;  %vm5480_vm14 = vmmov %vm5468_vm5 }
 0x20a   : > { %v1371_v19 = vsel %vm1369_vm2, %v1368_v37, %v1366_v22  ;;  %vm5473_vm0 = vcmp.ge.s32.totalorder %v3027_v55, 1  ;;  %v5476_v25 = vstv %s5467_s30  ;;  %v1362_v3 = vsel %vm4407_vm9, %v1358_v36, 0.0  ;;  %v1373_v52 = vpop.permute.xlu0 %1372  ;;  %v5490_v36 = vld [vmem:[#allocation32_spill] sm:$0xff]  ;;  %s4771_s30 = sld [smem:[#allocation5 + $0x5e]] }
 0x20b   : > { %vm4424_vm10 = vmand %vm451_vm15, %vm5473_vm0  ;;  %v1087_v11 = vmul.f32 %v5476_v25, %v1079_v23  ;;  %v5477_v44 = vmov %v5476_v25  ;;  %v4441_v27 = vadd.f32 %v1362_v3, %v1256_v7  ;;  %v1378_v17 = vstv %s4359_s3  ;;  %1806 = vrot.lane.b32.xlu1 %v2726_v58, %s2498_s18  ;;  %s4761_s3 = sld [smem:[#allocation5 + $0x2c]] }
 0x20c   : > { %v1088_v26 = vmul.f32 %v5477_v44, %v1078_v63  ;;  %vm5478_vm4 = vmmov %vm5473_vm0  ;;  %v1381_v30 = vstv %s4361_s4  ;;  %v881_v10 = vsel %vm5479_vm1, %v3945_v49, 0.0  ;;  %vm1396_vm8 = vcmp.lt.s32.totalorder %v2995_v48, 111  ;;  %v5489_v63 = vld [vmem:[#allocation73_spill] sm:$0xff]  ;;  %v1395_v32 = vpop.permute.xlu1 %1394  ;;  %1804 = vrot.lane.b32.xlu0 %v2716_v56, %s2498_s18  ;;  %s4765_s4 = sld [smem:[#allocation5 + $0x5d]]  ;;  %s4817_s18 = sld [smem:[#allocation5 + $0x61]] }
 0x20d   : > { %v1361_v14 = vsel %vm5478_vm4, %v1357_v47, 0.0  ;;  %v1092_v8 = vadd.f32 %v1090_v38, %v1087_v11  ;;  %v988_v15 = vsel %vm4424_vm10, %v4345_v46, 0.0  ;;  %v989_v5 = vsel %vm5480_vm14, %v985_v9, 0.0 }
 0x20e   : > { %v4439_v39 = vadd.f32 %v1361_v14, %v1255_v12  ;;  %v1093_v61 = vadd.f32 %v1091_v13, %v1088_v26  ;;  %vm5481_vm5 = vcmp.lt.s32.totalorder %v3027_v55, 13  ;;  %v1376_v49 = vsel %vm1369_vm2, %v1373_v52, %v1375_v0  ;;  %v1393_v38 = vpop.permute.xlu0 %1392 }
 0x20f   : > { %vm4460_vm9 = vmand %vm451_vm15, %vm5481_vm5  ;;  %v1377_v40 = vsel %vm1369_vm2, %v1375_v0, %v1373_v52  ;;  %v1379_v46 = vmul.f32 %v1378_v17, %v1370_v21  ;;  %v1380_v4 = vmul.f32 %v1378_v17, %v1371_v19  ;;  %v1382_v9 = vmul.f32 %v1381_v30, %v1376_v49  ;;  %1826 = vrot.lane.b32.xlu1 %v2730_v59, %s2499_s25 }
 0x210   : > { %v1383_v54 = vmul.f32 %v1381_v30, %v1377_v40  ;;  %v5486_v6 = vsel %vm3918_vm11, %v5485_v28, 0.0  ;;  %v883_v53 = vadd.f32 %v881_v10, %v5487_v62  ;;  %v1192_v23 = vrot.slane %v5489_v63, %v5488_v60  ;;  %vm4493_vm11 = vmand %vm478_vm12, %vm434_vm6  ;;  %v1402_v44 = vpop.permute.xlu1 %1401  ;;  %1824 = vrot.lane.b32.xlu0 %v2720_v57, %s2499_s25 }
 0x211   : > { %v882_v1 = vadd.f32 %v5486_v6, %v3703_v51  ;;  %v1096_v43 = vsel %vm4460_vm9, %v1092_v8, 0.0  ;;  %v1097_v20 = vsel %vm508_vm13, %v1093_v61, 0.0  ;;  %v1384_v37 = vadd.f32 %v1382_v9, %v1379_v46  ;;  %vm1468_vm9 = vmand %vm478_vm12, %vm508_vm13 }
 0x212   : > { %v1385_v31 = vadd.f32 %v1383_v54, %v1380_v4  ;;  %v991_v13 = vadd.f32 %v989_v5, %v883_v53  ;;  %v1397_v51 = vsel %vm1396_vm8, %v1393_v38, %v1395_v32  ;;  %v1398_v47 = vsel %vm1396_vm8, %v1395_v32, %v1393_v38  ;;  %v1400_v14 = vpop.permute.xlu0 %1399 }
 0x213   : > { %v990_v34 = vadd.f32 %v988_v15, %v882_v1  ;;  %v1196_v22 = vrot.slane %v5489_v63, %v5490_v36  ;;  %v4500_v21 = vadd.f32 %v1384_v37, %v4210_v2  ;;  %v1405_v19 = vstv %s4437_s9  ;;  %1833 = vrot.lane.b32.xlu1 %v2726_v58, %s2499_s25  ;;  %s4773_s9 = sld [smem:[#allocation5 + $0x2e]] }
 0x214   : > { %v1389_v7 = vsel %vm478_vm12, %v1385_v31, 0.0  ;;  %v1099_v25 = vadd.f32 %v1097_v20, %v991_v13  ;;  %v1408_v26 = vstv %s4445_s28  ;;  %vm1423_vm15 = vcmp.lt.s32.totalorder %v2995_v48, 110  ;;  %1831 = vrot.lane.b32.xlu0 %v2716_v56, %s2499_s25  ;;  %s4780_s28 = sld [smem:[#allocation5 + $0x5f]] }
 0x215   : > { %v1098_v33 = vadd.f32 %v1096_v43, %v990_v34  ;;  %v4505_v11 = vadd.f32 %v1389_v7, %v4212_v16  ;;  %vm5493_vm2 = vcmp.ge.s32.totalorder %v3027_v55, 3  ;;  %v1308_v3 = vsel %vm4493_vm11, %v4260_v29, 0.0  ;;  %v1422_v29 = vpop.permute.xlu1 %1421 }
 0x216   : > { %v1307_v2 = vsel %vm5493_vm2, %v4258_v18, 0.0  ;;  %v1403_v16 = vsel %vm1396_vm8, %v1400_v14, %v1402_v44  ;;  %v1404_v17 = vsel %vm1396_vm8, %v1402_v44, %v1400_v14  ;;  %v1406_v0 = vmul.f32 %v1405_v19, %v1397_v51  ;;  %v1420_v5 = vpop.permute.xlu0 %1419 }
 0x217   : > { %v1407_v30 = vmul.f32 %v1405_v19, %v1398_v47  ;;  %v1409_v10 = vmul.f32 %v1408_v26, %v1403_v16  ;;  %v1410_v8 = vmul.f32 %v1408_v26, %v1404_v17  ;;  %v1201_v18 = vadd.f32 %v1192_v23, %v1098_v33 }
 0x218   : > { %v1202_v61 = vadd.f32 %v1196_v22, %v1099_v25  ;;  %vm5494_vm0 = vcmp.lt.s32.totalorder %v3055_v41, 15  ;;  %v1424_v40 = vsel %vm1423_vm15, %v1420_v5, %v1422_v29  ;;  %v1425_v46 = vsel %vm1423_vm15, %v1422_v29, %v1420_v5 }
 0x219   : > { %vm1414_vm10 = vmand %vm478_vm12, %vm5494_vm0  ;;  %v1411_v52 = vadd.f32 %v1409_v10, %v1406_v0  ;;  %v1412_v15 = vadd.f32 %v1410_v8, %v1407_v30  ;;  %v1309_v35 = vadd.f32 %v1307_v2, %v1201_v18  ;;  %vm5495_vm4 = vcmp.lt.s32.totalorder %v3027_v55, 15  ;;  %v1429_v6 = vpop.permute.xlu1 %1428 }
 0x21a   : > { %v1310_v49 = vadd.f32 %v1308_v3, %v1202_v61  ;;  %v1432_v28 = vstv %s4508_s20  ;;  %v1435_v1 = vstv %s4510_s14  ;;  %v1427_v62 = vpop.permute.xlu0 %1426  ;;  %vm1450_vm1 = vcmp.lt.s32.totalorder %v2995_v48, 109  ;;  %s4799_s20 = sld [smem:[#allocation5 + $0x60]] }
 0x21b   : > { %v1415_v4 = vsel %vm5495_vm4, %v1411_v52, 0.0  ;;  %v1416_v9 = vsel %vm1414_vm10, %v1412_v15, 0.0  ;;  %v1430_v53 = vsel %vm1423_vm15, %v1427_v62, %v1429_v6  ;;  %v1431_v60 = vsel %vm1423_vm15, %v1429_v6, %v1427_v62  ;;  %s4801_s14 = sld [smem:[#allocation5 + $0x30]] }
 0x21c   : > { %v4537_v54 = vadd.f32 %v1415_v4, %v1309_v35  ;;  %v4539_v24 = vadd.f32 %v1416_v9, %v1310_v49  ;;  %v1433_v63 = vmul.f32 %v1432_v28, %v1424_v40  ;;  %v1434_v23 = vmul.f32 %v1432_v28, %v1425_v46 }
 0x21d   : > { %v1436_v32 = vmul.f32 %v1435_v1, %v1430_v53  ;;  %v1437_v43 = vmul.f32 %v1435_v1, %v1431_v60  ;;  %vm5496_vm8 = vcmp.lt.s32.totalorder %v3055_v41, 14  ;;  %v1449_v20 = vpop.permute.xlu1 %1448  ;;  %v1459_v36 = vstv %s4543_s19 }
 0x21e   : > { %vm1441_vm14 = vmand %vm478_vm12, %vm5496_vm8  ;;  %v1447_v38 = vpop.permute.xlu0 %1446  ;;  %v1462_v12 = vstv %s4545_s26  ;;  %vm1477_vm5 = vcmp.lt.s32.totalorder %v2995_v48, 99  ;;  %vm5497_vm11 = vcmp.lt.s32.totalorder %v3027_v55, 13  ;;  %v1486_v10 = vstv %s4574_s29 }
 0x21f   : > { %v1438_v37 = vadd.f32 %v1436_v32, %v1433_v63  ;;  %v1439_v31 = vadd.f32 %v1437_v43, %v1434_v23  ;;  %v1451_v59 = vsel %vm1450_vm1, %v1447_v38, %v1449_v20  ;;  %v1452_v34 = vsel %vm1450_vm1, %v1449_v20, %v1447_v38 }
 0x220   : > { %v1489_v18 = vstv %s4576_s0  ;;  %vm490_vm12 = vcmp.lt.s32.totalorder %v5435_v42, 224  ;;  %vm1504_vm15 = vcmp.lt.s32.totalorder %v2995_v48, 98  ;;  %vm5498_vm0 = vcmp.ge.s32.totalorder %v3027_v55, 3 }
 0x221   : > { %v1442_v57 = vsel %vm495_vm3, %v1438_v37, 0.0  ;;  %v1443_v13 = vsel %vm1441_vm14, %v1439_v31, 0.0  ;;  %v1456_v22 = vpop.permute.xlu1 %1455  ;;  %vm1495_vm2 = vmand %vm490_vm12, %vm434_vm6  ;;  %v1513_v53 = vstv %s4601_s10  ;;  %v1516_v63 = vstv %s4603_s24 }
 0x222   : > { %v4567_v51 = vadd.f32 %v1442_v57, %v4355_v50  ;;  %v4570_v47 = vadd.f32 %v1443_v13, %v4357_v45  ;;  %v1454_v58 = vpop.permute.xlu0 %1453  ;;  %v1460_v50 = vmul.f32 %v1459_v36, %v1451_v59  ;;  %v1461_v45 = vmul.f32 %v1459_v36, %v1452_v34 }
 0x223   : > { %v1457_v7 = vsel %vm1450_vm1, %v1454_v58, %v1456_v22  ;;  %v1458_v56 = vsel %vm1450_vm1, %v1456_v22, %v1454_v58  ;;  %vm1531_vm10 = vcmp.lt.s32.totalorder %v2995_v48, 97  ;;  %vm5499_vm4 = vcmp.ge.s32.totalorder %v3055_v41, 2 }
 0x224   : > { %v1463_v19 = vmul.f32 %v1462_v12, %v1457_v7  ;;  %v1464_v33 = vmul.f32 %v1462_v12, %v1458_v56  ;;  %vm1522_vm1 = vmand %vm490_vm12, %vm5499_vm4  ;;  %v1540_v7 = vstv %s4629_s1  ;;  %vm1558_vm8 = vcmp.lt.s32.totalorder %v2995_v48, 96 }
 0x225   : > { %v1476_v25 = vpop.permute.xlu1 %1475  ;;  %vm5500_vm14 = vcmp.ge.s32.totalorder %v3055_v41, 1  ;;  %vm5504_vm4 = vcmp.lt.s32.totalorder %v3055_v41, 14 }
 0x226   : > { %v1465_v44 = vadd.f32 %v1463_v19, %v1460_v50  ;;  %v1466_v26 = vadd.f32 %v1464_v33, %v1461_v45  ;;  %v1474_v14 = vpop.permute.xlu0 %1473  ;;  %v1543_v50 = vstv %s4631_s5 }
 0x227   : > { %v1478_v2 = vsel %vm1477_vm5, %v1474_v14, %v1476_v25  ;;  %v1479_v3 = vsel %vm1477_vm5, %v1476_v25, %v1474_v14 }
 0x228   : > { %v1469_v16 = vsel %vm5497_vm11, %v1465_v44, 0.0  ;;  %v1470_v17 = vsel %vm1468_vm9, %v1466_v26, 0.0  ;;  %v1488_v52 = vmul.f32 %v1486_v10, %v1479_v3  ;;  %vm5501_vm9 = vcmp.ge.s32.totalorder %v3027_v55, 1 }
 0x229   : > { %v4594_v0 = vadd.f32 %v1469_v16, %v4439_v39  ;;  %v4597_v30 = vadd.f32 %v1470_v17, %v4441_v27  ;;  %v1483_v8 = vpop.permute.xlu1 %1482  ;;  %v1487_v27 = vmul.f32 %v1486_v10, %v1478_v2  ;;  %vm1585_vm11 = vcmp.lt.s32.totalorder %v2995_v48, 95 }
 0x22a   : > { %v1481_v61 = vpop.permute.xlu0 %1480 }
 0x22b   : > { %v1484_v29 = vsel %vm1477_vm5, %v1481_v61, %v1483_v8  ;;  %v1485_v39 = vsel %vm1477_vm5, %v1483_v8, %v1481_v61  ;;  %vm1549_vm5 = vmand %vm490_vm12, %vm5500_vm14  ;;  %vm1666_vm14 = vcmp.lt.s32.totalorder %v2995_v48, 83 }
 0x22c   : > { %v1490_v15 = vmul.f32 %v1489_v18, %v1484_v29  ;;  %v1491_v5 = vmul.f32 %v1489_v18, %v1485_v39  ;;  %v1567_v29 = vstv %s4656_s7 }
 0x22d   : > { %v1503_v35 = vpop.permute.xlu1 %1502 }
 0x22e   : > { %v1492_v49 = vadd.f32 %v1490_v15, %v1487_v27  ;;  %v1493_v40 = vadd.f32 %v1491_v5, %v1488_v52  ;;  %v1501_v46 = vpop.permute.xlu0 %1500  ;;  %v1570_v27 = vstv %s4658_s27 }
 0x22f   : > { %v1505_v4 = vsel %vm1504_vm15, %v1501_v46, %v1503_v35  ;;  %v1506_v9 = vsel %vm1504_vm15, %v1503_v35, %v1501_v46 }
 0x230   : > { %v1496_v28 = vsel %vm5498_vm0, %v1492_v49, 0.0  ;;  %v1497_v6 = vsel %vm1495_vm2, %v1493_v40, 0.0  ;;  %vm5502_vm2 = vcmp.lt.s32.totalorder %v3055_v41, 15 }
 0x231   : > { %v4622_v1 = vadd.f32 %v1496_v28, %v4500_v21  ;;  %v4625_v62 = vadd.f32 %v1497_v6, %v4505_v11  ;;  %v1510_v60 = vpop.permute.xlu1 %1509  ;;  %v1514_v21 = vmul.f32 %v1513_v53, %v1505_v4  ;;  %v1515_v11 = vmul.f32 %v1513_v53, %v1506_v9  ;;  %vm1603_vm0 = vmand %vm490_vm12, %vm5502_vm2 }
 0x232   : > { %v1508_v23 = vpop.permute.xlu0 %1507  ;;  %vm1801_vm2 = vcmp.lt.s32.totalorder %v2995_v48, 78 }
 0x233   : > { %v1511_v32 = vsel %vm1504_vm15, %v1508_v23, %v1510_v60  ;;  %v1512_v43 = vsel %vm1504_vm15, %v1510_v60, %v1508_v23  ;;  %v1594_v23 = vstv %s2081_s22  ;;  %vm1612_vm15 = vcmp.lt.s32.totalorder %v2995_v48, 94 }
 0x234   : > { %v1517_v20 = vmul.f32 %v1516_v63, %v1511_v32  ;;  %v1518_v37 = vmul.f32 %v1516_v63, %v1512_v43  ;;  %v1597_v43 = vstv %s2130_s2 }
 0x235   : > { %v1530_v31 = vpop.permute.xlu1 %1529 }
 0x236   : > { %v1519_v38 = vadd.f32 %v1517_v20, %v1514_v21  ;;  %v1520_v59 = vadd.f32 %v1518_v37, %v1515_v11  ;;  %v1528_v34 = vpop.permute.xlu0 %1527 }
 0x237   : > { %v1532_v57 = vsel %vm1531_vm10, %v1528_v34, %v1530_v31  ;;  %v1533_v13 = vsel %vm1531_vm10, %v1530_v31, %v1528_v34 }
 0x238   : > { %v1523_v36 = vsel %vm445_vm7, %v1519_v38, 0.0  ;;  %v1524_v22 = vsel %vm1522_vm1, %v1520_v59, 0.0  ;;  %vm1630_vm1 = vmand %vm490_vm12, %vm5504_vm4 }
 0x239   : > { %v4649_v12 = vadd.f32 %v1523_v36, %v4537_v54  ;;  %v4652_v58 = vadd.f32 %v1524_v22, %v4539_v24  ;;  %v1537_v56 = vpop.permute.xlu1 %1536  ;;  %v1541_v54 = vmul.f32 %v1540_v7, %v1532_v57  ;;  %v1542_v24 = vmul.f32 %v1540_v7, %v1533_v13  ;;  %vm4862_vm4 = vmand %vm490_vm12, %vm508_vm13 }
 0x23a   : > { %v1535_v45 = vpop.permute.xlu0 %1534 }
 0x23b   : > { %v1538_v19 = vsel %vm1531_vm10, %v1535_v45, %v1537_v56  ;;  %v1539_v33 = vsel %vm1531_vm10, %v1537_v56, %v1535_v45  ;;  %vm5503_vm10 = vcmp.lt.s32.totalorder %v3027_v55, 15  ;;  %v1621_v45 = vstv %s2082_s11 }
 0x23c   : > { %v1544_v25 = vmul.f32 %v1543_v50, %v1538_v19  ;;  %v1545_v44 = vmul.f32 %v1543_v50, %v1539_v33  ;;  %v1624_v33 = vstv %s2131_s13 }
 0x23d   : > { %v1557_v26 = vpop.permute.xlu1 %1556 }
 0x23e   : > { %v1546_v14 = vadd.f32 %v1544_v25, %v1541_v54  ;;  %v1547_v2 = vadd.f32 %v1545_v44, %v1542_v24  ;;  %v1555_v3 = vpop.permute.xlu0 %1554 }
 0x23f   : > { %v1559_v16 = vsel %vm1558_vm8, %v1555_v3, %v1557_v26  ;;  %v1560_v17 = vsel %vm1558_vm8, %v1557_v26, %v1555_v3 }
 0x240   : > { %v1550_v10 = vsel %vm5501_vm9, %v1546_v14, 0.0  ;;  %v1551_v8 = vsel %vm1549_vm5, %v1547_v2, 0.0  ;;  %v1568_v35 = vmul.f32 %v1567_v29, %v1559_v16  ;;  %vm502_vm5 = vcmp.lt.s32.totalorder %v5435_v42, 208 }
 0x241   : > { %v4676_v18 = vadd.f32 %v1550_v10, %v4567_v51  ;;  %v4679_v61 = vadd.f32 %v1551_v8, %v4570_v47  ;;  %v1564_v39 = vpop.permute.xlu1 %1563  ;;  %v1569_v51 = vmul.f32 %v1567_v29, %v1560_v17  ;;  %vm1693_vm9 = vcmp.lt.s32.totalorder %v2995_v48, 82 }
 0x242   : > { %v1562_v52 = vpop.permute.xlu0 %1561 }
 0x243   : > { %v1565_v15 = vsel %vm1558_vm8, %v1562_v52, %v1564_v39  ;;  %v1566_v5 = vsel %vm1558_vm8, %v1564_v39, %v1562_v52  ;;  %vm1639_vm8 = vcmp.lt.s32.totalorder %v2995_v48, 93 }
 0x244   : > { %v1571_v49 = vmul.f32 %v1570_v27, %v1565_v15  ;;  %v1572_v40 = vmul.f32 %v1570_v27, %v1566_v5 }
 0x245   : > { %v1584_v47 = vpop.permute.xlu1 %1583 }
 0x246   : > { %v1573_v46 = vadd.f32 %v1571_v49, %v1568_v35  ;;  %v1574_v4 = vadd.f32 %v1572_v40, %v1569_v51  ;;  %v1582_v9 = vpop.permute.xlu0 %1581 }
 0x247   : > { %v1586_v28 = vsel %vm1585_vm11, %v1582_v9, %v1584_v47  ;;  %v1587_v6 = vsel %vm1585_vm11, %v1584_v47, %v1582_v9 }
 0x248   : > { %v1578_v53 = vsel %vm490_vm12, %v1574_v4, 0.0  ;;  %v4695_v60 = vadd.f32 %v1573_v46, %v4594_v0  ;;  %v1595_v37 = vmul.f32 %v1594_v23, %v1586_v28  ;;  %v1596_v0 = vmul.f32 %v1594_v23, %v1587_v6 }
 0x249   : > { %v4698_v63 = vadd.f32 %v1578_v53, %v4597_v30  ;;  %v1591_v32 = vpop.permute.xlu1 %1590  ;;  %v1648_v6 = vstv %s4747_s15  ;;  %v1651_v53 = vstv %s4749_s12  ;;  %v1675_v23 = vstv %s4753_s16 }
 0x24a   : > { %v1589_v21 = vpop.permute.xlu0 %1588 }
 0x24b   : > { %v1592_v11 = vsel %vm1585_vm11, %v1589_v21, %v1591_v32  ;;  %v1593_v20 = vsel %vm1585_vm11, %v1591_v32, %v1589_v21  ;;  %v1678_v32 = vstv %s4755_s8  ;;  %v1702_v21 = vstv %s4757_s23 }
 0x24c   : > { %v1598_v31 = vmul.f32 %v1597_v43, %v1592_v11  ;;  %v1599_v38 = vmul.f32 %v1597_v43, %v1593_v20  ;;  %v1705_v11 = vstv %s4759_s17  ;;  %v1729_v20 = vstv %s4761_s3 }
 0x24d   : > { %v1611_v30 = vpop.permute.xlu1 %1610  ;;  %vm1720_vm11 = vcmp.lt.s32.totalorder %v2995_v48, 81 }
 0x24e   : > { %v1600_v59 = vadd.f32 %v1598_v31, %v1595_v37  ;;  %v1601_v34 = vadd.f32 %v1599_v38, %v1596_v0  ;;  %v1609_v57 = vpop.permute.xlu0 %1608  ;;  %v1732_v37 = vstv %s4765_s4 }
 0x24f   : > { %v1613_v13 = vsel %vm1612_vm15, %v1609_v57, %v1611_v30  ;;  %v1614_v36 = vsel %vm1612_vm15, %v1611_v30, %v1609_v57  ;;  %v1756_v30 = vstv %s4769_s6 }
 0x250   : > { %v1604_v22 = vsel %vm5503_vm10, %v1600_v59, 0.0  ;;  %v1605_v7 = vsel %vm1603_vm0, %v1601_v34, 0.0  ;;  %v1622_v44 = vmul.f32 %v1621_v45, %v1613_v13  ;;  %v1623_v26 = vmul.f32 %v1621_v45, %v1614_v36  ;;  %vm4854_vm10 = vmand %vm502_vm5, %vm434_vm6 }
 0x251   : > { %v4716_v56 = vadd.f32 %v1604_v22, %v4622_v1  ;;  %v4719_v50 = vadd.f32 %v1605_v7, %v4625_v62  ;;  %v1618_v19 = vpop.permute.xlu1 %1617  ;;  %v1759_v59 = vstv %s4771_s30  ;;  %vm1747_vm0 = vcmp.lt.s32.totalorder %v2995_v48, 80 }
 0x252   : > { %v1616_v54 = vpop.permute.xlu0 %1615  ;;  %vm5510_vm6 = vcmp.ge.s32.totalorder %v3055_v41, 2 }
 0x253   : > { %v1619_v24 = vsel %vm1612_vm15, %v1616_v54, %v1618_v19  ;;  %v1620_v25 = vsel %vm1612_vm15, %v1618_v19, %v1616_v54  ;;  %vm1774_vm15 = vcmp.lt.s32.totalorder %v2995_v48, 79  ;;  %v1783_v19 = vstv %s4773_s9  ;;  %vm4883_vm12 = vmand %vm502_vm5, %vm5510_vm6 }
 0x254   : > { %v1625_v14 = vmul.f32 %v1624_v33, %v1619_v24  ;;  %v1626_v2 = vmul.f32 %v1624_v33, %v1620_v25 }
 0x255   : > { %v4729_v1 = vpop.permute.xlu1 %1637 }
 0x256   : > { %v1627_v62 = vadd.f32 %v1625_v14, %v1622_v44  ;;  %v1628_v3 = vadd.f32 %v1626_v2, %v1623_v26  ;;  %v4731_v16 = vpop.permute.xlu0 %1635 }
 0x257   : > { %v1640_v22 = vsel %vm1639_vm8, %v4731_v16, %v4729_v1  ;;  %v1641_v7 = vsel %vm1639_vm8, %v4729_v1, %v4731_v16  ;;  %v1786_v1 = vstv %s4780_s28 }
 0x258   : > { %v1631_v17 = vsel %vm495_vm3, %v1627_v62, 0.0  ;;  %v1632_v10 = vsel %vm1630_vm1, %v1628_v3, 0.0  ;;  %vm5509_vm1 = vcmp.ge.s32.totalorder %v3027_v55, 3 }
 0x259   : > { %v4736_v8 = vadd.f32 %v1631_v17, %v4649_v12  ;;  %v4739_v29 = vadd.f32 %v1632_v10, %v4652_v58  ;;  %v1645_v39 = vpop.permute.xlu1 %1644  ;;  %v1649_v10 = vmul.f32 %v1648_v6, %v1640_v22 }
 0x25a   : > { %v1643_v27 = vpop.permute.xlu0 %1642 }
 0x25b   : > { %v1646_v57 = vsel %vm1639_vm8, %v1643_v27, %v1645_v39  ;;  %v1647_v13 = vsel %vm1639_vm8, %v1645_v39, %v1643_v27  ;;  %v1650_v39 = vmul.f32 %v1648_v6, %v1641_v7  ;;  %vm5513_vm8 = vcmp.lt.s32.totalorder %v3027_v55, 13 }
 0x25c   : > { %v1652_v26 = vmul.f32 %v1651_v53, %v1646_v57  ;;  %v1653_v14 = vmul.f32 %v1651_v53, %v1647_v13  ;;  %v1840_v57 = vstv %s4817_s18 }
 0x25d   : > { %v1665_v52 = vpop.permute.xlu1 %1664 }
 0x25e   : > { %v1663_v15 = vpop.permute.xlu0 %1662  ;;  %v1654_v53 = vadd.f32 %v1652_v26, %v1649_v10 }
 0x25f   : > { %v1667_v31 = vsel %vm1666_vm14, %v1663_v15, %v1665_v52  ;;  %v1668_v45 = vsel %vm1666_vm14, %v1665_v52, %v1663_v15 }
 0x260   : > { %v1676_v33 = vmul.f32 %v1675_v23, %v1667_v31  ;;  %v1677_v62 = vmul.f32 %v1675_v23, %v1668_v45  ;;  %v4848_v23 = vadd.f32 %v1653_v14, %v1650_v39 }
 0x261   : > { %v1672_v5 = vpop.permute.xlu1 %1671 }
 0x262   : > { %v1670_v35 = vpop.permute.xlu0 %1669  ;;  %v1659_v26 = vsel %vm4862_vm4, %v4848_v23, 0.0 }
 0x263   : > { %v1673_v43 = vsel %vm1666_vm14, %v1670_v35, %v1672_v5  ;;  %v1674_v38 = vsel %vm1666_vm14, %v1672_v5, %v1670_v35  ;;  %v1810_v35 = vstv %s4791_s21  ;;  %vm1828_vm14 = vcmp.lt.s32.totalorder %v2995_v48, 77 }
 0x264   : > { %v1679_v36 = vmul.f32 %v1678_v32, %v1673_v43  ;;  %v1680_v54 = vmul.f32 %v1678_v32, %v1674_v38 }
 0x265   : > { %v4741_v51 = vpop.permute.xlu1 %1691 }
 0x266   : > { %v4743_v49 = vpop.permute.xlu0 %1689  ;;  %v1681_v3 = vadd.f32 %v1679_v36, %v1676_v33  ;;  %v1682_v15 = vadd.f32 %v1680_v54, %v1677_v62 }
 0x267   : > { %v1694_v16 = vsel %vm1693_vm9, %v4743_v49, %v4741_v51  ;;  %v1695_v17 = vsel %vm1693_vm9, %v4741_v51, %v4743_v49 }
 0x268   : > { %v1703_v49 = vmul.f32 %v1702_v21, %v1694_v16  ;;  %v1704_v6 = vmul.f32 %v1702_v21, %v1695_v17  ;;  %v1686_v7 = vsel %vm4854_vm10, %v1682_v15, 0.0  ;;  %vm5521_vm10 = vcmp.ge.s32.totalorder %v3055_v41, 1 }
 0x269   : > { %v1699_v40 = vpop.permute.xlu1 %1698  ;;  %v1688_v17 = vadd.f32 %v1686_v7, %v4698_v63 }
 0x26a   : > { %v1697_v47 = vpop.permute.xlu0 %1696 }
 0x26b   : > { %v1700_v24 = vsel %vm1693_vm9, %v1697_v47, %v1699_v40  ;;  %v1701_v25 = vsel %vm1693_vm9, %v1699_v40, %v1697_v47  ;;  %v1813_v40 = vstv %s4799_s20  ;;  %v1837_v47 = vstv %s4801_s14 }
 0x26c   : > { %v1706_v27 = vmul.f32 %v1705_v11, %v1700_v24  ;;  %v1707_v52 = vmul.f32 %v1705_v11, %v1701_v25  ;;  %v1685_v11 = vsel %vm5509_vm1, %v1681_v3, 0.0  ;;  %vm4973_vm1 = vmand %vm502_vm5, %vm5521_vm10 }
 0x26d   : > { %v4745_v46 = vpop.permute.xlu1 %1718  ;;  %v1687_v14 = vadd.f32 %v1685_v11, %v4695_v60 }
 0x26e   : > { %v4751_v12 = vpop.permute.xlu0 %1716  ;;  %v1708_v21 = vadd.f32 %v1706_v27, %v1703_v49  ;;  %v1709_v13 = vadd.f32 %v1707_v52, %v1704_v6 }
 0x270   : > { %v1712_v10 = vsel %vm445_vm7, %v1708_v21, 0.0  ;;  %v1713_v39 = vsel %vm4883_vm12, %v1709_v13, 0.0  ;;  %vm5514_vm7 = vcmp.lt.s32.totalorder %v3055_v41, 15 }
 0x271   : > { %v4763_v58 = vpop.permute.xlu1 %1725  ;;  %vm4937_vm9 = vmand %vm502_vm5, %vm5514_vm7  ;;  %v1714_v21 = vadd.f32 %v1712_v10, %v4716_v56 }
 0x272   : > { %v4767_v4 = vpop.permute.xlu0 %1723 }
 0x273   : > { %v1727_v33 = vsel %vm1720_vm11, %v4767_v4, %v4763_v58  ;;  %v1728_v60 = vsel %vm1720_vm11, %v4763_v58, %v4767_v4 }
 0x274   : > { %v1733_v27 = vmul.f32 %v1732_v37, %v1727_v33  ;;  %v1715_v33 = vadd.f32 %v1713_v39, %v4719_v50 }
 0x275   : > { %v4775_v9 = vpop.permute.xlu1 %1745 }
 0x276   : > { %v4778_v28 = vpop.permute.xlu0 %1743 }
 0x279   : > { %v4797_v0 = vpop.permute.xlu1 %1752 }
 0x27a   : > { %v4809_v34 = vpop.permute.xlu0 %1750 }
 0x27d   : > { %v1773_v44 = vpop.permute.xlu1 %1772 }
 0x27e   : > { %v1771_v2 = vpop.permute.xlu0 %1770 }
 0x27f   : > { %v1775_v36 = vsel %vm1774_vm15, %v1771_v2, %v1773_v44  ;;  %v1776_v22 = vsel %vm1774_vm15, %v1773_v44, %v1771_v2  ;;  %v4893_v44 = vsel %vm5513_vm8, %v1654_v53, 0.0  ;;  %v1721_v2 = vsel %vm1720_vm11, %v4751_v12, %v4745_v46 }
 0x280   : > { %v1784_v3 = vmul.f32 %v1783_v19, %v1775_v36  ;;  %v1785_v16 = vmul.f32 %v1783_v19, %v1776_v22  ;;  %v1730_v4 = vmul.f32 %v1729_v20, %v1721_v2  ;;  %v1734_v19 = vmul.f32 %v1732_v37, %v1728_v60 }
 0x281   : > { %v1780_v5 = vpop.permute.xlu1 %1779  ;;  %v1755_v37 = vsel %vm1747_vm0, %v4797_v0, %v4809_v34 }
 0x282   : > { %v1778_v32 = vpop.permute.xlu0 %1777  ;;  %v1735_v13 = vadd.f32 %v1733_v27, %v1730_v4  ;;  %v1761_v22 = vmul.f32 %v1759_v59, %v1755_v37 }
 0x283   : > { %v1781_v31 = vsel %vm1774_vm15, %v1778_v32, %v1780_v5  ;;  %v1782_v38 = vsel %vm1774_vm15, %v1780_v5, %v1778_v32  ;;  %v1749_v5 = vsel %vm1747_vm0, %v4775_v9, %v4778_v28  ;;  %vm5518_vm15 = vcmp.lt.s32.totalorder %v3055_v41, 14 }
 0x284   : > { %v1787_v54 = vmul.f32 %v1786_v1, %v1781_v31  ;;  %v1788_v24 = vmul.f32 %v1786_v1, %v1782_v38  ;;  %v1722_v1 = vsel %vm1720_vm11, %v4745_v46, %v4751_v12  ;;  %vm5517_vm11 = vcmp.lt.s32.totalorder %v3027_v55, 15 }
 0x285   : > { %v1800_v25 = vpop.permute.xlu1 %1799  ;;  %v1731_v63 = vmul.f32 %v1729_v20, %v1722_v1  ;;  %v1754_v20 = vsel %vm1747_vm0, %v4809_v34, %v4797_v0 }
 0x286   : > { %v1798_v62 = vpop.permute.xlu0 %1797  ;;  %v1789_v52 = vadd.f32 %v1787_v54, %v1784_v3  ;;  %v1790_v15 = vadd.f32 %v1788_v24, %v1785_v16  ;;  %v1748_v24 = vsel %vm1747_vm0, %v4778_v28, %v4775_v9  ;;  %v1760_v2 = vmul.f32 %v1759_v59, %v1754_v20 }
 0x287   : > { %v1802_v46 = vsel %vm1801_vm2, %v1798_v62, %v1800_v25  ;;  %v1803_v12 = vsel %vm1801_vm2, %v1800_v25, %v1798_v62  ;;  %v1758_v25 = vmul.f32 %v1756_v30, %v1749_v5  ;;  %vm5524_vm0 = vcmp.ge.s32.totalorder %v3027_v55, 1 }
 0x288   : > { %v1811_v32 = vmul.f32 %v1810_v35, %v1802_v46  ;;  %v1812_v11 = vmul.f32 %v1810_v35, %v1803_v12  ;;  %v1793_v36 = vsel %vm5517_vm11, %v1789_v52, 0.0  ;;  %v1794_v0 = vsel %vm4937_vm9, %v1790_v15, 0.0 }
 0x289   : > { %v1807_v58 = vpop.permute.xlu1 %1806  ;;  %v1795_v62 = vadd.f32 %v1793_v36, %v1687_v14  ;;  %v1796_v50 = vadd.f32 %v1794_v0, %v1688_v17  ;;  %v1739_v14 = vsel %vm5524_vm0, %v1735_v13, 0.0  ;;  %v1757_v10 = vmul.f32 %v1756_v30, %v1748_v24  ;;  %v5526_v36 = vld [vmem:[#allocation30_spill] sm:$0xff] }
 0x28a   : > { %v1805_v51 = vpop.permute.xlu0 %1804  ;;  %v1763_v39 = vadd.f32 %v1761_v22, %v1758_v25  ;;  %v2500_v55 = vmov 1966171168   ;;  %v5527_v22 = vlaneseq }
 0x28b   : > { %v1808_v49 = vsel %vm1801_vm2, %v1805_v51, %v1807_v58  ;;  %v1809_v6 = vsel %vm1801_vm2, %v1807_v58, %v1805_v51  ;;  %vm4962_vm2 = vmand %vm502_vm5, %vm5518_vm15  ;;  %v1762_v5 = vadd.f32 %v1760_v2, %v1757_v10  ;;  %v1660_v51 = vadd.f32 %v4893_v44, %v4676_v18 }
 0x28c   : > { %v1814_v31 = vmul.f32 %v1813_v40, %v1808_v49  ;;  %v1815_v38 = vmul.f32 %v1813_v40, %v1809_v6  ;;  %v1736_v40 = vadd.f32 %v1734_v19, %v1731_v63  ;;  %v1767_v30 = vsel %vm502_vm5, %v1763_v39, 0.0 }
 0x28d   : > { %v1827_v35 = vpop.permute.xlu1 %1826  ;;  %v1768_v37 = vadd.f32 %v1762_v5, %v1660_v51 }
 0x28e   : > { %v1816_v56 = vadd.f32 %v1814_v31, %v1811_v32  ;;  %v1817_v7 = vadd.f32 %v1815_v38, %v1812_v11  ;;  %v1825_v45 = vpop.permute.xlu0 %1824  ;;  %v1740_v17 = vsel %vm4973_vm1, %v1736_v40, 0.0 }
 0x28f   : > { %v1829_v9 = vsel %vm1828_vm14, %v1825_v45, %v1827_v35  ;;  %v1830_v28 = vsel %vm1828_vm14, %v1827_v35, %v1825_v45  ;;  %v1742_v41 = vadd.f32 %v1740_v17, %v4739_v29 }
 0x290   : > { %v1820_v1 = vsel %vm495_vm3, %v1816_v56, 0.0  ;;  %v1821_v60 = vsel %vm4962_vm2, %v1817_v7, 0.0  ;;  %v1838_v58 = vmul.f32 %v1837_v47, %v1829_v9  ;;  %v1839_v4 = vmul.f32 %v1837_v47, %v1830_v28  ;;  %vm1846_vm3 = vmand %vm502_vm5, %vm508_vm13 }
 0x291   : > { %v1822_v3 = vadd.f32 %v1820_v1, %v1714_v21  ;;  %v1823_v16 = vadd.f32 %v1821_v60, %v1715_v33  ;;  %v1834_v59 = vpop.permute.xlu1 %1833  ;;  %v1661_v47 = vadd.f32 %v1659_v26, %v4679_v61  ;;  %vm5525_vm13 = vmmov %vm5513_vm8  ;;  %v1873_v26 = vunpack.c.l.s4 %v2500_v55 }
 0x292   : > { %v1832_v27 = vpop.permute.xlu0 %1831  ;;  %vm1889_vm5 = vcmp.lt.s32.totalorder %v5527_v22, 256 }
 0x293   : > { %v1853_v52 = vadd.f32 %v1822_v3, %v1795_v62  ;;  %v1854_v15 = vadd.f32 %v1823_v16, %v1796_v50  ;;  %v1835_v46 = vsel %vm1828_vm14, %v1832_v27, %v1834_v59  ;;  %v1836_v12 = vsel %vm1828_vm14, %v1834_v59, %v1832_v27 }
 0x294   : > { %v1841_v63 = vmul.f32 %v1840_v57, %v1835_v46  ;;  %v1842_v19 = vmul.f32 %v1840_v57, %v1836_v12  ;;  %v1741_v57 = vadd.f32 %v1739_v14, %v4736_v8  ;;  %v1769_v49 = vadd.f32 %v1767_v30, %v1661_v47 }
 0x295   : > { %v1874_v21 = vunpack.c.0.s8 %v1873_v26 }
 0x296   : > { %v1843_v53 = vadd.f32 %v1841_v63, %v1838_v58  ;;  %v1844_v48 = vadd.f32 %v1842_v19, %v1839_v4 }
 0x297   : > { %v1877_v0 = vsub.s32 %v1874_v21, %v5526_v36 }
 0x298   : > { %v1847_v20 = vsel %vm5525_vm13, %v1843_v53, 0.0  ;;  %v1848_v42 = vsel %vm1846_vm3, %v1844_v48, 0.0 }
 0x299   : > { %v1849_v6 = vadd.f32 %v1847_v20, %v1741_v57  ;;  %v1850_v32 = vadd.f32 %v1848_v42, %v1742_v41 }
 0x29b   : > { %v1851_v11 = vadd.f32 %v1849_v6, %v1768_v37  ;;  %v1852_v18 = vadd.f32 %v1850_v32, %v1769_v49 }
 0x29d   : > { %v1855_v44 = vadd.f32 %v1853_v52, %v1851_v11  ;;  %v1856_v31 = vadd.f32 %v1854_v15, %v1852_v18 }
 0x29f   : > { %v2140_v43 = vmul.f32 -1.442695, %v1855_v44  ;;  %v2141_v38 = vmul.f32 -1.442695, %v1856_v31 }
 0x2a1   : > { %2292 = vpow2.f32 %v2140_v43 }
 0x2a2   : > { %2294 = vpow2.f32 %v2141_v38 }
 0x2ab   : > { %v2293_v61 = vpop.eup %2292 }
 0x2ac   : > { %v2295_v8 = vpop.eup %2294  ;;  %v1863_v23 = vadd.f32 1.0, %v2293_v61 }
 0x2ad   : > { %v1864_v29 = vadd.f32 1.0, %v2295_v8 }
 0x2ae   : > { %2296 = vrcp.f32 %v1863_v23 }
 0x2af   : > { %2298 = vrcp.f32 %v1864_v29 }
 0x2b8   : > { %v2297_v13 = vpop.eup %2296 }
 0x2b9   : > { %v2299_v34 = vpop.eup %2298 }
 0x2ba   : > { %v1871_v35 = vcombine.low %v2297_v13, %v2299_v34 }
 0x2bc   : > { %v1878_v40 = vrot.slane %v1871_v35, %v1877_v0 }
 0x2be   : > { %v1885_v56 = vrot.slane %v1878_v40, %v1877_v0 }
 0x2c0   : > { %1891 = vst.msk [vmem:[#allocation4] sm:$0x3] %vm1889_vm5, %v1885_v56 }
 0x2c1 PF: > { %s5528_s19 = sld [smem:[#allocation17_spill]] }
 0x2c7   : > { %p2142_p0 = scmp.ne.s32.totalorder %s5528_s19, 1 }
 0x2c8   : > { %v1897_v7 = vlaneseq (!%p2142_p0)  ;;  %s5529_s26 = sld [smem:[#allocation29_spill]] (!%p2142_p0)  ;;  %v1895_v33 = vld [vmem:[#allocation4] sm:$0x3] (!%p2142_p0)  ;;  %v5530_v50 = vld [vmem:[#allocation28_spill] sm:$0xff] (!%p2142_p0) }
 0x2c9   : > { %1894 = sbr.rel (%p2142_p0) target bundleno = 725 (0x2d5), region = 52 }
 0x2ca   : > { %v1898_v45 = vshrl.u32 (!%p2142_p0), %v1897_v7, 7 }
 0x2cc   : > { %v1899_v54 = vsub.s32 (!%p2142_p0), 0, %v1898_v45  ;;  %v1903_v24 = vsub.s32 (!%p2142_p0), 1, %v1898_v45 }
 0x2ce   : > { %v1900_v25 = vrot.slane (!%p2142_p0), %v1895_v33, %v1899_v54  ;;  %v1904_v2 = vrot.slane (!%p2142_p0), %v1895_v33, %v1903_v24 }
 0x2d0   : > { %v1905_v62 = vcombine.low %v1900_v25, %v1904_v2 }
 0x2d2   : > { %v1907_v1 = vmul.f32 %v1905_v62, %v5530_v50 }
 0x2d4   : > { %1908 = vst [vmem:[%s5529_s26] sm:$0xff] %v1907_v1 }
 0x2d5 PF: > { %s5531_s25 = sld [smem:[#allocation18_spill]]  ;;  %s5532_s29 = sld [smem:[#allocation29_spill]] }
 0x2d6   : > { %s5533_s0 = sld [smem:[#allocation27_spill]]  ;;  %s5534_s10 = sld [smem:[#allocation24_spill]] }
 0x2d7   : > { %s5535_s7 = sld [smem:[#allocation76_spill]]  ;;  %s2501_s13 = smov [#allocation10]  }
 0x2d8   : > { %s2347_s15 = sshll.u32 %s2501_s13, 4  ;;  %s2348_s15 = int_to_ptr.vmem [resolvable:$false] %s2347_s15 }
 0x2d9   : > { %s2349_s12 = scalar_lea.vmem %s2348_s15, 256 }
 0x2db   : > { %s2150_s24 = sshll.u32 %s5531_s25, 7  ;;  %s1927_s22 = sshll.u32 %s5532_s29, 4  ;;  %s1928_s22 = int_to_ptr.vmem [resolvable:$true] %s1927_s22 }
 0x2dc   : > { %s1910_s2 = scalar_lea.sflag [#allocation7], %s5533_s0  ;;  %s2343_s11 = scalar_lea.vmem %s1928_s22, 128 }
 0x2dd   : > { %s5037_s27 = scalar_lea.hbm %s5535_s7, %s2150_s24  ;;  %p2344_p2 = scmp.ne.s32.totalorder %s1928_s22, %s2343_s11 }
 0x2de   : > { %p5536_p7 = scmp.ne.s32.totalorder %s5534_s10, 0  ;;  %p2350_p11 = scmp.lt.s32.totalorder %s1928_s22, %s2348_s15 }
 0x2df   : > { %p2351_p9 = scmp.lt.s32.totalorder %s2349_s12, %s2343_s11 }
 0x2e0   : > { %p2345_p12 = pnand %p2344_p2, %p5536_p7 }
 0x2e1   : > { %p2352_p13 = por %p2351_p9, %p2350_p11 }
 0x2e2   : > { %p2346_p10 = pneg %p2345_p12 }
 0x2e4   : > { %p2353_p3 = pnand %p2352_p13, %p2346_p10 }
 0x2e6   : > { %2356 = shalt.err (!%p2353_p3)
}
 0x2e7   : > { %s2357_s16 = scalar_lea.hbm %s5037_s27, 128  ;;  %s2361_s17 = scalar_lea.hbm %s5535_s7, 256 }
 0x2e8   : > { %p2358_p5 = scmp.ne.s32.totalorder %s5037_s27, %s2357_s16  ;;  %p2362_p4 = scmp.lt.u32.totalorder %s5037_s27, %s5535_s7 }
 0x2e9   : > { %p2363_p8 = scmp.lt.u32.totalorder %s2361_s17, %s2357_s16  ;;  %p2365_p2 = scmp.lt.u32.totalorder %s2357_s16, %s5037_s27 }
 0x2ea   : > { %p2359_p6 = pnand %p2358_p5, %p5536_p7 }
 0x2eb   : > { %p2364_p0 = por %p2363_p8, %p2362_p4 }
 0x2ec   : > { %p2360_p1 = pneg %p2359_p6 }
 0x2ed   : > { %p2366_p12 = por %p2365_p2, %p2364_p0 }
 0x2ef   : > { %p2367_p10 = pnand %p2366_p12, %p2360_p1 }
 0x2f1   : > { %2370 = shalt.err (!%p2367_p10)
}
 0x2f2   : > { %2157 = dma.vmem_to_hbm [thread:$0]  (%p5536_p7), %s1928_s22, 128, %s5037_s27, %s1910_s2  }
 0x2f3 PF: > { %s5537_s6 = sld [smem:[#allocation21_spill]]  ;;  %s5538_s30 = sld [smem:[#allocation14_spill]] }
 0x2f4   : > { %s5539_s9 = sld [smem:[#allocation22_spill]] }
 0x2f9   : > { %p2174_p11 = scmp.ge.s32.totalorder %s5537_s6, 2  ;;  %s1939_s28 = sand.u32 1, %s5538_s30  }
 0x2fa   : > { %p5540_p9 = scmp.ne.s32.totalorder %s5539_s9, 0  ;;  %s1940_s21 = scalar_lea.sflag [#allocation7], %s1939_s28 }
 0x2fc   : > { %p2168_p13 = pnand %p2174_p11, %p5540_p9 }
 0x2fe   : > { %2412 = dma.done.wait (!%p2168_p13), %s1940_s21, 128  }
 0x2ff   : > { %2414 = vsyncadd (!%p2168_p13), %s1940_s21, 4294967168  ;;  %s19_s16 = sadd.s32 1, %s5537_s6   ;;  %s5541_s9 = sld [smem:[#allocation15_spill]] }
 0x300   : > { %p16_p3 = scmp.ge.s32.totalorder %s19_s16, 6   ;;  %s5542_s10 = sld [smem:[#allocation16_spill]] }
 0x301   : > { %s5543_s11 = sld [smem:[#allocation26_spill]]  ;;  %s5544_s12 = sld [smem:[#allocation19_spill]] }
 0x302   : > { %s5545_s13 = sld [smem:[#allocation20_spill]]  ;;  %s5546_s14 = sld [smem:[#allocation23_spill]] }
 0x303   : > { %s5547_s15 = sld [smem:[#allocation25_spill]]  ;;  %18 = sbr.rel (!%p16_p3) target bundleno = 12 (0xc), region = 94 }
 0x30a   :  { %1945 = vsyncpa [#allocation6], 1 }
 0x30b   :  { %1947 = vsyncpa [#allocation6 + $0x1], 1 }
 0x30c   :  { %1948 = vsyncpa [#allocation7], 1 }
 0x30d   :  { %1950 = vsyncpa [#allocation7 + $0x1], 1 }
 0x30e   :  { %1951 = vsyncpa [#allocation8], 1 }
 0x30f   :  { %1953 = vsyncpa [#allocation8 + $0x1], 1 }

</bundles_post_ra>
